<compile_context>
chip_gen: v7x
topology: tpu7x:2x2x1
jax: 0.10.0
libtpu: 0.0.40
codegen_flags: <defaults>
</compile_context>

<pallas_src>
import functools

import jax
import jax.numpy as jnp
from jax.experimental import pallas as pl
from jax.experimental.pallas import tpu as pltpu

_EPS = 1e-5              # PyTorch InstanceNorm2d default (affine=False)
_IM2COL_MAX_C = 32       # below this, one K=9C matmul beats 9 tiny dots
_TARGET_K = 256          # v6e/v7x MXU systolic depth
_FORCE_BF16_MATMUL = False  # set True to use bf16 MXU operands for f32 inputs


def _round_up(x, m):
    return (x + m - 1) // m * m


def _tap_group(C):
    """Taps per dot so K = group*C approaches the MXU depth."""
    if C < _IM2COL_MAX_C:
        return 9                      # im2col fallback path (unused group)
    return max(1, min(9, _TARGET_K // C))


# ----------------------------- kernel helpers --------------------------------
def _reflect_pad_into(xp_ref, a, H, W):
    """Write ReflectionPad2d(1) of `a` (H, W, C) into xp_ref (H+2, >=W+2, C)."""
    xp_ref[1:H + 1, 1:W + 1, :] = a
    xp_ref[0:1, 1:W + 1, :] = a[1:2]                     # top row    <- row 1
    xp_ref[H + 1:H + 2, 1:W + 1, :] = a[H - 2:H - 1]     # bottom row <- row H-2
    # Columns (incl. corners) reflect the already-padded rows.
    xp_ref[:, 0:1, :] = xp_ref[:, 2:3, :]
    xp_ref[:, W + 1:W + 2, :] = xp_ref[:, W - 1:W, :]


def _conv3x3(xp_ref, w_ref, col_ref, H, W, C, group):
    """3x3 VALID conv on the padded scratch -> (H*W, C_out) f32.

    col_ref is None  -> grouped per-tap accumulation straight from shifted
                        ref views (no materialized im2col).
    col_ref not None -> tiny-C fallback: build (H*W, 9C) im2col once, one
                        K=9C MXU matmul.
    """
    if col_ref is not None:
        for t in range(9):
            dy, dx = divmod(t, 3)
            col_ref[:, t * C:(t + 1) * C] = (
                xp_ref[dy:dy + H, dx:dx + W, :].reshape(H * W, C))
        return jnp.dot(col_ref[...], w_ref[...],
                       preferred_element_type=jnp.float32)

    acc = None
    for t0 in range(0, 9, group):
        t1 = min(t0 + group, 9)
        wins = []
        for t in range(t0, t1):
            dy, dx = divmod(t, 3)
            wins.append(xp_ref[dy:dy + H, dx:dx + W, :].reshape(H * W, C))
        lhs = wins[0] if len(wins) == 1 else jnp.concatenate(wins, axis=1)
        part = jnp.dot(lhs, w_ref[t0 * C:t1 * C, :],
                       preferred_element_type=jnp.float32)
        acc = part if acc is None else acc + part
    return acc


def _instance_norm(y):
    """Single-pass InstanceNorm over the spatial axis of an (H*W, C) tile."""
    inv_n = 1.0 / y.shape[0]
    mean = jnp.sum(y, axis=0, keepdims=True) * inv_n
    var = jnp.sum(y * y, axis=0, keepdims=True) * inv_n - mean * mean
    var = jnp.maximum(var, 0.0)       # guard f32 rounding -> negative -> NaN
    return (y - mean) * jax.lax.rsqrt(var + _EPS)


# --------------------------------- kernel -------------------------------------
def resnet_block_kernel(x_ref, w1_ref, w2_ref, out_ref, xp_ref, *col_scratch,
                        H, W, C, group):
    """Fused: pad->conv1->IN->ReLU->pad->conv2->IN + residual, one image."""
    col_ref = col_scratch[0] if col_scratch else None
    cdt = xp_ref.dtype

    # conv1 -> InstanceNorm -> ReLU   (intermediate never leaves VMEM/vregs)
    _reflect_pad_into(xp_ref, x_ref[0].astype(cdt), H, W)
    y = _conv3x3(xp_ref, w1_ref, col_ref, H, W, C, group)
    y = jnp.maximum(_instance_norm(y), 0.0)

    # conv2 -> InstanceNorm   (re-pad the intermediate entirely in VMEM)
    _reflect_pad_into(xp_ref, y.astype(cdt).reshape(H, W, C), H, W)
    y = _conv3x3(xp_ref, w2_ref, col_ref, H, W, C, group)
    y = _instance_norm(y)

    # Residual: re-read the VMEM-resident input block late (short live range).
    y = y + x_ref[0].astype(jnp.float32).reshape(H * W, C)
    out_ref[0] = y.reshape(H, W, C).astype(out_ref.dtype)


# -------------------------------- wrapper --------------------------------------
@jax.jit
def resnet_block(x_nchw, w1, b1, w2, b2):
    """ResnetBlock forward. x_nchw: (N, C, H, W); conv weights in HWIO."""
    # b1/b2 accepted for parity with nn.Conv2d but NOT used: a per-channel
    # bias is cancelled exactly by the following InstanceNorm(affine=False).
    # Do NOT reuse this kernel with affine IN or without the norm.
    del b1, b2

    # NCHW -> NHWC so channels sit on the lane axis.
    # TODO(synk): keep activations NHWC end-to-end in the surrounding network
    # so these boundary transposes (a full HBM pass each) are hoisted out.
    x = jnp.transpose(x_nchw, (0, 2, 3, 1))
    N, H, W, C = x.shape
    Hp = H + 2
    Wp = _round_up(W + 2, 8)          # sublane-aligned padded-scratch width

    # bf16 MXU operands run at full MXU rate; for f32 inputs this is gated by
    # _FORCE_BF16_MATMUL so the 1e-3 tolerance of the check is respected.
    cdt = (jnp.bfloat16
           if (x.dtype == jnp.bfloat16 or _FORCE_BF16_MATMUL) else x.dtype)

    # HWIO (3,3,Cin,Cout) -> (9C, C); rows ordered (dy, dx, cin) to match the
    # in-kernel tap order.
    w1f = w1.reshape(9 * C, C).astype(cdt)
    w2f = w2.reshape(9 * C, C).astype(cdt)

    use_col = C < _IM2COL_MAX_C
    group = _tap_group(C)

    scratch_shapes = [pltpu.VMEM((Hp, Wp, C), cdt)]     # padded tile (reused x2)
    if use_col:
        scratch_shapes.append(pltpu.VMEM((H * W, 9 * C), cdt))  # tiny-C im2col

    # VMEM budget from the actual buffers (double-buffered blocks) + headroom,
    # capped by the device's physical VMEM (gen-aware: 64 MiB on v7x, 128 MiB
    # on v5e/v6e).
    a_it = jnp.dtype(x.dtype).itemsize
    c_it = jnp.dtype(cdt).itemsize
    need = (2 * 2 * H * W * C * a_it                 # in + out blocks, 2-deep
            + 2 * 2 * 9 * C * C * c_it               # both weights, 2-deep
            + Hp * Wp * C * c_it                     # padded scratch
            + (H * W * 9 * C * c_it if use_col else 0)
            + 2 * H * W * C * 4)                     # f32 accumulator headroom
    try:
        phys = int(getattr(pltpu.get_tpu_info(), "vmem_capacity_bytes", 0))
    except Exception:
        phys = 0
    cap = int(phys * 0.85) if phys else (100 << 20)
    vmem_limit = min(max(2 * need, 32 << 20), cap)

    # TODO(synk): for production sizes on v7x (64 MiB VMEM, 2 TCs) add a
    # spatial row-tile grid axis with a 1-row halo and a two-pass InstanceNorm
    # (sum/sumsq accumulated over an "arbitrary" axis), so the working set
    # stays <= ~24 MiB and small-N batches still fill both TensorCores.
    # TODO(synk): for C < 128 a transposed (C, H*W) compute layout would make
    # every VPU op and the output store lane-dense; kept channels-on-lanes
    # here because the required (H,W)->(H*W) lane-merge relayouts are not
    # reliably supported by the lowering.
    # TODO(synk): pipeline_mode=pl.Buffered(1) on the constant weight blocks
    # would save 2*9*C*C*dtype bytes of VMEM under v7x's budget.
    kernel = functools.partial(resnet_block_kernel, H=H, W=W, C=C, group=group)
    out = pl.pallas_call(
        kernel,
        out_shape=jax.ShapeDtypeStruct((N, H, W, C), x.dtype),
        grid=(N,),
        in_specs=[
            pl.BlockSpec((1, H, W, C), lambda n: (n, 0, 0, 0)),
            pl.BlockSpec((9 * C, C), lambda n: (0, 0)),
            pl.BlockSpec((9 * C, C), lambda n: (0, 0)),
        ],
        out_specs=pl.BlockSpec((1, H, W, C), lambda n: (n, 0, 0, 0)),
        scratch_shapes=scratch_shapes,
        compiler_params=pltpu.CompilerParams(
            dimension_semantics=("parallel",),       # megacore-shard over batch
            vmem_limit_bytes=vmem_limit,
        ),
    )(x, w1f, w2f)
    return jnp.transpose(out, (0, 3, 1, 2))          # NHWC -> NCHW


# ------------------------- pure-JAX reference ----------------------------------
def _ref_resnet_block(x_nchw, w1, b1, w2, b2):
    x = jnp.transpose(x_nchw, (0, 2, 3, 1))

    def conv_in(a, w, b):
        ap = jnp.pad(a, ((0, 0), (1, 1), (1, 1), (0, 0)), mode="reflect")
        y = jax.lax.conv_general_dilated(
            ap.astype(jnp.float32), w.astype(jnp.float32),
            window_strides=(1, 1), padding="VALID",
            dimension_numbers=("NHWC", "HWIO", "NHWC"))
        y = y + b.astype(jnp.float32)        # bias kept here on purpose:
        mean = jnp.mean(y, axis=(1, 2), keepdims=True)   # IN cancels it.
        var = jnp.mean((y - mean) ** 2, axis=(1, 2), keepdims=True)
        return (y - mean) * jax.lax.rsqrt(var + _EPS)

    h = jnp.maximum(conv_in(x, w1, b1), 0.0)
    out = x + conv_in(h, w2, b2)
    return jnp.transpose(out, (0, 3, 1, 2)).astype(x_nchw.dtype)


# ---------------------------------- main ----------------------------------------
if __name__ == "__main__":
    N, DIM, H, W = 2, 4, 16, 16
    key = jax.random.PRNGKey(0)
    kx, kw1, kb1, kw2, kb2 = jax.random.split(key, 5)

    x = jax.random.normal(kx, (N, DIM, H, W), dtype=jnp.float32)
    # Conv weights stored directly in HWIO (3, 3, C_in, C_out); deterministic.
    w1 = 0.1 * jax.random.normal(kw1, (3, 3, DIM, DIM), dtype=jnp.float32)
    b1 = 0.1 * jax.random.normal(kb1, (DIM,), dtype=jnp.float32)
    w2 = 0.1 * jax.random.normal(kw2, (3, 3, DIM, DIM), dtype=jnp.float32)
    b2 = 0.1 * jax.random.normal(kb2, (DIM,), dtype=jnp.float32)

    out = jax.block_until_ready(resnet_block(x, w1, b1, w2, b2))
    ref = jax.block_until_ready(_ref_resnet_block(x, w1, b1, w2, b2))

    assert out.shape == (N, DIM, H, W)
    assert jnp.allclose(out, ref, atol=1e-3, rtol=1e-3), float(
        jnp.max(jnp.abs(out - ref)))
    print("KERNEL_OK")
</pallas_src>

<mosaic_0001>
module attributes {stable_mosaic.version = 11 : i64} {
  func.func @resnet_block_kernel(%arg0: i32, %arg1: memref<1x16x16x4xf32, #tpu.memory_space<vmem>>, %arg2: memref<36x4xf32, #tpu.memory_space<vmem>>, %arg3: memref<36x4xf32, #tpu.memory_space<vmem>>, %arg4: memref<1x16x16x4xf32, #tpu.memory_space<vmem>>, %arg5: memref<18x24x4xf32, #tpu.memory_space<vmem>>, %arg6: memref<256x36xf32, #tpu.memory_space<vmem>>) attributes {dimension_semantics = [#tpu.dimension_semantics<parallel>], iteration_bounds = array<i64: 2>, scalar_prefetch = 0 : i64, scratch_operands = 2 : i64, tpu.core_type = #tpu.core_type<tc>, window_params = [{transform_indices = @transform_0, window_bounds = array<i64: 1, 16, 16, 4>}, {pipeline_mode = #tpu.pipeline_mode<synchronous>, transform_indices = @transform_1, window_bounds = array<i64: 36, 4>}, {pipeline_mode = #tpu.pipeline_mode<synchronous>, transform_indices = @transform_2, window_bounds = array<i64: 36, 4>}, {transform_indices = @transform_3, window_bounds = array<i64: 1, 16, 16, 4>}]} {
    %c0 = arith.constant 0 : index
    %c0_0 = arith.constant 0 : index
    %c0_1 = arith.constant 0 : index
    %c0_2 = arith.constant 0 : index
    %0 = vector.load %arg1[%c0, %c0_0, %c0_1, %c0_2] : memref<1x16x16x4xf32, #tpu.memory_space<vmem>>, vector<1x16x16x4xf32>
    %1 = vector.shape_cast %0 : vector<1x16x16x4xf32> to vector<16x16x4xf32>
    %c1 = arith.constant 1 : index
    %c1_3 = arith.constant 1 : index
    %c0_4 = arith.constant 0 : index
    %2 = vector.load %arg5[%c1, %c1_3, %c0_4] : memref<18x24x4xf32, #tpu.memory_space<vmem>>, vector<16x16x4xf32>
    tpu.vector_store %arg5[%c1, %c1_3, %c0_4], %1 {strides = array<i32>} : memref<18x24x4xf32, #tpu.memory_space<vmem>>, vector<16x16x4xf32>,
    %3 = vector.extract_strided_slice %1 {offsets = [1, 0, 0], sizes = [1, 16, 4], strides = [1, 1, 1]} : vector<16x16x4xf32> to vector<1x16x4xf32>
    %c0_5 = arith.constant 0 : index
    %c1_6 = arith.constant 1 : index
    %c0_7 = arith.constant 0 : index
    %4 = vector.load %arg5[%c0_5, %c1_6, %c0_7] : memref<18x24x4xf32, #tpu.memory_space<vmem>>, vector<1x16x4xf32>
    tpu.vector_store %arg5[%c0_5, %c1_6, %c0_7], %3 {strides = array<i32>} : memref<18x24x4xf32, #tpu.memory_space<vmem>>, vector<1x16x4xf32>,
    %5 = vector.extract_strided_slice %1 {offsets = [14, 0, 0], sizes = [1, 16, 4], strides = [1, 1, 1]} : vector<16x16x4xf32> to vector<1x16x4xf32>
    %c17 = arith.constant 17 : index
    %c1_8 = arith.constant 1 : index
    %c0_9 = arith.constant 0 : index
    %6 = vector.load %arg5[%c17, %c1_8, %c0_9] : memref<18x24x4xf32, #tpu.memory_space<vmem>>, vector<1x16x4xf32>
    tpu.vector_store %arg5[%c17, %c1_8, %c0_9], %5 {strides = array<i32>} : memref<18x24x4xf32, #tpu.memory_space<vmem>>, vector<1x16x4xf32>,
    %c0_10 = arith.constant 0 : index
    %c2 = arith.constant 2 : index
    %c0_11 = arith.constant 0 : index
    %7 = vector.load %arg5[%c0_10, %c2, %c0_11] : memref<18x24x4xf32, #tpu.memory_space<vmem>>, vector<18x1x4xf32>
    %c0_12 = arith.constant 0 : index
    %c0_13 = arith.constant 0 : index
    %c0_14 = arith.constant 0 : index
    %8 = vector.load %arg5[%c0_12, %c0_13, %c0_14] : memref<18x24x4xf32, #tpu.memory_space<vmem>>, vector<18x1x4xf32>
    tpu.vector_store %arg5[%c0_12, %c0_13, %c0_14], %7 {strides = array<i32>} : memref<18x24x4xf32, #tpu.memory_space<vmem>>, vector<18x1x4xf32>,
    %c0_15 = arith.constant 0 : index
    %c15 = arith.constant 15 : index
    %c0_16 = arith.constant 0 : index
    %9 = vector.load %arg5[%c0_15, %c15, %c0_16] : memref<18x24x4xf32, #tpu.memory_space<vmem>>, vector<18x1x4xf32>
    %c0_17 = arith.constant 0 : index
    %c17_18 = arith.constant 17 : index
    %c0_19 = arith.constant 0 : index
    %10 = vector.load %arg5[%c0_17, %c17_18, %c0_19] : memref<18x24x4xf32, #tpu.memory_space<vmem>>, vector<18x1x4xf32>
    tpu.vector_store %arg5[%c0_17, %c17_18, %c0_19], %9 {strides = array<i32>} : memref<18x24x4xf32, #tpu.memory_space<vmem>>, vector<18x1x4xf32>,
    %c0_20 = arith.constant 0 : index
    %c0_21 = arith.constant 0 : index
    %c0_22 = arith.constant 0 : index
    %11 = vector.load %arg5[%c0_20, %c0_21, %c0_22] : memref<18x24x4xf32, #tpu.memory_space<vmem>>, vector<16x16x4xf32>
    %12 = vector.shape_cast %11 : vector<16x16x4xf32> to vector<256x4xf32>
    %c0_23 = arith.constant 0 : index
    %c0_24 = arith.constant 0 : index
    %13 = vector.load %arg6[%c0_23, %c0_24] : memref<256x36xf32, #tpu.memory_space<vmem>>, vector<256x4xf32>
    tpu.vector_store %arg6[%c0_23, %c0_24], %12 {strides = array<i32>} : memref<256x36xf32, #tpu.memory_space<vmem>>, vector<256x4xf32>,
    %c0_25 = arith.constant 0 : index
    %c1_26 = arith.constant 1 : index
    %c0_27 = arith.constant 0 : index
    %14 = vector.load %arg5[%c0_25, %c1_26, %c0_27] : memref<18x24x4xf32, #tpu.memory_space<vmem>>, vector<16x16x4xf32>
    %15 = vector.shape_cast %14 : vector<16x16x4xf32> to vector<256x4xf32>
    %c0_28 = arith.constant 0 : index
    %c4 = arith.constant 4 : index
    %16 = vector.load %arg6[%c0_28, %c4] : memref<256x36xf32, #tpu.memory_space<vmem>>, vector<256x4xf32>
    tpu.vector_store %arg6[%c0_28, %c4], %15 {strides = array<i32>} : memref<256x36xf32, #tpu.memory_space<vmem>>, vector<256x4xf32>,
    %c0_29 = arith.constant 0 : index
    %c2_30 = arith.constant 2 : index
    %c0_31 = arith.constant 0 : index
    %17 = vector.load %arg5[%c0_29, %c2_30, %c0_31] : memref<18x24x4xf32, #tpu.memory_space<vmem>>, vector<16x16x4xf32>
    %18 = vector.shape_cast %17 : vector<16x16x4xf32> to vector<256x4xf32>
    %c0_32 = arith.constant 0 : index
    %c8 = arith.constant 8 : index
    %19 = vector.load %arg6[%c0_32, %c8] : memref<256x36xf32, #tpu.memory_space<vmem>>, vector<256x4xf32>
    tpu.vector_store %arg6[%c0_32, %c8], %18 {strides = array<i32>} : memref<256x36xf32, #tpu.memory_space<vmem>>, vector<256x4xf32>,
    %c1_33 = arith.constant 1 : index
    %c0_34 = arith.constant 0 : index
    %c0_35 = arith.constant 0 : index
    %20 = vector.load %arg5[%c1_33, %c0_34, %c0_35] : memref<18x24x4xf32, #tpu.memory_space<vmem>>, vector<16x16x4xf32>
    %21 = vector.shape_cast %20 : vector<16x16x4xf32> to vector<256x4xf32>
    %c0_36 = arith.constant 0 : index
    %c12 = arith.constant 12 : index
    %22 = vector.load %arg6[%c0_36, %c12] : memref<256x36xf32, #tpu.memory_space<vmem>>, vector<256x4xf32>
    tpu.vector_store %arg6[%c0_36, %c12], %21 {strides = array<i32>} : memref<256x36xf32, #tpu.memory_space<vmem>>, vector<256x4xf32>,
    %c1_37 = arith.constant 1 : index
    %c1_38 = arith.constant 1 : index
    %c0_39 = arith.constant 0 : index
    %23 = vector.load %arg5[%c1_37, %c1_38, %c0_39] : memref<18x24x4xf32, #tpu.memory_space<vmem>>, vector<16x16x4xf32>
    %24 = vector.shape_cast %23 : vector<16x16x4xf32> to vector<256x4xf32>
    %c0_40 = arith.constant 0 : index
    %c16 = arith.constant 16 : index
    %25 = vector.load %arg6[%c0_40, %c16] : memref<256x36xf32, #tpu.memory_space<vmem>>, vector<256x4xf32>
    tpu.vector_store %arg6[%c0_40, %c16], %24 {strides = array<i32>} : memref<256x36xf32, #tpu.memory_space<vmem>>, vector<256x4xf32>,
    %c1_41 = arith.constant 1 : index
    %c2_42 = arith.constant 2 : index
    %c0_43 = arith.constant 0 : index
    %26 = vector.load %arg5[%c1_41, %c2_42, %c0_43] : memref<18x24x4xf32, #tpu.memory_space<vmem>>, vector<16x16x4xf32>
    %27 = vector.shape_cast %26 : vector<16x16x4xf32> to vector<256x4xf32>
    %c0_44 = arith.constant 0 : index
    %c20 = arith.constant 20 : index
    %28 = vector.load %arg6[%c0_44, %c20] : memref<256x36xf32, #tpu.memory_space<vmem>>, vector<256x4xf32>
    tpu.vector_store %arg6[%c0_44, %c20], %27 {strides = array<i32>} : memref<256x36xf32, #tpu.memory_space<vmem>>, vector<256x4xf32>,
    %c2_45 = arith.constant 2 : index
    %c0_46 = arith.constant 0 : index
    %c0_47 = arith.constant 0 : index
    %29 = vector.load %arg5[%c2_45, %c0_46, %c0_47] : memref<18x24x4xf32, #tpu.memory_space<vmem>>, vector<16x16x4xf32>
    %30 = vector.shape_cast %29 : vector<16x16x4xf32> to vector<256x4xf32>
    %c0_48 = arith.constant 0 : index
    %c24 = arith.constant 24 : index
    %31 = vector.load %arg6[%c0_48, %c24] : memref<256x36xf32, #tpu.memory_space<vmem>>, vector<256x4xf32>
    tpu.vector_store %arg6[%c0_48, %c24], %30 {strides = array<i32>} : memref<256x36xf32, #tpu.memory_space<vmem>>, vector<256x4xf32>,
    %c2_49 = arith.constant 2 : index
    %c1_50 = arith.constant 1 : index
    %c0_51 = arith.constant 0 : index
    %32 = vector.load %arg5[%c2_49, %c1_50, %c0_51] : memref<18x24x4xf32, #tpu.memory_space<vmem>>, vector<16x16x4xf32>
    %33 = vector.shape_cast %32 : vector<16x16x4xf32> to vector<256x4xf32>
    %c0_52 = arith.constant 0 : index
    %c28 = arith.constant 28 : index
    %34 = vector.load %arg6[%c0_52, %c28] : memref<256x36xf32, #tpu.memory_space<vmem>>, vector<256x4xf32>
    tpu.vector_store %arg6[%c0_52, %c28], %33 {strides = array<i32>} : memref<256x36xf32, #tpu.memory_space<vmem>>, vector<256x4xf32>,
    %c2_53 = arith.constant 2 : index
    %c2_54 = arith.constant 2 : index
    %c0_55 = arith.constant 0 : index
    %35 = vector.load %arg5[%c2_53, %c2_54, %c0_55] : memref<18x24x4xf32, #tpu.memory_space<vmem>>, vector<16x16x4xf32>
    %36 = vector.shape_cast %35 : vector<16x16x4xf32> to vector<256x4xf32>
    %c0_56 = arith.constant 0 : index
    %c32 = arith.constant 32 : index
    %37 = vector.load %arg6[%c0_56, %c32] : memref<256x36xf32, #tpu.memory_space<vmem>>, vector<256x4xf32>
    tpu.vector_store %arg6[%c0_56, %c32], %36 {strides = array<i32>} : memref<256x36xf32, #tpu.memory_space<vmem>>, vector<256x4xf32>,
    %c0_57 = arith.constant 0 : index
    %c0_58 = arith.constant 0 : index
    %38 = vector.load %arg6[%c0_57, %c0_58] : memref<256x36xf32, #tpu.memory_space<vmem>>, vector<256x36xf32>
    %c0_59 = arith.constant 0 : index
    %c0_60 = arith.constant 0 : index
    %39 = vector.load %arg2[%c0_59, %c0_60] : memref<36x4xf32, #tpu.memory_space<vmem>>, vector<36x4xf32>
    %cst = arith.constant dense<0.000000e+00> : vector<256x4xf32>
    %40 = tpu.matmul %38, %39, %cst {dimension_numbers = #tpu.dot_dimension_numbers<[1], [0], [0], [1], [0, 0, 1, 1], [], []>} : vector<256x36xf32>, vector<36x4xf32>, vector<256x4xf32> -> vector<256x4xf32>
    %cst_61 = arith.constant dense<0.000000e+00> : vector<4xf32>
    %41 = vector.multi_reduction <add>, %40, %cst_61 [0] : vector<256x4xf32> to vector<4xf32>
    %42 = vector.shape_cast %41 : vector<4xf32> to vector<1x4xf32>
    %cst_62 = arith.constant 3.906250e-03 : f32
    %43 = vector.broadcast %cst_62 : f32 to vector<1x4xf32>
    %44 = arith.mulf %42, %43 : vector<1x4xf32>
    %45 = arith.mulf %40, %40 : vector<256x4xf32>
    %cst_63 = arith.constant dense<0.000000e+00> : vector<4xf32>
    %46 = vector.multi_reduction <add>, %45, %cst_63 [0] : vector<256x4xf32> to vector<4xf32>
    %47 = vector.shape_cast %46 : vector<4xf32> to vector<1x4xf32>
    %cst_64 = arith.constant 3.906250e-03 : f32
    %48 = vector.broadcast %cst_64 : f32 to vector<1x4xf32>
    %49 = arith.mulf %47, %48 : vector<1x4xf32>
    %50 = arith.mulf %44, %44 : vector<1x4xf32>
    %51 = arith.subf %49, %50 : vector<1x4xf32>
    %cst_65 = arith.constant 0.000000e+00 : f32
    %52 = vector.broadcast %cst_65 : f32 to vector<1x4xf32>
    %53 = arith.maximumf %51, %52 : vector<1x4xf32>
    %54 = vector.broadcast %44 : vector<1x4xf32> to vector<256x4xf32>
    %55 = arith.subf %40, %54 : vector<256x4xf32>
    %cst_66 = arith.constant 9.99999974E-6 : f32
    %56 = vector.broadcast %cst_66 : f32 to vector<1x4xf32>
    %57 = arith.addf %53, %56 : vector<1x4xf32>
    %58 = math.rsqrt %57 : vector<1x4xf32>
    %59 = vector.broadcast %58 : vector<1x4xf32> to vector<256x4xf32>
    %60 = arith.mulf %55, %59 : vector<256x4xf32>
    %cst_67 = arith.constant 0.000000e+00 : f32
    %61 = vector.broadcast %cst_67 : f32 to vector<256x4xf32>
    %62 = arith.maximumf %60, %61 : vector<256x4xf32>
    %63 = vector.shape_cast %62 : vector<256x4xf32> to vector<16x16x4xf32>
    %c1_68 = arith.constant 1 : index
    %c1_69 = arith.constant 1 : index
    %c0_70 = arith.constant 0 : index
    %64 = vector.load %arg5[%c1_68, %c1_69, %c0_70] : memref<18x24x4xf32, #tpu.memory_space<vmem>>, vector<16x16x4xf32>
    tpu.vector_store %arg5[%c1_68, %c1_69, %c0_70], %63 {strides = array<i32>} : memref<18x24x4xf32, #tpu.memory_space<vmem>>, vector<16x16x4xf32>,
    %65 = vector.extract_strided_slice %63 {offsets = [1, 0, 0], sizes = [1, 16, 4], strides = [1, 1, 1]} : vector<16x16x4xf32> to vector<1x16x4xf32>
    %c0_71 = arith.constant 0 : index
    %c1_72 = arith.constant 1 : index
    %c0_73 = arith.constant 0 : index
    %66 = vector.load %arg5[%c0_71, %c1_72, %c0_73] : memref<18x24x4xf32, #tpu.memory_space<vmem>>, vector<1x16x4xf32>
    tpu.vector_store %arg5[%c0_71, %c1_72, %c0_73], %65 {strides = array<i32>} : memref<18x24x4xf32, #tpu.memory_space<vmem>>, vector<1x16x4xf32>,
    %67 = vector.extract_strided_slice %63 {offsets = [14, 0, 0], sizes = [1, 16, 4], strides = [1, 1, 1]} : vector<16x16x4xf32> to vector<1x16x4xf32>
    %c17_74 = arith.constant 17 : index
    %c1_75 = arith.constant 1 : index
    %c0_76 = arith.constant 0 : index
    %68 = vector.load %arg5[%c17_74, %c1_75, %c0_76] : memref<18x24x4xf32, #tpu.memory_space<vmem>>, vector<1x16x4xf32>
    tpu.vector_store %arg5[%c17_74, %c1_75, %c0_76], %67 {strides = array<i32>} : memref<18x24x4xf32, #tpu.memory_space<vmem>>, vector<1x16x4xf32>,
    %c0_77 = arith.constant 0 : index
    %c2_78 = arith.constant 2 : index
    %c0_79 = arith.constant 0 : index
    %69 = vector.load %arg5[%c0_77, %c2_78, %c0_79] : memref<18x24x4xf32, #tpu.memory_space<vmem>>, vector<18x1x4xf32>
    %c0_80 = arith.constant 0 : index
    %c0_81 = arith.constant 0 : index
    %c0_82 = arith.constant 0 : index
    %70 = vector.load %arg5[%c0_80, %c0_81, %c0_82] : memref<18x24x4xf32, #tpu.memory_space<vmem>>, vector<18x1x4xf32>
    tpu.vector_store %arg5[%c0_80, %c0_81, %c0_82], %69 {strides = array<i32>} : memref<18x24x4xf32, #tpu.memory_space<vmem>>, vector<18x1x4xf32>,
    %c0_83 = arith.constant 0 : index
    %c15_84 = arith.constant 15 : index
    %c0_85 = arith.constant 0 : index
    %71 = vector.load %arg5[%c0_83, %c15_84, %c0_85] : memref<18x24x4xf32, #tpu.memory_space<vmem>>, vector<18x1x4xf32>
    %c0_86 = arith.constant 0 : index
    %c17_87 = arith.constant 17 : index
    %c0_88 = arith.constant 0 : index
    %72 = vector.load %arg5[%c0_86, %c17_87, %c0_88] : memref<18x24x4xf32, #tpu.memory_space<vmem>>, vector<18x1x4xf32>
    tpu.vector_store %arg5[%c0_86, %c17_87, %c0_88], %71 {strides = array<i32>} : memref<18x24x4xf32, #tpu.memory_space<vmem>>, vector<18x1x4xf32>,
    %c0_89 = arith.constant 0 : index
    %c0_90 = arith.constant 0 : index
    %c0_91 = arith.constant 0 : index
    %73 = vector.load %arg5[%c0_89, %c0_90, %c0_91] : memref<18x24x4xf32, #tpu.memory_space<vmem>>, vector<16x16x4xf32>
    %74 = vector.shape_cast %73 : vector<16x16x4xf32> to vector<256x4xf32>
    %c0_92 = arith.constant 0 : index
    %c0_93 = arith.constant 0 : index
    %75 = vector.load %arg6[%c0_92, %c0_93] : memref<256x36xf32, #tpu.memory_space<vmem>>, vector<256x4xf32>
    tpu.vector_store %arg6[%c0_92, %c0_93], %74 {strides = array<i32>} : memref<256x36xf32, #tpu.memory_space<vmem>>, vector<256x4xf32>,
    %c0_94 = arith.constant 0 : index
    %c1_95 = arith.constant 1 : index
    %c0_96 = arith.constant 0 : index
    %76 = vector.load %arg5[%c0_94, %c1_95, %c0_96] : memref<18x24x4xf32, #tpu.memory_space<vmem>>, vector<16x16x4xf32>
    %77 = vector.shape_cast %76 : vector<16x16x4xf32> to vector<256x4xf32>
    %c0_97 = arith.constant 0 : index
    %c4_98 = arith.constant 4 : index
    %78 = vector.load %arg6[%c0_97, %c4_98] : memref<256x36xf32, #tpu.memory_space<vmem>>, vector<256x4xf32>
    tpu.vector_store %arg6[%c0_97, %c4_98], %77 {strides = array<i32>} : memref<256x36xf32, #tpu.memory_space<vmem>>, vector<256x4xf32>,
    %c0_99 = arith.constant 0 : index
    %c2_100 = arith.constant 2 : index
    %c0_101 = arith.constant 0 : index
    %79 = vector.load %arg5[%c0_99, %c2_100, %c0_101] : memref<18x24x4xf32, #tpu.memory_space<vmem>>, vector<16x16x4xf32>
    %80 = vector.shape_cast %79 : vector<16x16x4xf32> to vector<256x4xf32>
    %c0_102 = arith.constant 0 : index
    %c8_103 = arith.constant 8 : index
    %81 = vector.load %arg6[%c0_102, %c8_103] : memref<256x36xf32, #tpu.memory_space<vmem>>, vector<256x4xf32>
    tpu.vector_store %arg6[%c0_102, %c8_103], %80 {strides = array<i32>} : memref<256x36xf32, #tpu.memory_space<vmem>>, vector<256x4xf32>,
    %c1_104 = arith.constant 1 : index
    %c0_105 = arith.constant 0 : index
    %c0_106 = arith.constant 0 : index
    %82 = vector.load %arg5[%c1_104, %c0_105, %c0_106] : memref<18x24x4xf32, #tpu.memory_space<vmem>>, vector<16x16x4xf32>
    %83 = vector.shape_cast %82 : vector<16x16x4xf32> to vector<256x4xf32>
    %c0_107 = arith.constant 0 : index
    %c12_108 = arith.constant 12 : index
    %84 = vector.load %arg6[%c0_107, %c12_108] : memref<256x36xf32, #tpu.memory_space<vmem>>, vector<256x4xf32>
    tpu.vector_store %arg6[%c0_107, %c12_108], %83 {strides = array<i32>} : memref<256x36xf32, #tpu.memory_space<vmem>>, vector<256x4xf32>,
    %c1_109 = arith.constant 1 : index
    %c1_110 = arith.constant 1 : index
    %c0_111 = arith.constant 0 : index
    %85 = vector.load %arg5[%c1_109, %c1_110, %c0_111] : memref<18x24x4xf32, #tpu.memory_space<vmem>>, vector<16x16x4xf32>
    %86 = vector.shape_cast %85 : vector<16x16x4xf32> to vector<256x4xf32>
    %c0_112 = arith.constant 0 : index
    %c16_113 = arith.constant 16 : index
    %87 = vector.load %arg6[%c0_112, %c16_113] : memref<256x36xf32, #tpu.memory_space<vmem>>, vector<256x4xf32>
    tpu.vector_store %arg6[%c0_112, %c16_113], %86 {strides = array<i32>} : memref<256x36xf32, #tpu.memory_space<vmem>>, vector<256x4xf32>,
    %c1_114 = arith.constant 1 : index
    %c2_115 = arith.constant 2 : index
    %c0_116 = arith.constant 0 : index
    %88 = vector.load %arg5[%c1_114, %c2_115, %c0_116] : memref<18x24x4xf32, #tpu.memory_space<vmem>>, vector<16x16x4xf32>
    %89 = vector.shape_cast %88 : vector<16x16x4xf32> to vector<256x4xf32>
    %c0_117 = arith.constant 0 : index
    %c20_118 = arith.constant 20 : index
    %90 = vector.load %arg6[%c0_117, %c20_118] : memref<256x36xf32, #tpu.memory_space<vmem>>, vector<256x4xf32>
    tpu.vector_store %arg6[%c0_117, %c20_118], %89 {strides = array<i32>} : memref<256x36xf32, #tpu.memory_space<vmem>>, vector<256x4xf32>,
    %c2_119 = arith.constant 2 : index
    %c0_120 = arith.constant 0 : index
    %c0_121 = arith.constant 0 : index
    %91 = vector.load %arg5[%c2_119, %c0_120, %c0_121] : memref<18x24x4xf32, #tpu.memory_space<vmem>>, vector<16x16x4xf32>
    %92 = vector.shape_cast %91 : vector<16x16x4xf32> to vector<256x4xf32>
    %c0_122 = arith.constant 0 : index
    %c24_123 = arith.constant 24 : index
    %93 = vector.load %arg6[%c0_122, %c24_123] : memref<256x36xf32, #tpu.memory_space<vmem>>, vector<256x4xf32>
    tpu.vector_store %arg6[%c0_122, %c24_123], %92 {strides = array<i32>} : memref<256x36xf32, #tpu.memory_space<vmem>>, vector<256x4xf32>,
    %c2_124 = arith.constant 2 : index
    %c1_125 = arith.constant 1 : index
    %c0_126 = arith.constant 0 : index
    %94 = vector.load %arg5[%c2_124, %c1_125, %c0_126] : memref<18x24x4xf32, #tpu.memory_space<vmem>>, vector<16x16x4xf32>
    %95 = vector.shape_cast %94 : vector<16x16x4xf32> to vector<256x4xf32>
    %c0_127 = arith.constant 0 : index
    %c28_128 = arith.constant 28 : index
    %96 = vector.load %arg6[%c0_127, %c28_128] : memref<256x36xf32, #tpu.memory_space<vmem>>, vector<256x4xf32>
    tpu.vector_store %arg6[%c0_127, %c28_128], %95 {strides = array<i32>} : memref<256x36xf32, #tpu.memory_space<vmem>>, vector<256x4xf32>,
    %c2_129 = arith.constant 2 : index
    %c2_130 = arith.constant 2 : index
    %c0_131 = arith.constant 0 : index
    %97 = vector.load %arg5[%c2_129, %c2_130, %c0_131] : memref<18x24x4xf32, #tpu.memory_space<vmem>>, vector<16x16x4xf32>
    %98 = vector.shape_cast %97 : vector<16x16x4xf32> to vector<256x4xf32>
    %c0_132 = arith.constant 0 : index
    %c32_133 = arith.constant 32 : index
    %99 = vector.load %arg6[%c0_132, %c32_133] : memref<256x36xf32, #tpu.memory_space<vmem>>, vector<256x4xf32>
    tpu.vector_store %arg6[%c0_132, %c32_133], %98 {strides = array<i32>} : memref<256x36xf32, #tpu.memory_space<vmem>>, vector<256x4xf32>,
    %c0_134 = arith.constant 0 : index
    %c0_135 = arith.constant 0 : index
    %100 = vector.load %arg6[%c0_134, %c0_135] : memref<256x36xf32, #tpu.memory_space<vmem>>, vector<256x36xf32>
    %c0_136 = arith.constant 0 : index
    %c0_137 = arith.constant 0 : index
    %101 = vector.load %arg3[%c0_136, %c0_137] : memref<36x4xf32, #tpu.memory_space<vmem>>, vector<36x4xf32>
    %cst_138 = arith.constant dense<0.000000e+00> : vector<256x4xf32>
    %102 = tpu.matmul %100, %101, %cst_138 {dimension_numbers = #tpu.dot_dimension_numbers<[1], [0], [0], [1], [0, 0, 1, 1], [], []>} : vector<256x36xf32>, vector<36x4xf32>, vector<256x4xf32> -> vector<256x4xf32>
    %cst_139 = arith.constant dense<0.000000e+00> : vector<4xf32>
    %103 = vector.multi_reduction <add>, %102, %cst_139 [0] : vector<256x4xf32> to vector<4xf32>
    %104 = vector.shape_cast %103 : vector<4xf32> to vector<1x4xf32>
    %cst_140 = arith.constant 3.906250e-03 : f32
    %105 = vector.broadcast %cst_140 : f32 to vector<1x4xf32>
    %106 = arith.mulf %104, %105 : vector<1x4xf32>
    %107 = arith.mulf %102, %102 : vector<256x4xf32>
    %cst_141 = arith.constant dense<0.000000e+00> : vector<4xf32>
    %108 = vector.multi_reduction <add>, %107, %cst_141 [0] : vector<256x4xf32> to vector<4xf32>
    %109 = vector.shape_cast %108 : vector<4xf32> to vector<1x4xf32>
    %cst_142 = arith.constant 3.906250e-03 : f32
    %110 = vector.broadcast %cst_142 : f32 to vector<1x4xf32>
    %111 = arith.mulf %109, %110 : vector<1x4xf32>
    %112 = arith.mulf %106, %106 : vector<1x4xf32>
    %113 = arith.subf %111, %112 : vector<1x4xf32>
    %cst_143 = arith.constant 0.000000e+00 : f32
    %114 = vector.broadcast %cst_143 : f32 to vector<1x4xf32>
    %115 = arith.maximumf %113, %114 : vector<1x4xf32>
    %116 = vector.broadcast %106 : vector<1x4xf32> to vector<256x4xf32>
    %117 = arith.subf %102, %116 : vector<256x4xf32>
    %cst_144 = arith.constant 9.99999974E-6 : f32
    %118 = vector.broadcast %cst_144 : f32 to vector<1x4xf32>
    %119 = arith.addf %115, %118 : vector<1x4xf32>
    %120 = math.rsqrt %119 : vector<1x4xf32>
    %121 = vector.broadcast %120 : vector<1x4xf32> to vector<256x4xf32>
    %122 = arith.mulf %117, %121 : vector<256x4xf32>
    %c0_145 = arith.constant 0 : index
    %c0_146 = arith.constant 0 : index
    %c0_147 = arith.constant 0 : index
    %c0_148 = arith.constant 0 : index
    %123 = vector.load %arg1[%c0_145, %c0_146, %c0_147, %c0_148] : memref<1x16x16x4xf32, #tpu.memory_space<vmem>>, vector<1x16x16x4xf32>
    %124 = vector.shape_cast %123 : vector<1x16x16x4xf32> to vector<16x16x4xf32>
    %125 = vector.shape_cast %124 : vector<16x16x4xf32> to vector<256x4xf32>
    %126 = arith.addf %122, %125 : vector<256x4xf32>
    %127 = vector.shape_cast %126 : vector<256x4xf32> to vector<16x16x4xf32>
    %c0_149 = arith.constant 0 : index
    %c0_150 = arith.constant 0 : index
    %c0_151 = arith.constant 0 : index
    %c0_152 = arith.constant 0 : index
    %128 = vector.load %arg4[%c0_149, %c0_150, %c0_151, %c0_152] : memref<1x16x16x4xf32, #tpu.memory_space<vmem>>, vector<1x16x16x4xf32>
    %129 = vector.shape_cast %128 : vector<1x16x16x4xf32> to vector<16x16x4xf32>
    %130 = vector.shape_cast %127 : vector<16x16x4xf32> to vector<1x16x16x4xf32>
    tpu.vector_store %arg4[%c0_149, %c0_150, %c0_151, %c0_152], %130 {strides = array<i32>} : memref<1x16x16x4xf32, #tpu.memory_space<vmem>>, vector<1x16x16x4xf32>,
    return
  }
  func.func @transform_0(%arg0: i32) -> (i32, i32, i32, i32) {
    %c0_i32 = arith.constant 0 : i32
    %c0_i32_0 = arith.constant 0 : i32
    %c0_i32_1 = arith.constant 0 : i32
    %c0_i32_2 = arith.constant 0 : i32
    return %arg0, %c0_i32, %c0_i32_0, %c0_i32_1 : i32, i32, i32, i32
  }
  func.func @transform_1(%arg0: i32) -> (i32, i32) {
    %c0_i32 = arith.constant 0 : i32
    %c0_i32_0 = arith.constant 0 : i32
    %c0_i32_1 = arith.constant 0 : i32
    return %c0_i32, %c0_i32_0 : i32, i32
  }
  func.func @transform_2(%arg0: i32) -> (i32, i32) {
    %c0_i32 = arith.constant 0 : i32
    %c0_i32_0 = arith.constant 0 : i32
    %c0_i32_1 = arith.constant 0 : i32
    return %c0_i32, %c0_i32_0 : i32, i32
  }
  func.func @transform_3(%arg0: i32) -> (i32, i32, i32, i32) {
    %c0_i32 = arith.constant 0 : i32
    %c0_i32_0 = arith.constant 0 : i32
    %c0_i32_1 = arith.constant 0 : i32
    %c0_i32_2 = arith.constant 0 : i32
    return %arg0, %c0_i32, %c0_i32_0, %c0_i32_1 : i32, i32, i32, i32
  }
}

</mosaic_0001>

<bundles_post_ra>
// kernel: resnet_block.1
= control target key start
LH: loop header
LB: loop body
LE: loop exit
PB: predicated region body
PF: predicated region fallthrough
CT: control target
= control target key end

     0   :  { %s5362_s12 = smov 0   ;;  %s8056_s0 = inlined_call_operand.vmem [shape: f32[2,16,16,4], index: 0, kind: input, shape index: {}]   ;;  %s8057_s1 = inlined_call_operand.vmem [shape: f32[36,4], index: 1, kind: input, shape index: {}]   ;;  %s8058_s2 = inlined_call_operand.vmem [shape: f32[36,4], index: 2, kind: input, shape index: {}]   ;;  %s8059_s3 = inlined_call_operand.vmem [shape: f32[2,16,16,4], index: 3, kind: output, shape index: {}]  }
   0x1 LB: > { %s5021_s13 = sadd.s32 4294967295, %s5332_s12   ;;  %p5025_p0 = scmp.ge.s32.totalorder %s5332_s12, 1  ;;  %s5332_s12 = sphi %s5362_s12, %s13_s12  }
   0x2   : > { %p137_p1 = scmp.lt.s32.totalorder %s5332_s12, 3 }
   0x4   : > { %p138_p2 = pnand %p5025_p0, %p137_p1 }
   0x6   : > { %141 = sbr.rel (%p138_p2) target bundleno = 1844 (0x734), region = 32 }
   0xd   : > { %p161_p3 = scmp.lt.s32.totalorder %s5021_s13, 1  ;;  %vm204_vm0 = vcmask 31744   ;;  %s5334_s18 = smov 4   ;;  %vm260_vm1 = vcmask 24576   ;;  %vm539_vm2 = vcmask 64544   ;;  %vm732_vm3 = vcmask 97344  }
   0xe   : > { %s5335_s19 = smov 8   ;;  %s5336_s20 = smov 12   ;;  %vm925_vm4 = vcmask 130144   ;;  %vm2058_vm5 = vcmask 1043456   ;;  %vm1118_vm6 = vcmask 162944   ;;  %vm1311_vm7 = vcmask 195744  }
   0xf   : > { %s8087_s13 = smov (!%p161_p3, %s5021_s13), 1  ;;  %s5337_s21 = smov 16   ;;  %vm1505_vm8 = vcmask 228544   ;;  %vm1698_vm9 = vcmask 261344   ;;  %vm1891_vm10 = vcmask 294144   ;;  %vm1961_vm11 = vcmask 293888  }
  0x10   : > { %s5098_s14 = sshll.u32 %s8087_s13, 8  ;;  %s5338_s26 = smov 20  }
  0x11   : > { %s5378_s17 = scalar_lea.vmem %s8056_s0, %s5098_s14  ;;  %s5339_s4 = smov 24  }
  0x12   : > { %v173_v0 = vld [vmem:[%s5378_s17 + $0x10] sm:$0xff]  ;;  %v171_v1 = vld [vmem:[%s5378_s17] sm:$0xff]  ;;  %v174_v2 = vld [vmem:[%s5378_s17 + $0x18] sm:$0xff]  ;;  %s5340_s5 = smov 28   ;;  %s5341_s8 = smov 32  }
  0x13   : > { %237 = vst.msk [vmem:[#allocation2 + $0x1] sm:$0xff] %vm204_vm0, %v173_v0  ;;  %207 = vst.msk [vmem:[#allocation2 + $0x31] sm:$0xff] %vm204_vm0, %v173_v0  ;;  %v172_v3 = vld [vmem:[%s5378_s17 + $0x8] sm:$0xff]  ;;  %v175_v4 = vld [vmem:[%s5378_s17 + $0x20] sm:$0xff] }
  0x14   : > { %205 = vst.msk [vmem:[#allocation2 + $0x19] sm:$0xff] %vm204_vm0, %v171_v1  ;;  %238 = vst.msk [vmem:[#allocation2 + $0x9] sm:$0xff] %vm204_vm0, %v174_v2  ;;  %v176_v5 = vld [vmem:[%s5378_s17 + $0x28] sm:$0xff]  ;;  %v177_v6 = vld [vmem:[%s5378_s17 + $0x30] sm:$0xff] }
  0x15   : > { %208 = vst.msk [vmem:[#allocation2 + $0x39] sm:$0xff] %vm204_vm0, %v174_v2  ;;  %206 = vst.msk [vmem:[#allocation2 + $0x21] sm:$0xff] %vm204_vm0, %v172_v3  ;;  %v178_v7 = vld [vmem:[%s5378_s17 + $0x38] sm:$0xff]  ;;  %v179_v8 = vld [vmem:[%s5378_s17 + $0x40] sm:$0xff] }
  0x16   : > { %209 = vst.msk [vmem:[#allocation2 + $0x49] sm:$0xff] %vm204_vm0, %v175_v4  ;;  %210 = vst.msk [vmem:[#allocation2 + $0x51] sm:$0xff] %vm204_vm0, %v176_v5  ;;  %v180_v9 = vld [vmem:[%s5378_s17 + $0x48] sm:$0xff]  ;;  %v181_v10 = vld [vmem:[%s5378_s17 + $0x50] sm:$0xff] }
  0x17   : > { %211 = vst.msk [vmem:[#allocation2 + $0x61] sm:$0xff] %vm204_vm0, %v177_v6  ;;  %212 = vst.msk [vmem:[#allocation2 + $0x69] sm:$0xff] %vm204_vm0, %v178_v7  ;;  %v182_v11 = vld [vmem:[%s5378_s17 + $0x58] sm:$0xff]  ;;  %v183_v12 = vld [vmem:[%s5378_s17 + $0x60] sm:$0xff] }
  0x18   : > { %213 = vst.msk [vmem:[#allocation2 + $0x79] sm:$0xff] %vm204_vm0, %v179_v8  ;;  %214 = vst.msk [vmem:[#allocation2 + $0x81] sm:$0xff] %vm204_vm0, %v180_v9  ;;  %v184_v13 = vld [vmem:[%s5378_s17 + $0x68] sm:$0xff]  ;;  %v185_v14 = vld [vmem:[%s5378_s17 + $0x70] sm:$0xff] }
  0x19   : > { %215 = vst.msk [vmem:[#allocation2 + $0x91] sm:$0xff] %vm204_vm0, %v181_v10  ;;  %216 = vst.msk [vmem:[#allocation2 + $0x99] sm:$0xff] %vm204_vm0, %v182_v11  ;;  %v186_v15 = vld [vmem:[%s5378_s17 + $0x78] sm:$0xff]  ;;  %v187_v16 = vld [vmem:[%s5378_s17 + $0x80] sm:$0xff] }
  0x1a   : > { %217 = vst.msk [vmem:[#allocation2 + $0xa9] sm:$0xff] %vm204_vm0, %v183_v12  ;;  %218 = vst.msk [vmem:[#allocation2 + $0xb1] sm:$0xff] %vm204_vm0, %v184_v13  ;;  %v188_v17 = vld [vmem:[%s5378_s17 + $0x88] sm:$0xff]  ;;  %v189_v18 = vld [vmem:[%s5378_s17 + $0x90] sm:$0xff] }
  0x1b   : > { %219 = vst.msk [vmem:[#allocation2 + $0xc1] sm:$0xff] %vm204_vm0, %v185_v14  ;;  %220 = vst.msk [vmem:[#allocation2 + $0xc9] sm:$0xff] %vm204_vm0, %v186_v15  ;;  %v190_v19 = vld [vmem:[%s5378_s17 + $0x98] sm:$0xff]  ;;  %v191_v20 = vld [vmem:[%s5378_s17 + $0xa0] sm:$0xff] }
  0x1c   : > { %221 = vst.msk [vmem:[#allocation2 + $0xd9] sm:$0xff] %vm204_vm0, %v187_v16  ;;  %222 = vst.msk [vmem:[#allocation2 + $0xe1] sm:$0xff] %vm204_vm0, %v188_v17  ;;  %v192_v21 = vld [vmem:[%s5378_s17 + $0xa8] sm:$0xff]  ;;  %v193_v22 = vld [vmem:[%s5378_s17 + $0xb0] sm:$0xff] }
  0x1d   : > { %223 = vst.msk [vmem:[#allocation2 + $0xf1] sm:$0xff] %vm204_vm0, %v189_v18  ;;  %224 = vst.msk [vmem:[#allocation2 + $0xf9] sm:$0xff] %vm204_vm0, %v190_v19  ;;  %v194_v23 = vld [vmem:[%s5378_s17 + $0xb8] sm:$0xff]  ;;  %v379_v24 = vld [vmem:[#allocation2 + $0x1] sm:$0xff] }
  0x1e   : > { %225 = vst.msk [vmem:[#allocation2 + $0x109] sm:$0xff] %vm204_vm0, %v191_v20  ;;  %v5427_v25 = vld [vmem:[#allocation2 + $0x19] sm:$0xff]  ;;  %226 = vst.msk [vmem:[#allocation2 + $0x111] sm:$0xff] %vm204_vm0, %v192_v21  ;;  %443 = vrot.lane.b32.xlu0 %v379_v24, %s5334_s18  ;;  %v380_v26 = vld [vmem:[#allocation2 + $0x9] sm:$0xff] }
  0x1f   : > { %227 = vst.msk [vmem:[#allocation2 + $0x121] sm:$0xff] %vm204_vm0, %v193_v22  ;;  %228 = vst.msk [vmem:[#allocation2 + $0x129] sm:$0xff] %vm204_vm0, %v194_v23  ;;  %447 = vrot.lane.b32.xlu1 %v5427_v25, %s5334_s18  ;;  %v5435_v27 = vld [vmem:[#allocation2 + $0x21] sm:$0xff]  ;;  %v5440_v28 = vld [vmem:[#allocation2 + $0x31] sm:$0xff] }
  0x20   : > { %v5442_v29 = vld [vmem:[#allocation2 + $0x39] sm:$0xff]  ;;  %v5444_v30 = vld [vmem:[#allocation2 + $0x49] sm:$0xff]  ;;  %v5451_v32 = vld [vmem:[#allocation2 + $0x51] sm:$0xff] }
  0x21   : > { %v195_v31 = vld [vmem:[%s5378_s17 + $0xc0] sm:$0xff]  ;;  %v196_v33 = vld [vmem:[%s5378_s17 + $0xc8] sm:$0xff]  ;;  %v197_v34 = vld [vmem:[%s5378_s17 + $0xd0] sm:$0xff] }
  0x22   : > { %445 = vrot.lane.b32.xlu0 %v380_v26, %s5334_s18  ;;  %229 = vst.msk [vmem:[#allocation2 + $0x139] sm:$0xff] %vm204_vm0, %v195_v31  ;;  %230 = vst.msk [vmem:[#allocation2 + $0x141] sm:$0xff] %vm204_vm0, %v196_v33  ;;  %v198_v35 = vld [vmem:[%s5378_s17 + $0xd8] sm:$0xff]  ;;  %v199_v36 = vld [vmem:[%s5378_s17 + $0xe0] sm:$0xff] }
  0x23   : > { %449 = vrot.lane.b32.xlu1 %v5435_v27, %s5334_s18  ;;  %231 = vst.msk [vmem:[#allocation2 + $0x151] sm:$0xff] %vm204_vm0, %v197_v34  ;;  %v200_v37 = vld [vmem:[%s5378_s17 + $0xe8] sm:$0xff]  ;;  %232 = vst.msk [vmem:[#allocation2 + $0x159] sm:$0xff] %vm204_vm0, %v198_v35  ;;  %v280_v39 = vld [vmem:[#allocation2 + $0x27] sm:$0x1] }
  0x24   : > { %233 = vst.msk [vmem:[#allocation2 + $0x169] sm:$0xff] %vm204_vm0, %v199_v36  ;;  %240 = vst.msk [vmem:[#allocation2 + $0x199] sm:$0xff] %vm204_vm0, %v199_v36  ;;  %v279_v38 = vld [vmem:[#allocation2 + $0xf] sm:$0x1]  ;;  %v281_v40 = vld [vmem:[#allocation2 + $0x3f] sm:$0x1] }
  0x25   : > { %234 = vst.msk [vmem:[#allocation2 + $0x171] sm:$0xff] %vm204_vm0, %v200_v37  ;;  %241 = vst.msk [vmem:[#allocation2 + $0x1a1] sm:$0xff] %vm204_vm0, %v200_v37  ;;  %v282_v41 = vld [vmem:[#allocation2 + $0x57] sm:$0x1]  ;;  %v283_v42 = vld [vmem:[#allocation2 + $0x6f] sm:$0x1] }
  0x26   : > { %451 = vrot.lane.b32.xlu0 %v5440_v28, %s5334_s18  ;;  %297 = vst.msk [vmem:[#allocation2 + $0x11] sm:$0x1] %vm260_vm1, %v279_v38  ;;  %298 = vst.msk [vmem:[#allocation2 + $0x29] sm:$0x1] %vm260_vm1, %v280_v39  ;;  %v5473_v43 = vld [vmem:[#allocation2 + $0x61] sm:$0xff]  ;;  %v5475_v44 = vld [vmem:[#allocation2 + $0x69] sm:$0xff] }
  0x27   : > { %453 = vrot.lane.b32.xlu1 %v5442_v29, %s5334_s18  ;;  %299 = vst.msk [vmem:[#allocation2 + $0x41] sm:$0x1] %vm260_vm1, %v281_v40  ;;  %300 = vst.msk [vmem:[#allocation2 + $0x59] sm:$0x1] %vm260_vm1, %v282_v41  ;;  %v284_v45 = vld [vmem:[#allocation2 + $0x87] sm:$0x1] }
  0x28   : > { %301 = vst.msk [vmem:[#allocation2 + $0x71] sm:$0x1] %vm260_vm1, %v283_v42  ;;  %302 = vst.msk [vmem:[#allocation2 + $0x89] sm:$0x1] %vm260_vm1, %v284_v45  ;;  %v285_v46 = vld [vmem:[#allocation2 + $0x9f] sm:$0x1] }
  0x29   : > { %v286_v47 = vld [vmem:[#allocation2 + $0xb7] sm:$0x1]  ;;  %303 = vst.msk [vmem:[#allocation2 + $0xa1] sm:$0x1] %vm260_vm1, %v285_v46  ;;  %v287_v48 = vld [vmem:[#allocation2 + $0xcf] sm:$0x1] }
  0x2a   : > { %455 = vrot.lane.b32.xlu0 %v5444_v30, %s5334_s18  ;;  %304 = vst.msk [vmem:[#allocation2 + $0xb9] sm:$0x1] %vm260_vm1, %v286_v47  ;;  %305 = vst.msk [vmem:[#allocation2 + $0xd1] sm:$0x1] %vm260_vm1, %v287_v48  ;;  %v5487_v49 = vld [vmem:[#allocation2 + $0x79] sm:$0xff]  ;;  %v5489_v50 = vld [vmem:[#allocation2 + $0x81] sm:$0xff] }
  0x2b   : > { %457 = vrot.lane.b32.xlu1 %v5451_v32, %s5334_s18  ;;  %v288_v51 = vld [vmem:[#allocation2 + $0xe7] sm:$0x1]  ;;  %v289_v52 = vld [vmem:[#allocation2 + $0xff] sm:$0x1]  ;;  %v5497_v53 = vld [vmem:[#allocation2 + $0x91] sm:$0xff] }
  0x2c   : > { %306 = vst.msk [vmem:[#allocation2 + $0xe9] sm:$0x1] %vm260_vm1, %v288_v51  ;;  %307 = vst.msk [vmem:[#allocation2 + $0x101] sm:$0x1] %vm260_vm1, %v289_v52  ;;  %v5499_v54 = vld [vmem:[#allocation2 + $0x99] sm:$0xff]  ;;  %v5507_v59 = vld [vmem:[#allocation2 + $0xa9] sm:$0xff] }
  0x2d   : > { %v290_v55 = vld [vmem:[#allocation2 + $0x117] sm:$0x1]  ;;  %v291_v56 = vld [vmem:[#allocation2 + $0x12f] sm:$0x1]  ;;  %v242_v57 = vld [vmem:[#allocation2 + $0x2] sm:$0x1] }
  0x2e   : > { %459 = vrot.lane.b32.xlu0 %v5473_v43, %s5334_s18  ;;  %308 = vst.msk [vmem:[#allocation2 + $0x119] sm:$0x1] %vm260_vm1, %v290_v55  ;;  %309 = vst.msk [vmem:[#allocation2 + $0x131] sm:$0x1] %vm260_vm1, %v291_v56  ;;  %v243_v58 = vld [vmem:[#allocation2 + $0x1a] sm:$0x1] }
  0x2f   : > { %461 = vrot.lane.b32.xlu1 %v5475_v44, %s5334_s18  ;;  %261 = vst.msk [vmem:[#allocation2] sm:$0x1] %vm260_vm1, %v242_v57  ;;  %262 = vst.msk [vmem:[#allocation2 + $0x18] sm:$0x1] %vm260_vm1, %v243_v58  ;;  %v292_v60 = vld [vmem:[#allocation2 + $0x147] sm:$0x1] }
  0x30   : > { %v316_v61 = vld [vmem:[#allocation2 + $0x8] sm:$0xff]  ;;  %v5511_v62 = vld [vmem:[#allocation2 + $0xb1] sm:$0xff]  ;;  %310 = vst.msk [vmem:[#allocation2 + $0x149] sm:$0x1] %vm260_vm1, %v292_v60  ;;  %v5515_v63 = vld [vmem:[#allocation2 + $0x20] sm:$0xff] }
  0x31   : > { %348 = vst.msk [vmem:[#allocation3 + $0x8] sm:$0xff] %vm204_vm0, %v316_v61  ;;  %v293_v0 = vld [vmem:[#allocation2 + $0x15f] sm:$0x1]  ;;  %350 = vst.msk [vmem:[#allocation3 + $0x18] sm:$0xff] %vm204_vm0, %v5515_v63  ;;  %v244_v1 = vld [vmem:[#allocation2 + $0x32] sm:$0x1] }
  0x32   : > { %463 = vrot.lane.b32.xlu0 %v5487_v49, %s5334_s18  ;;  %311 = vst.msk [vmem:[#allocation2 + $0x161] sm:$0x1] %vm260_vm1, %v293_v0  ;;  %v5520_v2 = vld [vmem:[#allocation2 + $0x38] sm:$0xff]  ;;  %v5522_v3 = vld [vmem:[#allocation2 + $0xc1] sm:$0xff]  ;;  %263 = vst.msk [vmem:[#allocation2 + $0x30] sm:$0x1] %vm260_vm1, %v244_v1 }
  0x33   : > { %465 = vrot.lane.b32.xlu1 %v5489_v50, %s5334_s18  ;;  %352 = vst.msk [vmem:[#allocation3 + $0x28] sm:$0xff] %vm204_vm0, %v5520_v2  ;;  %v294_v4 = vld [vmem:[#allocation2 + $0x177] sm:$0x1]  ;;  %v245_v5 = vld [vmem:[#allocation2 + $0x4a] sm:$0x1]  ;;  %v5545_v11 = vld [vmem:[#allocation2 + $0x80] sm:$0xff] }
  0x34   : > { %312 = vst.msk [vmem:[#allocation2 + $0x179] sm:$0x1] %vm260_vm1, %v294_v4  ;;  %v5532_v6 = vld [vmem:[#allocation2 + $0x50] sm:$0xff]  ;;  %v246_v7 = vld [vmem:[#allocation2 + $0x62] sm:$0x1]  ;;  %v5540_v9 = vld [vmem:[#allocation2 + $0x68] sm:$0xff] }
  0x35   : > { %v5534_v8 = vld [vmem:[#allocation2 + $0xc9] sm:$0xff]  ;;  %264 = vst.msk [vmem:[#allocation2 + $0x48] sm:$0x1] %vm260_vm1, %v245_v5  ;;  %265 = vst.msk [vmem:[#allocation2 + $0x60] sm:$0x1] %vm260_vm1, %v246_v7  ;;  %v5552_v15 = vld [vmem:[#allocation2 + $0x98] sm:$0xff] }
  0x36   : > { %467 = vrot.lane.b32.xlu0 %v5497_v53, %s5334_s18  ;;  %354 = vst.msk [vmem:[#allocation3 + $0x38] sm:$0xff] %vm204_vm0, %v5532_v6  ;;  %v247_v10 = vld [vmem:[#allocation2 + $0x7a] sm:$0x1]  ;;  %356 = vst.msk [vmem:[#allocation3 + $0x48] sm:$0xff] %vm204_vm0, %v5540_v9  ;;  %v248_v12 = vld [vmem:[#allocation2 + $0x92] sm:$0x1] }
  0x37   : > { %469 = vrot.lane.b32.xlu1 %v5499_v54, %s5334_s18  ;;  %266 = vst.msk [vmem:[#allocation2 + $0x78] sm:$0x1] %vm260_vm1, %v247_v10  ;;  %v315_v13 = vld [vmem:[#allocation2] sm:$0xff]  ;;  %v5547_v14 = vld [vmem:[#allocation2 + $0x18] sm:$0xff]  ;;  %267 = vst.msk [vmem:[#allocation2 + $0x90] sm:$0x1] %vm260_vm1, %v248_v12 }
  0x38   : > { %358 = vst.msk [vmem:[#allocation3 + $0x58] sm:$0xff] %vm204_vm0, %v5545_v11  ;;  %v5558_v16 = vld [vmem:[#allocation2 + $0xd9] sm:$0xff]  ;;  %347 = vst.msk [vmem:[#allocation3] sm:$0xff] %vm204_vm0, %v315_v13  ;;  %v249_v17 = vld [vmem:[#allocation2 + $0xaa] sm:$0x1] }
  0x39   : > { %349 = vst.msk [vmem:[#allocation3 + $0x10] sm:$0xff] %vm204_vm0, %v5547_v14  ;;  %360 = vst.msk [vmem:[#allocation3 + $0x68] sm:$0xff] %vm204_vm0, %v5552_v15  ;;  %v5565_v18 = vld [vmem:[#allocation2 + $0xb0] sm:$0xff]  ;;  %v5567_v19 = vld [vmem:[#allocation2 + $0xe1] sm:$0xff] }
  0x3a   : > { %471 = vrot.lane.b32.xlu0 %v5507_v59, %s5334_s18  ;;  %268 = vst.msk [vmem:[#allocation2 + $0xa8] sm:$0x1] %vm260_vm1, %v249_v17  ;;  %v250_v20 = vld [vmem:[#allocation2 + $0xc2] sm:$0x1]  ;;  %v5572_v21 = vld [vmem:[#allocation2 + $0xc8] sm:$0xff]  ;;  %v5574_v22 = vld [vmem:[#allocation2 + $0x30] sm:$0xff] }
  0x3b   : > { %473 = vrot.lane.b32.xlu1 %v5511_v62, %s5334_s18  ;;  %362 = vst.msk [vmem:[#allocation3 + $0x78] sm:$0xff] %vm204_vm0, %v5565_v18  ;;  %364 = vst.msk [vmem:[#allocation3 + $0x88] sm:$0xff] %vm204_vm0, %v5572_v21  ;;  %v251_v23 = vld [vmem:[#allocation2 + $0xda] sm:$0x1]  ;;  %v5579_v24 = vld [vmem:[#allocation2 + $0xe0] sm:$0xff] }
  0x3c   : > { %269 = vst.msk [vmem:[#allocation2 + $0xc0] sm:$0x1] %vm260_vm1, %v250_v20  ;;  %v5581_v26 = vld [vmem:[#allocation2 + $0xf1] sm:$0xff]  ;;  %v5583_v31 = vld [vmem:[#allocation2 + $0xf9] sm:$0xff]  ;;  %270 = vst.msk [vmem:[#allocation2 + $0xd8] sm:$0x1] %vm260_vm1, %v251_v23 }
  0x3d   : > { %351 = vst.msk [vmem:[#allocation3 + $0x20] sm:$0xff] %vm204_vm0, %v5574_v22  ;;  %366 = vst.msk [vmem:[#allocation3 + $0x98] sm:$0xff] %vm204_vm0, %v5579_v24  ;;  %v252_v33 = vld [vmem:[#allocation2 + $0xf2] sm:$0x1]  ;;  %v5590_v34 = vld [vmem:[#allocation2 + $0xf8] sm:$0xff] }
  0x3e   : > { %475 = vrot.lane.b32.xlu0 %v5522_v3, %s5334_s18  ;;  %v5596_v35 = vld [vmem:[#allocation2 + $0x48] sm:$0xff]  ;;  %v5598_v36 = vld [vmem:[#allocation2 + $0x60] sm:$0xff]  ;;  %271 = vst.msk [vmem:[#allocation2 + $0xf0] sm:$0x1] %vm260_vm1, %v252_v33  ;;  %v5607_v38 = vld [vmem:[#allocation2 + $0x78] sm:$0xff] }
  0x3f   : > { %477 = vrot.lane.b32.xlu1 %v5534_v8, %s5334_s18  ;;  %368 = vst.msk [vmem:[#allocation3 + $0xa8] sm:$0xff] %vm204_vm0, %v5590_v34  ;;  %v253_v37 = vld [vmem:[#allocation2 + $0x10a] sm:$0x1]  ;;  %353 = vst.msk [vmem:[#allocation3 + $0x30] sm:$0xff] %vm204_vm0, %v5596_v35  ;;  %v5610_v39 = vld [vmem:[#allocation2 + $0x110] sm:$0xff] }
  0x40   : > { %355 = vst.msk [vmem:[#allocation3 + $0x40] sm:$0xff] %vm204_vm0, %v5598_v36  ;;  %v254_v40 = vld [vmem:[#allocation2 + $0x122] sm:$0x1]  ;;  %357 = vst.msk [vmem:[#allocation3 + $0x50] sm:$0xff] %vm204_vm0, %v5607_v38  ;;  %v5614_v41 = vld [vmem:[#allocation2 + $0x90] sm:$0xff] }
  0x41   : > { %272 = vst.msk [vmem:[#allocation2 + $0x108] sm:$0x1] %vm260_vm1, %v253_v37  ;;  %273 = vst.msk [vmem:[#allocation2 + $0x120] sm:$0x1] %vm260_vm1, %v254_v40  ;;  %v5619_v42 = vld [vmem:[#allocation2 + $0x128] sm:$0xff]  ;;  %v5626_v46 = vld [vmem:[#allocation2 + $0x140] sm:$0xff] }
  0x42   : > { %479 = vrot.lane.b32.xlu0 %v5558_v16, %s5334_s18  ;;  %370 = vst.msk [vmem:[#allocation3 + $0xb8] sm:$0xff] %vm204_vm0, %v5610_v39  ;;  %v255_v45 = vld [vmem:[#allocation2 + $0x13a] sm:$0x1]  ;;  %359 = vst.msk [vmem:[#allocation3 + $0x60] sm:$0xff] %vm204_vm0, %v5614_v41  ;;  %v256_v47 = vld [vmem:[#allocation2 + $0x152] sm:$0x1] }
  0x43   : > { %481 = vrot.lane.b32.xlu1 %v5567_v19, %s5334_s18  ;;  %372 = vst.msk [vmem:[#allocation3 + $0xc8] sm:$0xff] %vm204_vm0, %v5619_v42  ;;  %v257_v48 = vld [vmem:[#allocation2 + $0x16a] sm:$0x1]  ;;  %374 = vst.msk [vmem:[#allocation3 + $0xd8] sm:$0xff] %vm204_vm0, %v5626_v46  ;;  %v5640_v55 = vld [vmem:[#allocation2 + $0x111] sm:$0xff] }
  0x44   : > { %274 = vst.msk [vmem:[#allocation2 + $0x138] sm:$0x1] %vm260_vm1, %v255_v45  ;;  %v5632_v51 = vld [vmem:[#allocation2 + $0xa8] sm:$0xff]  ;;  %275 = vst.msk [vmem:[#allocation2 + $0x150] sm:$0x1] %vm260_vm1, %v256_v47  ;;  %v5644_v56 = vld [vmem:[#allocation2 + $0xc0] sm:$0xff] }
  0x45   : > { %276 = vst.msk [vmem:[#allocation2 + $0x168] sm:$0x1] %vm260_vm1, %v257_v48  ;;  %v5638_v52 = vld [vmem:[#allocation2 + $0x109] sm:$0xff]  ;;  %v5648_v57 = vld [vmem:[#allocation2 + $0xd8] sm:$0xff]  ;;  %v403_v1 = vld [vmem:[#allocation2 + $0x121] sm:$0xff] }
  0x46   : > { %483 = vrot.lane.b32.xlu0 %v5581_v26, %s5334_s18  ;;  %361 = vst.msk [vmem:[#allocation3 + $0x70] sm:$0xff] %vm204_vm0, %v5632_v51  ;;  %363 = vst.msk [vmem:[#allocation3 + $0x80] sm:$0xff] %vm204_vm0, %v5644_v56  ;;  %v5650_v58 = vld [vmem:[#allocation2 + $0x158] sm:$0xff]  ;;  %v5654_v60 = vld [vmem:[#allocation2 + $0xf0] sm:$0xff] }
  0x47   : > { %485 = vrot.lane.b32.xlu1 %v5583_v31, %s5334_s18  ;;  %365 = vst.msk [vmem:[#allocation3 + $0x90] sm:$0xff] %vm204_vm0, %v5648_v57  ;;  %376 = vst.msk [vmem:[#allocation3 + $0xe8] sm:$0xff] %vm204_vm0, %v5650_v58  ;;  %v201_v61 = vld [vmem:[%s5378_s17 + $0xf0] sm:$0xff]  ;;  %v405_v17 = vld [vmem:[#allocation2 + $0x139] sm:$0xff] }
  0x48   : > { %367 = vst.msk [vmem:[#allocation3 + $0xa0] sm:$0xff] %vm204_vm0, %v5654_v60  ;;  %v5665_v0 = vld [vmem:[#allocation2 + $0x108] sm:$0xff]  ;;  %235 = vst.msk [vmem:[#allocation2 + $0x181] sm:$0xff] %vm204_vm0, %v201_v61  ;;  %v5670_v5 = vld [vmem:[#allocation2 + $0x120] sm:$0xff] }
  0x49   : > { %v404_v4 = vld [vmem:[#allocation2 + $0x129] sm:$0xff]  ;;  %369 = vst.msk [vmem:[#allocation3 + $0xb0] sm:$0xff] %vm204_vm0, %v5665_v0  ;;  %371 = vst.msk [vmem:[#allocation3 + $0xc0] sm:$0xff] %vm204_vm0, %v5670_v5  ;;  %v406_v20 = vld [vmem:[#allocation2 + $0x141] sm:$0xff] }
  0x4a   : > { %487 = vrot.lane.b32.xlu0 %v5638_v52, %s5334_s18  ;;  %v5676_v10 = vld [vmem:[#allocation2 + $0x170] sm:$0xff]  ;;  %v202_v33 = vld [vmem:[%s5378_s17 + $0xf8] sm:$0xff]  ;;  %v572_v48 = vld [vmem:[#allocation2 + $0x2] sm:$0xff] }
  0x4b   : > { %489 = vrot.lane.b32.xlu1 %v5640_v55, %s5334_s18  ;;  %v5674_v7 = vld [vmem:[#allocation2 + $0x138] sm:$0xff]  ;;  %v5680_v12 = vld [vmem:[#allocation2 + $0x150] sm:$0xff]  ;;  %378 = vst.msk [vmem:[#allocation3 + $0xf8] sm:$0xff] %vm204_vm0, %v5676_v10  ;;  %236 = vst.msk [vmem:[#allocation2 + $0x189] sm:$0xff] %vm204_vm0, %v202_v33 }
  0x4c   : > { %373 = vst.msk [vmem:[#allocation3 + $0xd0] sm:$0xff] %vm204_vm0, %v5674_v7  ;;  %v5682_v13 = vld [vmem:[#allocation2 + $0x168] sm:$0xff]  ;;  %375 = vst.msk [vmem:[#allocation3 + $0xe0] sm:$0xff] %vm204_vm0, %v5680_v12  ;;  %v407_v37 = vld [vmem:[#allocation2 + $0x151] sm:$0xff] }
  0x4d   : > { %377 = vst.msk [vmem:[#allocation3 + $0xf0] sm:$0xff] %vm204_vm0, %v5682_v13  ;;  %v408_v40 = vld [vmem:[#allocation2 + $0x159] sm:$0xff]  ;;  %v409_v45 = vld [vmem:[#allocation2 + $0x169] sm:$0xff]  ;;  %v410_v47 = vld [vmem:[#allocation2 + $0x171] sm:$0xff] }
  0x4e   : > { %491 = vrot.lane.b32.xlu0 %v403_v1, %s5334_s18  ;;  %v573_v61 = vld [vmem:[#allocation2 + $0xa] sm:$0xff]  ;;  %v5703_v1 = vld [vmem:[#allocation2 + $0x1a] sm:$0xff]  ;;  %v5721_v33 = vld [vmem:[#allocation2 + $0x52] sm:$0xff] }
  0x4f   : > { %493 = vrot.lane.b32.xlu1 %v404_v4, %s5334_s18  ;;  %v258_v23 = vld [vmem:[#allocation2 + $0x182] sm:$0x1]  ;;  %8075 = vst [vmem:[#allocation7_spill] sm:$0xff] %v5721_v33 }
  0x50   : > { %277 = vst.msk [vmem:[#allocation2 + $0x180] sm:$0x1] %vm260_vm1, %v258_v23  ;;  %v5705_v4 = vld [vmem:[#allocation2 + $0x22] sm:$0xff]  ;;  %v5719_v23 = vld [vmem:[#allocation2 + $0x4a] sm:$0xff] }
  0x51   : > { %8074 = vst [vmem:[#allocation6_spill] sm:$0xff] %v5719_v23 }
  0x52   : > { %495 = vrot.lane.b32.xlu0 %v405_v17, %s5334_s18  ;;  %v5711_v17 = vld [vmem:[#allocation2 + $0x32] sm:$0xff] }
  0x53   : > { %497 = vrot.lane.b32.xlu1 %v406_v20, %s5334_s18  ;;  %8072 = vst [vmem:[#allocation4_spill] sm:$0xff] %v5711_v17  ;;  %v5713_v20 = vld [vmem:[#allocation2 + $0x3a] sm:$0xff] }
  0x54   : > { %8073 = vst [vmem:[#allocation5_spill] sm:$0xff] %v5713_v20 }
  0x56   : > { %499 = vrot.lane.b32.xlu0 %v407_v37, %s5334_s18  ;;  %v5727_v37 = vld [vmem:[#allocation2 + $0x62] sm:$0xff] }
  0x57   : > { %501 = vrot.lane.b32.xlu1 %v408_v40, %s5334_s18  ;;  %8076 = vst [vmem:[#allocation8_spill] sm:$0xff] %v5727_v37  ;;  %v5729_v40 = vld [vmem:[#allocation2 + $0x6a] sm:$0xff] }
  0x58   : > { %8077 = vst [vmem:[#allocation9_spill] sm:$0xff] %v5729_v40 }
  0x5a   : > { %503 = vrot.lane.b32.xlu0 %v409_v45, %s5334_s18  ;;  %v582_v45 = vld [vmem:[#allocation2 + $0x7a] sm:$0xff] }
  0x5b   : > { %505 = vrot.lane.b32.xlu1 %v410_v47, %s5334_s18  ;;  %v583_v47 = vld [vmem:[#allocation2 + $0x82] sm:$0xff] }
  0x5e   : > { %636 = vrot.lane.b32.xlu0 %v572_v48, %s5335_s19  ;;  %v584_v48 = vld [vmem:[#allocation2 + $0x92] sm:$0xff] }
  0x5f   : > { %638 = vrot.lane.b32.xlu1 %v573_v61, %s5335_s19  ;;  %v585_v61 = vld [vmem:[#allocation2 + $0x9a] sm:$0xff] }
  0x62   : > { %640 = vrot.lane.b32.xlu0 %v5703_v1, %s5335_s19 }
  0x63   : > { %642 = vrot.lane.b32.xlu1 %v5705_v4, %s5335_s19 }
  0x66   : > { %644 = vrot.lane.b32.xlu0 %v5711_v17, %s5335_s19 }
  0x67   : > { %646 = vrot.lane.b32.xlu1 %v5713_v20, %s5335_s19 }
  0x6a   : > { %648 = vrot.lane.b32.xlu0 %v5719_v23, %s5335_s19  ;;  %v587_v23 = vld [vmem:[#allocation2 + $0xb2] sm:$0xff] }
  0x6b   : > { %650 = vrot.lane.b32.xlu1 %v5721_v33, %s5335_s19  ;;  %v586_v33 = vld [vmem:[#allocation2 + $0xaa] sm:$0xff] }
  0x6e   : > { %652 = vrot.lane.b32.xlu0 %v5727_v37, %s5335_s19  ;;  %v588_v37 = vld [vmem:[#allocation2 + $0xc2] sm:$0xff] }
  0x6f   : > { %654 = vrot.lane.b32.xlu1 %v5729_v40, %s5335_s19  ;;  %v589_v40 = vld [vmem:[#allocation2 + $0xca] sm:$0xff] }
  0x72   : > { %656 = vrot.lane.b32.xlu0 %v582_v45, %s5335_s19  ;;  %v590_v45 = vld [vmem:[#allocation2 + $0xda] sm:$0xff] }
  0x73   : > { %658 = vrot.lane.b32.xlu1 %v583_v47, %s5335_s19  ;;  %v591_v47 = vld [vmem:[#allocation2 + $0xe2] sm:$0xff] }
  0x76   : > { %660 = vrot.lane.b32.xlu0 %v584_v48, %s5335_s19  ;;  %v592_v48 = vld [vmem:[#allocation2 + $0xf2] sm:$0xff] }
  0x77   : > { %662 = vrot.lane.b32.xlu1 %v585_v61, %s5335_s19  ;;  %v593_v61 = vld [vmem:[#allocation2 + $0xfa] sm:$0xff] }
  0x7a   : > { %664 = vrot.lane.b32.xlu0 %v586_v33, %s5335_s19  ;;  %v594_v33 = vld [vmem:[#allocation2 + $0x10a] sm:$0xff] }
  0x7b   : > { %666 = vrot.lane.b32.xlu1 %v587_v23, %s5335_s19  ;;  %v595_v23 = vld [vmem:[#allocation2 + $0x112] sm:$0xff] }
  0x7e   : > { %668 = vrot.lane.b32.xlu0 %v588_v37, %s5335_s19  ;;  %v596_v37 = vld [vmem:[#allocation2 + $0x122] sm:$0xff] }
  0x7f   : > { %670 = vrot.lane.b32.xlu1 %v589_v40, %s5335_s19  ;;  %v597_v40 = vld [vmem:[#allocation2 + $0x12a] sm:$0xff] }
  0x82   : > { %672 = vrot.lane.b32.xlu0 %v590_v45, %s5335_s19  ;;  %v598_v45 = vld [vmem:[#allocation2 + $0x13a] sm:$0xff] }
  0x83   : > { %674 = vrot.lane.b32.xlu1 %v591_v47, %s5335_s19  ;;  %v599_v47 = vld [vmem:[#allocation2 + $0x142] sm:$0xff] }
  0x86   : > { %676 = vrot.lane.b32.xlu0 %v592_v48, %s5335_s19  ;;  %v600_v48 = vld [vmem:[#allocation2 + $0x152] sm:$0xff] }
  0x87   : > { %678 = vrot.lane.b32.xlu1 %v593_v61, %s5335_s19  ;;  %v601_v61 = vld [vmem:[#allocation2 + $0x15a] sm:$0xff] }
  0x8a   : > { %680 = vrot.lane.b32.xlu0 %v594_v33, %s5335_s19 }
  0x8b   : > { %682 = vrot.lane.b32.xlu1 %v595_v23, %s5335_s19 }
  0x8e   : > { %684 = vrot.lane.b32.xlu0 %v596_v37, %s5335_s19  ;;  %v602_v37 = vld [vmem:[#allocation2 + $0x16a] sm:$0xff] }
  0x8f   : > { %686 = vrot.lane.b32.xlu1 %v597_v40, %s5335_s19 }
  0x90   : > { %v444_v20 = vpop.permute.xlu0 %443 }
  0x91   : > { %v448_v17 = vpop.permute.xlu1 %447  ;;  %540 = vst.msk [vmem:[#allocation3] sm:$0xff] %vm539_vm2, %v444_v20  ;;  %v603_v20 = vld [vmem:[#allocation2 + $0x172] sm:$0xff] }
  0x92   : > { %542 = vst.msk [vmem:[#allocation3 + $0x10] sm:$0xff] %vm539_vm2, %v448_v17  ;;  %688 = vrot.lane.b32.xlu0 %v598_v45, %s5335_s19 }
  0x93   : > { %690 = vrot.lane.b32.xlu1 %v599_v47, %s5335_s19 }
  0x94   : > { %v446_v33 = vpop.permute.xlu0 %445 }
  0x95   : > { %v450_v23 = vpop.permute.xlu1 %449  ;;  %541 = vst.msk [vmem:[#allocation3 + $0x8] sm:$0xff] %vm539_vm2, %v446_v33 }
  0x96   : > { %543 = vst.msk [vmem:[#allocation3 + $0x18] sm:$0xff] %vm539_vm2, %v450_v23  ;;  %692 = vrot.lane.b32.xlu0 %v600_v48, %s5335_s19 }
  0x97   : > { %694 = vrot.lane.b32.xlu1 %v601_v61, %s5335_s19 }
  0x98   : > { %v452_v40 = vpop.permute.xlu0 %451 }
  0x99   : > { %v454_v17 = vpop.permute.xlu1 %453  ;;  %544 = vst.msk [vmem:[#allocation3 + $0x20] sm:$0xff] %vm539_vm2, %v452_v40 }
  0x9a   : > { %545 = vst.msk [vmem:[#allocation3 + $0x28] sm:$0xff] %vm539_vm2, %v454_v17  ;;  %696 = vrot.lane.b32.xlu0 %v602_v37, %s5335_s19 }
  0x9b   : > { %698 = vrot.lane.b32.xlu1 %v603_v20, %s5335_s19 }
  0x9c   : > { %v456_v45 = vpop.permute.xlu0 %455 }
  0x9d   : > { %v458_v47 = vpop.permute.xlu1 %457  ;;  %546 = vst.msk [vmem:[#allocation3 + $0x30] sm:$0xff] %vm539_vm2, %v456_v45 }
  0x9e   : > { %547 = vst.msk [vmem:[#allocation3 + $0x38] sm:$0xff] %vm539_vm2, %v458_v47  ;;  %829 = vrot.lane.b32.xlu0 %v5547_v14, %s5336_s20 }
  0x9f   : > { %831 = vrot.lane.b32.xlu1 %v5515_v63, %s5336_s20 }
  0xa0   : > { %v460_v48 = vpop.permute.xlu0 %459 }
  0xa1   : > { %v462_v61 = vpop.permute.xlu1 %461  ;;  %548 = vst.msk [vmem:[#allocation3 + $0x40] sm:$0xff] %vm539_vm2, %v460_v48 }
  0xa2   : > { %549 = vst.msk [vmem:[#allocation3 + $0x48] sm:$0xff] %vm539_vm2, %v462_v61  ;;  %833 = vrot.lane.b32.xlu0 %v5574_v22, %s5336_s20 }
  0xa3   : > { %835 = vrot.lane.b32.xlu1 %v5520_v2, %s5336_s20 }
  0xa4   : > { %v464_v33 = vpop.permute.xlu0 %463 }
  0xa5   : > { %v466_v23 = vpop.permute.xlu1 %465  ;;  %550 = vst.msk [vmem:[#allocation3 + $0x50] sm:$0xff] %vm539_vm2, %v464_v33 }
  0xa6   : > { %551 = vst.msk [vmem:[#allocation3 + $0x58] sm:$0xff] %vm539_vm2, %v466_v23  ;;  %837 = vrot.lane.b32.xlu0 %v5596_v35, %s5336_s20 }
  0xa7   : > { %839 = vrot.lane.b32.xlu1 %v5532_v6, %s5336_s20 }
  0xa8   : > { %v468_v63 = vpop.permute.xlu0 %467 }
  0xa9   : > { %v470_v14 = vpop.permute.xlu1 %469  ;;  %552 = vst.msk [vmem:[#allocation3 + $0x60] sm:$0xff] %vm539_vm2, %v468_v63 }
  0xaa   : > { %553 = vst.msk [vmem:[#allocation3 + $0x68] sm:$0xff] %vm539_vm2, %v470_v14  ;;  %841 = vrot.lane.b32.xlu0 %v5598_v36, %s5336_s20 }
  0xab   : > { %843 = vrot.lane.b32.xlu1 %v5540_v9, %s5336_s20 }
  0xac   : > { %v472_v37 = vpop.permute.xlu0 %471 }
  0xad   : > { %v474_v20 = vpop.permute.xlu1 %473  ;;  %554 = vst.msk [vmem:[#allocation3 + $0x70] sm:$0xff] %vm539_vm2, %v472_v37 }
  0xae   : > { %555 = vst.msk [vmem:[#allocation3 + $0x78] sm:$0xff] %vm539_vm2, %v474_v20  ;;  %845 = vrot.lane.b32.xlu0 %v5607_v38, %s5336_s20 }
  0xaf   : > { %847 = vrot.lane.b32.xlu1 %v5545_v11, %s5336_s20 }
  0xb0   : > { %v476_v40 = vpop.permute.xlu0 %475 }
  0xb1   : > { %v478_v17 = vpop.permute.xlu1 %477  ;;  %556 = vst.msk [vmem:[#allocation3 + $0x80] sm:$0xff] %vm539_vm2, %v476_v40 }
  0xb2   : > { %557 = vst.msk [vmem:[#allocation3 + $0x88] sm:$0xff] %vm539_vm2, %v478_v17  ;;  %849 = vrot.lane.b32.xlu0 %v5614_v41, %s5336_s20 }
  0xb3   : > { %851 = vrot.lane.b32.xlu1 %v5552_v15, %s5336_s20 }
  0xb4   : > { %v480_v45 = vpop.permute.xlu0 %479 }
  0xb5   : > { %v482_v47 = vpop.permute.xlu1 %481  ;;  %558 = vst.msk [vmem:[#allocation3 + $0x90] sm:$0xff] %vm539_vm2, %v480_v45 }
  0xb6   : > { %559 = vst.msk [vmem:[#allocation3 + $0x98] sm:$0xff] %vm539_vm2, %v482_v47  ;;  %853 = vrot.lane.b32.xlu0 %v5632_v51, %s5336_s20 }
  0xb7   : > { %855 = vrot.lane.b32.xlu1 %v5565_v18, %s5336_s20 }
  0xb8   : > { %v484_v48 = vpop.permute.xlu0 %483 }
  0xb9   : > { %v486_v61 = vpop.permute.xlu1 %485  ;;  %560 = vst.msk [vmem:[#allocation3 + $0xa0] sm:$0xff] %vm539_vm2, %v484_v48 }
  0xba   : > { %561 = vst.msk [vmem:[#allocation3 + $0xa8] sm:$0xff] %vm539_vm2, %v486_v61  ;;  %857 = vrot.lane.b32.xlu0 %v5644_v56, %s5336_s20 }
  0xbb   : > { %859 = vrot.lane.b32.xlu1 %v5572_v21, %s5336_s20 }
  0xbc   : > { %v488_v33 = vpop.permute.xlu0 %487 }
  0xbd   : > { %v490_v23 = vpop.permute.xlu1 %489  ;;  %562 = vst.msk [vmem:[#allocation3 + $0xb0] sm:$0xff] %vm539_vm2, %v488_v33 }
  0xbe   : > { %563 = vst.msk [vmem:[#allocation3 + $0xb8] sm:$0xff] %vm539_vm2, %v490_v23  ;;  %861 = vrot.lane.b32.xlu0 %v5648_v57, %s5336_s20 }
  0xbf   : > { %863 = vrot.lane.b32.xlu1 %v5579_v24, %s5336_s20 }
  0xc0   : > { %v492_v63 = vpop.permute.xlu0 %491 }
  0xc1   : > { %v494_v14 = vpop.permute.xlu1 %493  ;;  %564 = vst.msk [vmem:[#allocation3 + $0xc0] sm:$0xff] %vm539_vm2, %v492_v63 }
  0xc2   : > { %565 = vst.msk [vmem:[#allocation3 + $0xc8] sm:$0xff] %vm539_vm2, %v494_v14  ;;  %865 = vrot.lane.b32.xlu0 %v5654_v60, %s5336_s20  ;;  %v1958_v14 = vld [vmem:[%s8057_s1 + $0x10] sm:$0xff] }
  0xc3   : > { %867 = vrot.lane.b32.xlu1 %v5590_v34, %s5336_s20 }
  0xc4   : > { %v496_v37 = vpop.permute.xlu0 %495 }
  0xc5   : > { %v498_v20 = vpop.permute.xlu1 %497  ;;  %566 = vst.msk [vmem:[#allocation3 + $0xd0] sm:$0xff] %vm539_vm2, %v496_v37  ;;  %v1959_v37 = vld [vmem:[%s8057_s1 + $0x18] sm:$0xff] }
  0xc6   : > { %567 = vst.msk [vmem:[#allocation3 + $0xd8] sm:$0xff] %vm539_vm2, %v498_v20  ;;  %869 = vrot.lane.b32.xlu0 %v5665_v0, %s5336_s20  ;;  %v1539_v20 = vld [vmem:[#allocation2 + $0x39] sm:$0xff] }
  0xc7   : > { %871 = vrot.lane.b32.xlu1 %v5610_v39, %s5336_s20 }
  0xc8   : > { %v500_v40 = vpop.permute.xlu0 %499 }
  0xc9   : > { %v502_v17 = vpop.permute.xlu1 %501  ;;  %568 = vst.msk [vmem:[#allocation3 + $0xe0] sm:$0xff] %vm539_vm2, %v500_v40 }
  0xca   : > { %569 = vst.msk [vmem:[#allocation3 + $0xe8] sm:$0xff] %vm539_vm2, %v502_v17  ;;  %873 = vrot.lane.b32.xlu0 %v5670_v5, %s5336_s20 }
  0xcb   : > { %875 = vrot.lane.b32.xlu1 %v5619_v42, %s5336_s20 }
  0xcc   : > { %v504_v45 = vpop.permute.xlu0 %503 }
  0xcd   : > { %v506_v47 = vpop.permute.xlu1 %505  ;;  %570 = vst.msk [vmem:[#allocation3 + $0xf0] sm:$0xff] %vm539_vm2, %v504_v45 }
  0xce   : > { %571 = vst.msk [vmem:[#allocation3 + $0xf8] sm:$0xff] %vm539_vm2, %v506_v47  ;;  %877 = vrot.lane.b32.xlu0 %v5674_v7, %s5336_s20  ;;  %v796_v7 = vld [vmem:[#allocation2 + $0x188] sm:$0xff]  ;;  %v8078_v47 = vld [vmem:[#allocation4_spill] sm:$0xff] }
  0xcf   : > { %879 = vrot.lane.b32.xlu1 %v5626_v46, %s5336_s20  ;;  %v795_v46 = vld [vmem:[#allocation2 + $0x180] sm:$0xff] }
  0xd0   : > { %v637_v39 = vpop.permute.xlu0 %636 }
  0xd1   : > { %v639_v0 = vpop.permute.xlu1 %638  ;;  %733 = vst.msk [vmem:[#allocation3] sm:$0xff] %vm732_vm3, %v637_v39 }
  0xd2   : > { %734 = vst.msk [vmem:[#allocation3 + $0x8] sm:$0xff] %vm732_vm3, %v639_v0  ;;  %881 = vrot.lane.b32.xlu0 %v5680_v12, %s5336_s20 }
  0xd3   : > { %883 = vrot.lane.b32.xlu1 %v5650_v58, %s5336_s20 }
  0xd4   : > { %v641_v42 = vpop.permute.xlu0 %640 }
  0xd5   : > { %v643_v5 = vpop.permute.xlu1 %642  ;;  %735 = vst.msk [vmem:[#allocation3 + $0x10] sm:$0xff] %vm732_vm3, %v641_v42  ;;  %v8079_v42 = vld [vmem:[#allocation5_spill] sm:$0xff] }
  0xd6   : > { %736 = vst.msk [vmem:[#allocation3 + $0x18] sm:$0xff] %vm732_vm3, %v643_v5  ;;  %885 = vrot.lane.b32.xlu0 %v5682_v13, %s5336_s20 }
  0xd7   : > { %887 = vrot.lane.b32.xlu1 %v5676_v10, %s5336_s20 }
  0xd8   : > { %v645_v48 = vpop.permute.xlu0 %644 }
  0xd9   : > { %v647_v61 = vpop.permute.xlu1 %646  ;;  %737 = vst.msk [vmem:[#allocation3 + $0x20] sm:$0xff] %vm732_vm3, %v645_v48  ;;  %v1541_v48 = vld [vmem:[#allocation2 + $0x51] sm:$0xff] }
  0xda   : > { %738 = vst.msk [vmem:[#allocation3 + $0x28] sm:$0xff] %vm732_vm3, %v647_v61  ;;  %889 = vrot.lane.b32.xlu0 %v795_v46, %s5336_s20 }
  0xdb   : > { %891 = vrot.lane.b32.xlu1 %v796_v7, %s5336_s20  ;;  %v1540_v7 = vld [vmem:[#allocation2 + $0x49] sm:$0xff] }
  0xdc   : > { %v649_v58 = vpop.permute.xlu0 %648 }
  0xdd   : > { %v651_v12 = vpop.permute.xlu1 %650  ;;  %739 = vst.msk [vmem:[#allocation3 + $0x30] sm:$0xff] %vm732_vm3, %v649_v58 }
  0xde   : > { %740 = vst.msk [vmem:[#allocation3 + $0x38] sm:$0xff] %vm732_vm3, %v651_v12  ;;  %1022 = vrot.lane.b32.xlu0 %v5427_v25, %s5337_s21 }
  0xdf   : > { %1024 = vrot.lane.b32.xlu1 %v5435_v27, %s5337_s21 }
  0xe0   : > { %v653_v10 = vpop.permute.xlu0 %652 }
  0xe1   : > { %v655_v13 = vpop.permute.xlu1 %654  ;;  %741 = vst.msk [vmem:[#allocation3 + $0x40] sm:$0xff] %vm732_vm3, %v653_v10 }
  0xe2   : > { %742 = vst.msk [vmem:[#allocation3 + $0x48] sm:$0xff] %vm732_vm3, %v655_v13  ;;  %1026 = vrot.lane.b32.xlu0 %v5440_v28, %s5337_s21 }
  0xe3   : > { %1028 = vrot.lane.b32.xlu1 %v5442_v29, %s5337_s21 }
  0xe4   : > { %v657_v33 = vpop.permute.xlu0 %656 }
  0xe5   : > { %v659_v23 = vpop.permute.xlu1 %658  ;;  %743 = vst.msk [vmem:[#allocation3 + $0x50] sm:$0xff] %vm732_vm3, %v657_v33  ;;  %v8081_v33 = vld [vmem:[#allocation7_spill] sm:$0xff] }
  0xe6   : > { %744 = vst.msk [vmem:[#allocation3 + $0x58] sm:$0xff] %vm732_vm3, %v659_v23  ;;  %1030 = vrot.lane.b32.xlu0 %v5444_v30, %s5337_s21 }
  0xe7   : > { %1032 = vrot.lane.b32.xlu1 %v5451_v32, %s5337_s21 }
  0xe8   : > { %v661_v25 = vpop.permute.xlu0 %660 }
  0xe9   : > { %v663_v27 = vpop.permute.xlu1 %662  ;;  %745 = vst.msk [vmem:[#allocation3 + $0x60] sm:$0xff] %vm732_vm3, %v661_v25 }
  0xea   : > { %746 = vst.msk [vmem:[#allocation3 + $0x68] sm:$0xff] %vm732_vm3, %v663_v27  ;;  %1034 = vrot.lane.b32.xlu0 %v5473_v43, %s5337_s21  ;;  %v1542_v27 = vld [vmem:[#allocation2 + $0x61] sm:$0xff] }
  0xeb   : > { %1036 = vrot.lane.b32.xlu1 %v5475_v44, %s5337_s21 }
  0xec   : > { %v665_v28 = vpop.permute.xlu0 %664 }
  0xed   : > { %v667_v29 = vpop.permute.xlu1 %666  ;;  %747 = vst.msk [vmem:[#allocation3 + $0x70] sm:$0xff] %vm732_vm3, %v665_v28  ;;  %v1543_v28 = vld [vmem:[#allocation2 + $0x69] sm:$0xff] }
  0xee   : > { %748 = vst.msk [vmem:[#allocation3 + $0x78] sm:$0xff] %vm732_vm3, %v667_v29  ;;  %1038 = vrot.lane.b32.xlu0 %v5487_v49, %s5337_s21 }
  0xef   : > { %1040 = vrot.lane.b32.xlu1 %v5489_v50, %s5337_s21 }
  0xf0   : > { %v669_v30 = vpop.permute.xlu0 %668 }
  0xf1   : > { %v671_v32 = vpop.permute.xlu1 %670  ;;  %749 = vst.msk [vmem:[#allocation3 + $0x80] sm:$0xff] %vm732_vm3, %v669_v30 }
  0xf2   : > { %750 = vst.msk [vmem:[#allocation3 + $0x88] sm:$0xff] %vm732_vm3, %v671_v32  ;;  %1042 = vrot.lane.b32.xlu0 %v5497_v53, %s5337_s21 }
  0xf3   : > { %1044 = vrot.lane.b32.xlu1 %v5499_v54, %s5337_s21 }
  0xf4   : > { %v673_v43 = vpop.permute.xlu0 %672 }
  0xf5   : > { %v675_v44 = vpop.permute.xlu1 %674  ;;  %751 = vst.msk [vmem:[#allocation3 + $0x90] sm:$0xff] %vm732_vm3, %v673_v43 }
  0xf6   : > { %752 = vst.msk [vmem:[#allocation3 + $0x98] sm:$0xff] %vm732_vm3, %v675_v44  ;;  %1046 = vrot.lane.b32.xlu0 %v5507_v59, %s5337_s21 }
  0xf7   : > { %1048 = vrot.lane.b32.xlu1 %v5511_v62, %s5337_s21 }
  0xf8   : > { %v677_v49 = vpop.permute.xlu0 %676 }
  0xf9   : > { %v679_v50 = vpop.permute.xlu1 %678  ;;  %753 = vst.msk [vmem:[#allocation3 + $0xa0] sm:$0xff] %vm732_vm3, %v677_v49  ;;  %v8083_v49 = vld [vmem:[#allocation9_spill] sm:$0xff] }
  0xfa   : > { %754 = vst.msk [vmem:[#allocation3 + $0xa8] sm:$0xff] %vm732_vm3, %v679_v50  ;;  %1050 = vrot.lane.b32.xlu0 %v5522_v3, %s5337_s21 }
  0xfb   : > { %1052 = vrot.lane.b32.xlu1 %v5534_v8, %s5337_s21 }
  0xfc   : > { %v681_v53 = vpop.permute.xlu0 %680 }
  0xfd   : > { %v683_v54 = vpop.permute.xlu1 %682  ;;  %755 = vst.msk [vmem:[#allocation3 + $0xb0] sm:$0xff] %vm732_vm3, %v681_v53 }
  0xfe   : > { %756 = vst.msk [vmem:[#allocation3 + $0xb8] sm:$0xff] %vm732_vm3, %v683_v54  ;;  %1054 = vrot.lane.b32.xlu0 %v5558_v16, %s5337_s21  ;;  %v1544_v54 = vld [vmem:[#allocation2 + $0x79] sm:$0xff] }
  0xff   : > { %1056 = vrot.lane.b32.xlu1 %v5567_v19, %s5337_s21 }
 0x100   : > { %v685_v59 = vpop.permute.xlu0 %684 }
 0x101   : > { %v687_v62 = vpop.permute.xlu1 %686  ;;  %757 = vst.msk [vmem:[#allocation3 + $0xc0] sm:$0xff] %vm732_vm3, %v685_v59  ;;  %v1545_v59 = vld [vmem:[#allocation2 + $0x81] sm:$0xff] }
 0x102   : > { %758 = vst.msk [vmem:[#allocation3 + $0xc8] sm:$0xff] %vm732_vm3, %v687_v62  ;;  %1058 = vrot.lane.b32.xlu0 %v5581_v26, %s5337_s21  ;;  %v1956_v26 = vld [vmem:[%s8057_s1] sm:$0xff] }
 0x103   : > { %1060 = vrot.lane.b32.xlu1 %v5583_v31, %s5337_s21  ;;  %v1957_v31 = vld [vmem:[%s8057_s1 + $0x8] sm:$0xff] }
 0x104   : > { %v689_v3 = vpop.permute.xlu0 %688  ;;  %v5290_v63 = vpack.c.bf16 %v1957_v31, %v1956_v26 }
 0x105   : > { %v691_v8 = vpop.permute.xlu1 %690  ;;  %759 = vst.msk [vmem:[#allocation3 + $0xd0] sm:$0xff] %vm732_vm3, %v689_v3 }
 0x106   : > { %760 = vst.msk [vmem:[#allocation3 + $0xd8] sm:$0xff] %vm732_vm3, %v691_v8  ;;  %1062 = vrot.lane.b32.xlu0 %v5638_v52, %s5337_s21  ;;  %5291 = vmatprep.subr.bf16.mxu0 %v5290_v63  ;;  %v1737_v8 = vld [vmem:[#allocation2 + $0x7a] sm:$0xff] }
 0x107   : > { %1064 = vrot.lane.b32.xlu1 %v5640_v55, %s5337_s21  ;;  %5293 = vmatpush3.bf16.msra.mxu0 %v5290_v63 }
 0x108   : > { %v693_v16 = vpop.permute.xlu0 %692 }
 0x109   : > { %v695_v19 = vpop.permute.xlu1 %694  ;;  %761 = vst.msk [vmem:[#allocation3 + $0xe0] sm:$0xff] %vm732_vm3, %v693_v16 }
 0x10a   : > { %762 = vst.msk [vmem:[#allocation3 + $0xe8] sm:$0xff] %vm732_vm3, %v695_v19  ;;  %1215 = vrot.lane.b32.xlu0 %v5703_v1, %s5338_s26  ;;  %v5294_v1 = vpack.c.bf16 %v1959_v37, %v1958_v14 }
 0x10b   : > { %1217 = vrot.lane.b32.xlu1 %v5705_v4, %s5338_s26  ;;  %v1538_v4 = vld [vmem:[#allocation2 + $0x31] sm:$0xff] }
 0x10c   : > { %v697_v52 = vpop.permute.xlu0 %696  ;;  %5295 = vmatprep.subr.bf16.mxu0 %v5294_v1 }
 0x10d   : > { %v699_v55 = vpop.permute.xlu1 %698  ;;  %763 = vst.msk [vmem:[#allocation3 + $0xf0] sm:$0xff] %vm732_vm3, %v697_v52  ;;  %5297 = vmatpush3.bf16.msra.mxu0 %v5294_v1  ;;  %v1546_v52 = vld [vmem:[#allocation2 + $0x91] sm:$0xff] }
 0x10e   : > { %764 = vst.msk [vmem:[#allocation3 + $0xf8] sm:$0xff] %vm732_vm3, %v699_v55  ;;  %1409 = vrot.lane.b32.xlu0 %v5574_v22, %s5339_s4  ;;  %v1547_v55 = vld [vmem:[#allocation2 + $0x99] sm:$0xff] }
 0x10f   : > { %1411 = vrot.lane.b32.xlu1 %v5520_v2, %s5339_s4  ;;  %v1960_v2 = vld [vmem:[%s8057_s1 + $0x20] sm:$0xf]  ;;  %v1739_v1 = vld [vmem:[#allocation2 + $0x92] sm:$0xff] }
 0x110   : > { %v830_v40 = vpop.permute.xlu0 %829  ;;  %5182 = vmatprep.subr.msk.mxu0 %vm2058_vm5, %v1960_v2 }
 0x111   : > { %v832_v17 = vpop.permute.xlu1 %831  ;;  %926 = vst.msk [vmem:[#allocation3] sm:$0xff] %vm925_vm4, %v830_v40  ;;  %5183 = vmatpush3.msk.msra.mxu0 %vm2058_vm5, %v1960_v2 }
 0x112   : > { %927 = vst.msk [vmem:[#allocation3 + $0x8] sm:$0xff] %vm925_vm4, %v832_v17  ;;  %1602 = vrot.lane.b32.xlu0 %v1538_v4, %s5340_s5 }
 0x113   : > { %1604 = vrot.lane.b32.xlu1 %v1539_v20, %s5340_s5 }
 0x114   : > { %v834_v22 = vpop.permute.xlu0 %833 }
 0x115   : > { %v836_v45 = vpop.permute.xlu1 %835  ;;  %928 = vst.msk [vmem:[#allocation3 + $0x10] sm:$0xff] %vm925_vm4, %v834_v22  ;;  %v1548_v22 = vld [vmem:[#allocation2 + $0xa9] sm:$0xff] }
 0x116   : > { %929 = vst.msk [vmem:[#allocation3 + $0x18] sm:$0xff] %vm925_vm4, %v836_v45  ;;  %1795 = vrot.lane.b32.xlu0 %v8078_v47, %s5341_s8  ;;  %v1549_v45 = vld [vmem:[#allocation2 + $0xb1] sm:$0xff] }
 0x117   : > { %1219 = vrot.lane.b32.xlu1 %v8078_v47, %s5338_s26 }
 0x118   : > { %v838_v39 = vpop.permute.xlu0 %837 }
 0x119   : > { %v840_v0 = vpop.permute.xlu1 %839  ;;  %930 = vst.msk [vmem:[#allocation3 + $0x20] sm:$0xff] %vm925_vm4, %v838_v39 }
 0x11a   : > { %931 = vst.msk [vmem:[#allocation3 + $0x28] sm:$0xff] %vm925_vm4, %v840_v0  ;;  %1797 = vrot.lane.b32.xlu0 %v8079_v42, %s5341_s8  ;;  %v1741_v0 = vld [vmem:[#allocation2 + $0xaa] sm:$0xff] }
 0x11b   : > { %1221 = vrot.lane.b32.xlu1 %v8079_v42, %s5338_s26 }
 0x11c   : > { %v842_v5 = vpop.permute.xlu0 %841 }
 0x11d   : > { %v844_v46 = vpop.permute.xlu1 %843  ;;  %932 = vst.msk [vmem:[#allocation3 + $0x30] sm:$0xff] %vm925_vm4, %v842_v5 }
 0x11e   : > { %933 = vst.msk [vmem:[#allocation3 + $0x38] sm:$0xff] %vm925_vm4, %v844_v46  ;;  %1413 = vrot.lane.b32.xlu0 %v5596_v35, %s5339_s4 }
 0x11f   : > { %1415 = vrot.lane.b32.xlu1 %v5532_v6, %s5339_s4  ;;  %v8080_v6 = vld [vmem:[#allocation6_spill] sm:$0xff] }
 0x120   : > { %v846_v61 = vpop.permute.xlu0 %845 }
 0x121   : > { %v848_v58 = vpop.permute.xlu1 %847  ;;  %934 = vst.msk [vmem:[#allocation3 + $0x40] sm:$0xff] %vm925_vm4, %v846_v61  ;;  %v1550_v61 = vld [vmem:[#allocation2 + $0xc1] sm:$0xff] }
 0x122   : > { %935 = vst.msk [vmem:[#allocation3 + $0x48] sm:$0xff] %vm925_vm4, %v848_v58  ;;  %1606 = vrot.lane.b32.xlu0 %v1540_v7, %s5340_s5  ;;  %v1551_v58 = vld [vmem:[#allocation2 + $0xc9] sm:$0xff] }
 0x123   : > { %1608 = vrot.lane.b32.xlu1 %v1541_v48, %s5340_s5 }
 0x124   : > { %v850_v12 = vpop.permute.xlu0 %849 }
 0x125   : > { %v852_v10 = vpop.permute.xlu1 %851  ;;  %936 = vst.msk [vmem:[#allocation3 + $0x50] sm:$0xff] %vm925_vm4, %v850_v12 }
 0x126   : > { %937 = vst.msk [vmem:[#allocation3 + $0x58] sm:$0xff] %vm925_vm4, %v852_v10  ;;  %1799 = vrot.lane.b32.xlu0 %v8080_v6, %s5341_s8 }
 0x127   : > { %1223 = vrot.lane.b32.xlu1 %v8080_v6, %s5338_s26  ;;  %v1743_v6 = vld [vmem:[#allocation2 + $0xc2] sm:$0xff] }
 0x128   : > { %v854_v35 = vpop.permute.xlu0 %853 }
 0x129   : > { %v856_v13 = vpop.permute.xlu1 %855  ;;  %938 = vst.msk [vmem:[#allocation3 + $0x60] sm:$0xff] %vm925_vm4, %v854_v35 }
 0x12a   : > { %939 = vst.msk [vmem:[#allocation3 + $0x68] sm:$0xff] %vm925_vm4, %v856_v13  ;;  %1801 = vrot.lane.b32.xlu0 %v8081_v33, %s5341_s8 }
 0x12b   : > { %1225 = vrot.lane.b32.xlu1 %v8081_v33, %s5338_s26 }
 0x12c   : > { %v858_v23 = vpop.permute.xlu0 %857 }
 0x12d   : > { %v860_v25 = vpop.permute.xlu1 %859  ;;  %940 = vst.msk [vmem:[#allocation3 + $0x70] sm:$0xff] %vm925_vm4, %v858_v23 }
 0x12e   : > { %941 = vst.msk [vmem:[#allocation3 + $0x78] sm:$0xff] %vm925_vm4, %v860_v25  ;;  %1417 = vrot.lane.b32.xlu0 %v5598_v36, %s5339_s4 }
 0x12f   : > { %1419 = vrot.lane.b32.xlu1 %v5540_v9, %s5339_s4  ;;  %v8082_v9 = vld [vmem:[#allocation8_spill] sm:$0xff] }
 0x130   : > { %v862_v29 = vpop.permute.xlu0 %861 }
 0x131   : > { %v864_v30 = vpop.permute.xlu1 %863  ;;  %942 = vst.msk [vmem:[#allocation3 + $0x80] sm:$0xff] %vm925_vm4, %v862_v29 }
 0x132   : > { %943 = vst.msk [vmem:[#allocation3 + $0x88] sm:$0xff] %vm925_vm4, %v864_v30  ;;  %1610 = vrot.lane.b32.xlu0 %v1542_v27, %s5340_s5  ;;  %v1552_v27 = vld [vmem:[#allocation2 + $0xd9] sm:$0xff] }
 0x133   : > { %1612 = vrot.lane.b32.xlu1 %v1543_v28, %s5340_s5  ;;  %v1553_v28 = vld [vmem:[#allocation2 + $0xe1] sm:$0xff] }
 0x134   : > { %v866_v32 = vpop.permute.xlu0 %865 }
 0x135   : > { %v868_v43 = vpop.permute.xlu1 %867  ;;  %944 = vst.msk [vmem:[#allocation3 + $0x90] sm:$0xff] %vm925_vm4, %v866_v32  ;;  %v1745_v32 = vld [vmem:[#allocation2 + $0xda] sm:$0xff] }
 0x136   : > { %945 = vst.msk [vmem:[#allocation3 + $0x98] sm:$0xff] %vm925_vm4, %v868_v43  ;;  %1803 = vrot.lane.b32.xlu0 %v8082_v9, %s5341_s8 }
 0x137   : > { %1227 = vrot.lane.b32.xlu1 %v8082_v9, %s5338_s26  ;;  %v1746_v9 = vld [vmem:[#allocation2 + $0xe2] sm:$0xff] }
 0x138   : > { %v870_v36 = vpop.permute.xlu0 %869 }
 0x139   : > { %v872_v44 = vpop.permute.xlu1 %871  ;;  %946 = vst.msk [vmem:[#allocation3 + $0xa0] sm:$0xff] %vm925_vm4, %v870_v36 }
 0x13a   : > { %947 = vst.msk [vmem:[#allocation3 + $0xa8] sm:$0xff] %vm925_vm4, %v872_v44  ;;  %1805 = vrot.lane.b32.xlu0 %v8083_v49, %s5341_s8 }
 0x13b   : > { %1229 = vrot.lane.b32.xlu1 %v8083_v49, %s5338_s26  ;;  %v259_v49 = vld [vmem:[#allocation2 + $0x19a] sm:$0x1] }
 0x13c   : > { %v874_v50 = vpop.permute.xlu0 %873  ;;  %278 = vst.msk [vmem:[#allocation2 + $0x198] sm:$0x1] %vm260_vm1, %v259_v49 }
 0x13d   : > { %v876_v53 = vpop.permute.xlu1 %875  ;;  %948 = vst.msk [vmem:[#allocation3 + $0xb0] sm:$0xff] %vm925_vm4, %v874_v50 }
 0x13e   : > { %949 = vst.msk [vmem:[#allocation3 + $0xb8] sm:$0xff] %vm925_vm4, %v876_v53  ;;  %1421 = vrot.lane.b32.xlu0 %v5607_v38, %s5339_s4 }
 0x13f   : > { %1423 = vrot.lane.b32.xlu1 %v5545_v11, %s5339_s4  ;;  %v1738_v11 = vld [vmem:[#allocation2 + $0x82] sm:$0xff] }
 0x140   : > { %v878_v62 = vpop.permute.xlu0 %877 }
 0x141   : > { %v880_v3 = vpop.permute.xlu1 %879  ;;  %950 = vst.msk [vmem:[#allocation3 + $0xc0] sm:$0xff] %vm925_vm4, %v878_v62 }
 0x142   : > { %951 = vst.msk [vmem:[#allocation3 + $0xc8] sm:$0xff] %vm925_vm4, %v880_v3  ;;  %1614 = vrot.lane.b32.xlu0 %v1544_v54, %s5340_s5  ;;  %v1554_v54 = vld [vmem:[#allocation2 + $0xf1] sm:$0xff] }
 0x143   : > { %1616 = vrot.lane.b32.xlu1 %v1545_v59, %s5340_s5  ;;  %v1555_v59 = vld [vmem:[#allocation2 + $0xf9] sm:$0xff] }
 0x144   : > { %v882_v16 = vpop.permute.xlu0 %881 }
 0x145   : > { %v884_v19 = vpop.permute.xlu1 %883  ;;  %952 = vst.msk [vmem:[#allocation3 + $0xd0] sm:$0xff] %vm925_vm4, %v882_v16  ;;  %v1747_v16 = vld [vmem:[#allocation2 + $0xf2] sm:$0xff] }
 0x146   : > { %953 = vst.msk [vmem:[#allocation3 + $0xd8] sm:$0xff] %vm925_vm4, %v884_v19  ;;  %1807 = vrot.lane.b32.xlu0 %v1737_v8, %s5341_s8 }
 0x147   : > { %1231 = vrot.lane.b32.xlu1 %v1737_v8, %s5338_s26 }
 0x148   : > { %v886_v38 = vpop.permute.xlu0 %885 }
 0x149   : > { %v888_v26 = vpop.permute.xlu1 %887  ;;  %954 = vst.msk [vmem:[#allocation3 + $0xe0] sm:$0xff] %vm925_vm4, %v886_v38  ;;  %v1748_v38 = vld [vmem:[#allocation2 + $0xfa] sm:$0xff] }
 0x14a   : > { %955 = vst.msk [vmem:[#allocation3 + $0xe8] sm:$0xff] %vm925_vm4, %v888_v26  ;;  %1809 = vrot.lane.b32.xlu0 %v1738_v11, %s5341_s8 }
 0x14b   : > { %1233 = vrot.lane.b32.xlu1 %v1738_v11, %s5338_s26 }
 0x14c   : > { %v890_v31 = vpop.permute.xlu0 %889 }
 0x14d   : > { %v892_v63 = vpop.permute.xlu1 %891  ;;  %956 = vst.msk [vmem:[#allocation3 + $0xf0] sm:$0xff] %vm925_vm4, %v890_v31 }
 0x14e   : > { %957 = vst.msk [vmem:[#allocation3 + $0xf8] sm:$0xff] %vm925_vm4, %v892_v63  ;;  %1425 = vrot.lane.b32.xlu0 %v5614_v41, %s5339_s4  ;;  %v1363_v63 = vld [vmem:[#allocation2 + $0x108] sm:$0xff] }
 0x14f   : > { %1427 = vrot.lane.b32.xlu1 %v5552_v15, %s5339_s4  ;;  %v1740_v15 = vld [vmem:[#allocation2 + $0x9a] sm:$0xff] }
 0x150   : > { %v1023_v14 = vpop.permute.xlu0 %1022 }
 0x151   : > { %v1025_v37 = vpop.permute.xlu1 %1024  ;;  %1119 = vst.msk [vmem:[#allocation3] sm:$0xff] %vm1118_vm6, %v1023_v14 }
 0x152   : > { %1120 = vst.msk [vmem:[#allocation3 + $0x8] sm:$0xff] %vm1118_vm6, %v1025_v37  ;;  %1618 = vrot.lane.b32.xlu0 %v1546_v52, %s5340_s5  ;;  %v1364_v52 = vld [vmem:[#allocation2 + $0x110] sm:$0xff] }
 0x153   : > { %1620 = vrot.lane.b32.xlu1 %v1547_v55, %s5340_s5  ;;  %v1556_v37 = vld [vmem:[#allocation2 + $0x109] sm:$0xff] }
 0x154   : > { %v1027_v4 = vpop.permute.xlu0 %1026 }
 0x155   : > { %v1029_v20 = vpop.permute.xlu1 %1028  ;;  %1121 = vst.msk [vmem:[#allocation3 + $0x10] sm:$0xff] %vm1118_vm6, %v1027_v4 }
 0x156   : > { %1122 = vst.msk [vmem:[#allocation3 + $0x18] sm:$0xff] %vm1118_vm6, %v1029_v20  ;;  %1811 = vrot.lane.b32.xlu0 %v1739_v1, %s5341_s8 }
 0x157   : > { %1235 = vrot.lane.b32.xlu1 %v1739_v1, %s5338_s26  ;;  %v1557_v1 = vld [vmem:[#allocation2 + $0x111] sm:$0xff] }
 0x158   : > { %v1031_v41 = vpop.permute.xlu0 %1030 }
 0x159   : > { %v1033_v40 = vpop.permute.xlu1 %1032  ;;  %1123 = vst.msk [vmem:[#allocation3 + $0x20] sm:$0xff] %vm1118_vm6, %v1031_v41  ;;  %v1749_v41 = vld [vmem:[#allocation2 + $0x10a] sm:$0xff] }
 0x15a   : > { %1124 = vst.msk [vmem:[#allocation3 + $0x28] sm:$0xff] %vm1118_vm6, %v1033_v40  ;;  %1813 = vrot.lane.b32.xlu0 %v1740_v15, %s5341_s8 }
 0x15b   : > { %1237 = vrot.lane.b32.xlu1 %v1740_v15, %s5338_s26 }
 0x15c   : > { %v1035_v17 = vpop.permute.xlu0 %1034 }
 0x15d   : > { %v1037_v2 = vpop.permute.xlu1 %1036  ;;  %1125 = vst.msk [vmem:[#allocation3 + $0x30] sm:$0xff] %vm1118_vm6, %v1035_v17 }
 0x15e   : > { %1126 = vst.msk [vmem:[#allocation3 + $0x38] sm:$0xff] %vm1118_vm6, %v1037_v2  ;;  %1429 = vrot.lane.b32.xlu0 %v5632_v51, %s5339_s4 }
 0x15f   : > { %1431 = vrot.lane.b32.xlu1 %v5565_v18, %s5339_s4  ;;  %v1742_v18 = vld [vmem:[#allocation2 + $0xb2] sm:$0xff] }
 0x160   : > { %v1039_v47 = vpop.permute.xlu0 %1038 }
 0x161   : > { %v1041_v39 = vpop.permute.xlu1 %1040  ;;  %1127 = vst.msk [vmem:[#allocation3 + $0x40] sm:$0xff] %vm1118_vm6, %v1039_v47 }
 0x162   : > { %1128 = vst.msk [vmem:[#allocation3 + $0x48] sm:$0xff] %vm1118_vm6, %v1041_v39  ;;  %1622 = vrot.lane.b32.xlu0 %v1548_v22, %s5340_s5  ;;  %v1750_v22 = vld [vmem:[#allocation2 + $0x112] sm:$0xff]  ;;  %v1365_v39 = vld [vmem:[#allocation2 + $0x120] sm:$0xff] }
 0x163   : > { %1624 = vrot.lane.b32.xlu1 %v1549_v45, %s5340_s5 }
 0x164   : > { %v1043_v42 = vpop.permute.xlu0 %1042 }
 0x165   : > { %v1045_v5 = vpop.permute.xlu1 %1044  ;;  %1129 = vst.msk [vmem:[#allocation3 + $0x50] sm:$0xff] %vm1118_vm6, %v1043_v42 }
 0x166   : > { %1130 = vst.msk [vmem:[#allocation3 + $0x58] sm:$0xff] %vm1118_vm6, %v1045_v5  ;;  %1815 = vrot.lane.b32.xlu0 %v1741_v0, %s5341_s8 }
 0x167   : > { %1239 = vrot.lane.b32.xlu1 %v1741_v0, %s5338_s26  ;;  %v1366_v0 = vld [vmem:[#allocation2 + $0x128] sm:$0xff] }
 0x168   : > { %v1047_v51 = vpop.permute.xlu0 %1046 }
 0x169   : > { %v1049_v46 = vpop.permute.xlu1 %1048  ;;  %1131 = vst.msk [vmem:[#allocation3 + $0x60] sm:$0xff] %vm1118_vm6, %v1047_v51 }
 0x16a   : > { %1132 = vst.msk [vmem:[#allocation3 + $0x68] sm:$0xff] %vm1118_vm6, %v1049_v46  ;;  %1817 = vrot.lane.b32.xlu0 %v1742_v18, %s5341_s8 }
 0x16b   : > { %1241 = vrot.lane.b32.xlu1 %v1742_v18, %s5338_s26  ;;  %v1558_v18 = vld [vmem:[#allocation2 + $0x121] sm:$0xff] }
 0x16c   : > { %v1051_v7 = vpop.permute.xlu0 %1050 }
 0x16d   : > { %v1053_v48 = vpop.permute.xlu1 %1052  ;;  %1133 = vst.msk [vmem:[#allocation3 + $0x70] sm:$0xff] %vm1118_vm6, %v1051_v7 }
 0x16e   : > { %1134 = vst.msk [vmem:[#allocation3 + $0x78] sm:$0xff] %vm1118_vm6, %v1053_v48  ;;  %1433 = vrot.lane.b32.xlu0 %v5644_v56, %s5339_s4  ;;  %v1559_v48 = vld [vmem:[#allocation2 + $0x129] sm:$0xff] }
 0x16f   : > { %1435 = vrot.lane.b32.xlu1 %v5572_v21, %s5339_s4  ;;  %v1744_v21 = vld [vmem:[#allocation2 + $0xca] sm:$0xff] }
 0x170   : > { %v1055_v12 = vpop.permute.xlu0 %1054 }
 0x171   : > { %v1057_v10 = vpop.permute.xlu1 %1056  ;;  %1135 = vst.msk [vmem:[#allocation3 + $0x80] sm:$0xff] %vm1118_vm6, %v1055_v12 }
 0x172   : > { %1136 = vst.msk [vmem:[#allocation3 + $0x88] sm:$0xff] %vm1118_vm6, %v1057_v10  ;;  %1626 = vrot.lane.b32.xlu0 %v1550_v61, %s5340_s5  ;;  %v1751_v61 = vld [vmem:[#allocation2 + $0x122] sm:$0xff] }
 0x173   : > { %1628 = vrot.lane.b32.xlu1 %v1551_v58, %s5340_s5 }
 0x174   : > { %v1059_v35 = vpop.permute.xlu0 %1058 }
 0x175   : > { %v1061_v13 = vpop.permute.xlu1 %1060  ;;  %1137 = vst.msk [vmem:[#allocation3 + $0x90] sm:$0xff] %vm1118_vm6, %v1059_v35 }
 0x176   : > { %1138 = vst.msk [vmem:[#allocation3 + $0x98] sm:$0xff] %vm1118_vm6, %v1061_v13  ;;  %1819 = vrot.lane.b32.xlu0 %v1743_v6, %s5341_s8  ;;  %v1752_v13 = vld [vmem:[#allocation2 + $0x12a] sm:$0xff] }
 0x177   : > { %1243 = vrot.lane.b32.xlu1 %v1743_v6, %s5338_s26 }
 0x178   : > { %v1063_v56 = vpop.permute.xlu0 %1062 }
 0x179   : > { %v1065_v33 = vpop.permute.xlu1 %1064  ;;  %1139 = vst.msk [vmem:[#allocation3 + $0xa0] sm:$0xff] %vm1118_vm6, %v1063_v56 }
 0x17a   : > { %1140 = vst.msk [vmem:[#allocation3 + $0xa8] sm:$0xff] %vm1118_vm6, %v1065_v33  ;;  %1821 = vrot.lane.b32.xlu0 %v1744_v21, %s5341_s8  ;;  %v1367_v33 = vld [vmem:[#allocation2 + $0x138] sm:$0xff] }
 0x17b   : > { %1245 = vrot.lane.b32.xlu1 %v1744_v21, %s5338_s26 }
 0x17c   : > { %v1216_v23 = vpop.permute.xlu0 %1215 }
 0x17d   : > { %v1218_v25 = vpop.permute.xlu1 %1217  ;;  %1312 = vst.msk [vmem:[#allocation3] sm:$0xff] %vm1311_vm7, %v1216_v23  ;;  %v1368_v23 = vld [vmem:[#allocation2 + $0x140] sm:$0xff] }
 0x17e   : > { %1313 = vst.msk [vmem:[#allocation3 + $0x8] sm:$0xff] %vm1311_vm7, %v1218_v25  ;;  %1437 = vrot.lane.b32.xlu0 %v5648_v57, %s5339_s4 }
 0x17f   : > { %1439 = vrot.lane.b32.xlu1 %v5579_v24, %s5339_s4  ;;  %v295_v24 = vld [vmem:[#allocation2 + $0x18f] sm:$0x1] }
 0x180   : > { %v1410_v29 = vpop.permute.xlu0 %1409  ;;  %313 = vst.msk [vmem:[#allocation2 + $0x191] sm:$0x1] %vm260_vm1, %v295_v24  ;;  %v1753_v24 = vld [vmem:[#allocation2 + $0x13a] sm:$0xff] }
 0x181   : > { %v1412_v30 = vpop.permute.xlu1 %1411  ;;  %1506 = vst.msk [vmem:[#allocation3] sm:$0xff] %vm1505_vm8, %v1410_v29  ;;  %v1560_v29 = vld [vmem:[#allocation2 + $0x139] sm:$0xff] }
 0x182   : > { %1507 = vst.msk [vmem:[#allocation3 + $0x8] sm:$0xff] %vm1505_vm8, %v1412_v30  ;;  %1630 = vrot.lane.b32.xlu0 %v1552_v27, %s5340_s5 }
 0x183   : > { %1632 = vrot.lane.b32.xlu1 %v1553_v28, %s5340_s5 }
 0x184   : > { %v1603_v43 = vpop.permute.xlu0 %1602 }
 0x185   : > { %v1605_v57 = vpop.permute.xlu1 %1604  ;;  %1699 = vst.msk [vmem:[#allocation3] sm:$0xff] %vm1698_vm9, %v1603_v43 }
 0x186   : > { %1700 = vst.msk [vmem:[#allocation3 + $0x8] sm:$0xff] %vm1698_vm9, %v1605_v57  ;;  %1823 = vrot.lane.b32.xlu0 %v1745_v32, %s5341_s8  ;;  %v1561_v57 = vld [vmem:[#allocation2 + $0x141] sm:$0xff] }
 0x187   : > { %1247 = vrot.lane.b32.xlu1 %v1745_v32, %s5338_s26 }
 0x188   : > { %v1796_v36 = vpop.permute.xlu0 %1795 }
 0x189   : > { %v1220_v44 = vpop.permute.xlu1 %1219  ;;  %1892 = vst.msk [vmem:[#allocation3] sm:$0xff] %vm1891_vm10, %v1796_v36 }
 0x18a   : > { %1314 = vst.msk [vmem:[#allocation3 + $0x10] sm:$0xff] %vm1311_vm7, %v1220_v44  ;;  %1825 = vrot.lane.b32.xlu0 %v1746_v9, %s5341_s8 }
 0x18b   : > { %1249 = vrot.lane.b32.xlu1 %v1746_v9, %s5338_s26 }
 0x18c   : > { %v1798_v50 = vpop.permute.xlu0 %1797 }
 0x18d   : > { %v1222_v53 = vpop.permute.xlu1 %1221  ;;  %1893 = vst.msk [vmem:[#allocation3 + $0x8] sm:$0xff] %vm1891_vm10, %v1798_v50  ;;  %v1754_v50 = vld [vmem:[#allocation2 + $0x142] sm:$0xff] }
 0x18e   : > { %1315 = vst.msk [vmem:[#allocation3 + $0x18] sm:$0xff] %vm1311_vm7, %v1222_v53  ;;  %1441 = vrot.lane.b32.xlu0 %v5654_v60, %s5339_s4  ;;  %v296_v60 = vld [vmem:[#allocation2 + $0x1a7] sm:$0x1] }
 0x18f   : > { %1443 = vrot.lane.b32.xlu1 %v5590_v34, %s5339_s4  ;;  %314 = vst.msk [vmem:[#allocation2 + $0x1a9] sm:$0x1] %vm260_vm1, %v296_v60 }
 0x190   : > { %v1414_v62 = vpop.permute.xlu0 %1413  ;;  %v1924_v8 = vld [vmem:[#allocation3] sm:$0xff] }
 0x191   : > { %v1416_v3 = vpop.permute.xlu1 %1415  ;;  %1508 = vst.msk [vmem:[#allocation3 + $0x10] sm:$0xff] %vm1505_vm8, %v1414_v62  ;;  %5184 = vmatprep.mubr.msk.f32.mxu0 %vm1961_vm11, %v1924_v8  ;;  %v1369_v62 = vld [vmem:[#allocation2 + $0x150] sm:$0xff] }
 0x192   : > { %1509 = vst.msk [vmem:[#allocation3 + $0x18] sm:$0xff] %vm1505_vm8, %v1416_v3  ;;  %1634 = vrot.lane.b32.xlu0 %v1554_v54, %s5340_s5  ;;  %v1370_v3 = vld [vmem:[#allocation2 + $0x158] sm:$0xff] }
 0x193   : > { %1636 = vrot.lane.b32.xlu1 %v1555_v59, %s5340_s5 }
 0x194   : > { %v1607_v34 = vpop.permute.xlu0 %1606  ;;  %v1925_v11 = vld [vmem:[#allocation3 + $0x8] sm:$0xff] }
 0x195   : > { %v1609_v19 = vpop.permute.xlu1 %1608  ;;  %1701 = vst.msk [vmem:[#allocation3 + $0x10] sm:$0xff] %vm1698_vm9, %v1607_v34  ;;  %5185 = vmatmul.mubr.msk.f32.vlgmr.msra.gmra.mrb[0].mxu0 %vm1961_vm11, %v1925_v11  ;;  %v1562_v34 = vld [vmem:[#allocation2 + $0x151] sm:$0xff] }
 0x196   : > { %1702 = vst.msk [vmem:[#allocation3 + $0x18] sm:$0xff] %vm1698_vm9, %v1609_v19  ;;  %1827 = vrot.lane.b32.xlu0 %v1747_v16, %s5341_s8 }
 0x197   : > { %1251 = vrot.lane.b32.xlu1 %v1747_v16, %s5338_s26 }
 0x198   : > { %v1800_v26 = vpop.permute.xlu0 %1799 }
 0x199   : > { %v1224_v31 = vpop.permute.xlu1 %1223  ;;  %1894 = vst.msk [vmem:[#allocation3 + $0x10] sm:$0xff] %vm1891_vm10, %v1800_v26  ;;  %v1755_v26 = vld [vmem:[#allocation2 + $0x152] sm:$0xff] }
 0x19a   : > { %1316 = vst.msk [vmem:[#allocation3 + $0x20] sm:$0xff] %vm1311_vm7, %v1224_v31  ;;  %1829 = vrot.lane.b32.xlu0 %v1748_v38, %s5341_s8 }
 0x19b   : > { %1253 = vrot.lane.b32.xlu1 %v1748_v38, %s5338_s26  ;;  %v1563_v38 = vld [vmem:[#allocation2 + $0x159] sm:$0xff] }
 0x19c   : > { %v1802_v55 = vpop.permute.xlu0 %1801 }
 0x19d   : > { %v1226_v14 = vpop.permute.xlu1 %1225  ;;  %1895 = vst.msk [vmem:[#allocation3 + $0x18] sm:$0xff] %vm1891_vm10, %v1802_v55 }
 0x19e   : > { %1317 = vst.msk [vmem:[#allocation3 + $0x28] sm:$0xff] %vm1311_vm7, %v1226_v14  ;;  %1445 = vrot.lane.b32.xlu0 %v1363_v63, %s5339_s4 }
 0x19f   : > { %1447 = vrot.lane.b32.xlu1 %v1364_v52, %s5339_s4 }
 0x1a0   : > { %v1418_v4 = vpop.permute.xlu0 %1417  ;;  %v1926_v15 = vld [vmem:[#allocation3 + $0x10] sm:$0xff] }
 0x1a1   : > { %v1420_v20 = vpop.permute.xlu1 %1419  ;;  %1510 = vst.msk [vmem:[#allocation3 + $0x20] sm:$0xff] %vm1505_vm8, %v1418_v4  ;;  %5187 = vmatprep.mubr.msk.f32.mxu0 %vm1961_vm11, %v1926_v15  ;;  %v1371_v15 = vld [vmem:[#allocation2 + $0x168] sm:$0xff] }
 0x1a2   : > { %1511 = vst.msk [vmem:[#allocation3 + $0x28] sm:$0xff] %vm1505_vm8, %v1420_v20  ;;  %1638 = vrot.lane.b32.xlu0 %v1556_v37, %s5340_s5  ;;  %v1756_v37 = vld [vmem:[#allocation2 + $0x15a] sm:$0xff] }
 0x1a3   : > { %1640 = vrot.lane.b32.xlu1 %v1557_v1, %s5340_s5 }
 0x1a4   : > { %v1611_v40 = vpop.permute.xlu0 %1610  ;;  %v1927_v2 = vld [vmem:[#allocation3 + $0x18] sm:$0xff] }
 0x1a5   : > { %v1613_v17 = vpop.permute.xlu1 %1612  ;;  %1703 = vst.msk [vmem:[#allocation3 + $0x20] sm:$0xff] %vm1698_vm9, %v1611_v40  ;;  %5188 = vmatmul.mubr.msk.f32.gmra.mrb[2].mxu0 %vm1961_vm11, %v1927_v2  ;;  %v1564_v2 = vld [vmem:[#allocation2 + $0x169] sm:$0xff] }
 0x1a6   : > { %1704 = vst.msk [vmem:[#allocation3 + $0x28] sm:$0xff] %vm1698_vm9, %v1613_v17  ;;  %1831 = vrot.lane.b32.xlu0 %v1749_v41, %s5341_s8 }
 0x1a7   : > { %1255 = vrot.lane.b32.xlu1 %v1749_v41, %s5338_s26  ;;  %v1372_v41 = vld [vmem:[#allocation2 + $0x170] sm:$0xff] }
 0x1a8   : > { %v1804_v45 = vpop.permute.xlu0 %1803 }
 0x1a9   : > { %v1228_v47 = vpop.permute.xlu1 %1227  ;;  %1896 = vst.msk [vmem:[#allocation3 + $0x20] sm:$0xff] %vm1891_vm10, %v1804_v45 }
 0x1aa   : > { %1318 = vst.msk [vmem:[#allocation3 + $0x30] sm:$0xff] %vm1311_vm7, %v1228_v47  ;;  %1833 = vrot.lane.b32.xlu0 %v1750_v22, %s5341_s8  ;;  %v1565_v47 = vld [vmem:[#allocation2 + $0x171] sm:$0xff] }
 0x1ab   : > { %1257 = vrot.lane.b32.xlu1 %v1750_v22, %s5338_s26 }
 0x1ac   : > { %v1806_v42 = vpop.permute.xlu0 %1805 }
 0x1ad   : > { %v1230_v5 = vpop.permute.xlu1 %1229  ;;  %1897 = vst.msk [vmem:[#allocation3 + $0x28] sm:$0xff] %vm1891_vm10, %v1806_v42 }
 0x1ae   : > { %1319 = vst.msk [vmem:[#allocation3 + $0x38] sm:$0xff] %vm1311_vm7, %v1230_v5  ;;  %1449 = vrot.lane.b32.xlu0 %v1365_v39, %s5339_s4  ;;  %v1757_v39 = vld [vmem:[#allocation2 + $0x16a] sm:$0xff] }
 0x1af   : > { %1451 = vrot.lane.b32.xlu1 %v1366_v0, %s5339_s4 }
 0x1b0   : > { %v1422_v51 = vpop.permute.xlu0 %1421  ;;  %v1928_v7 = vld [vmem:[#allocation3 + $0x20] sm:$0xff] }
 0x1b1   : > { %v1424_v46 = vpop.permute.xlu1 %1423  ;;  %1512 = vst.msk [vmem:[#allocation3 + $0x30] sm:$0xff] %vm1505_vm8, %v1422_v51  ;;  %5190 = vmatprep.mubr.msk.f32.mxu0 %vm1961_vm11, %v1928_v7  ;;  %v1758_v7 = vld [vmem:[#allocation2 + $0x172] sm:$0xff] }
 0x1b2   : > { %1513 = vst.msk [vmem:[#allocation3 + $0x38] sm:$0xff] %vm1505_vm8, %v1424_v46  ;;  %1642 = vrot.lane.b32.xlu0 %v1558_v18, %s5340_s5 }
 0x1b3   : > { %1066 = vrot.lane.b32.xlu1 %v1558_v18, %s5337_s21 }
 0x1b4   : > { %v1615_v58 = vpop.permute.xlu0 %1614  ;;  %v1929_v10 = vld [vmem:[#allocation3 + $0x28] sm:$0xff] }
 0x1b5   : > { %v1617_v12 = vpop.permute.xlu1 %1616  ;;  %1705 = vst.msk [vmem:[#allocation3 + $0x30] sm:$0xff] %vm1698_vm9, %v1615_v58  ;;  %5191 = vmatmul.mubr.msk.f32.gmra.mrb[4].mxu0 %vm1961_vm11, %v1929_v10  ;;  %v1373_v58 = vld [vmem:[#allocation2 + $0x180] sm:$0xff] }
 0x1b6   : > { %1706 = vst.msk [vmem:[#allocation3 + $0x38] sm:$0xff] %vm1698_vm9, %v1617_v12  ;;  %1644 = vrot.lane.b32.xlu0 %v1559_v48, %s5340_s5  ;;  %v1374_v12 = vld [vmem:[#allocation2 + $0x188] sm:$0xff] }
 0x1b7   : > { %1835 = vrot.lane.b32.xlu1 %v1751_v61, %s5341_s8 }
 0x1b8   : > { %v1808_v6 = vpop.permute.xlu0 %1807 }
 0x1b9   : > { %v1232_v35 = vpop.permute.xlu1 %1231  ;;  %1898 = vst.msk [vmem:[#allocation3 + $0x30] sm:$0xff] %vm1891_vm10, %v1808_v6 }
 0x1ba   : > { %1320 = vst.msk [vmem:[#allocation3 + $0x40] sm:$0xff] %vm1311_vm7, %v1232_v35  ;;  %1068 = vrot.lane.b32.xlu0 %v1559_v48, %s5337_s21  ;;  %v1566_v35 = vld [vmem:[#allocation2 + $0x181] sm:$0xff] }
 0x1bb   : > { %1259 = vrot.lane.b32.xlu1 %v1751_v61, %s5338_s26 }
 0x1bc   : > { %v1810_v21 = vpop.permute.xlu0 %1809 }
 0x1bd   : > { %v1234_v56 = vpop.permute.xlu1 %1233  ;;  %1899 = vst.msk [vmem:[#allocation3 + $0x38] sm:$0xff] %vm1891_vm10, %v1810_v21 }
 0x1be   : > { %1321 = vst.msk [vmem:[#allocation3 + $0x48] sm:$0xff] %vm1311_vm7, %v1234_v56  ;;  %1837 = vrot.lane.b32.xlu0 %v1752_v13, %s5341_s8 }
 0x1bf   : > { %1261 = vrot.lane.b32.xlu1 %v1752_v13, %s5338_s26 }
 0x1c0   : > { %v1426_v25 = vpop.permute.xlu0 %1425  ;;  %v1930_v28 = vld [vmem:[#allocation3 + $0x30] sm:$0xff] }
 0x1c1   : > { %v1428_v27 = vpop.permute.xlu1 %1427  ;;  %1514 = vst.msk [vmem:[#allocation3 + $0x40] sm:$0xff] %vm1505_vm8, %v1426_v25  ;;  %5193 = vmatprep.mubr.msk.f32.mxu0 %vm1961_vm11, %v1930_v28 }
 0x1c2   : > { %1515 = vst.msk [vmem:[#allocation3 + $0x48] sm:$0xff] %vm1505_vm8, %v1428_v27  ;;  %1453 = vrot.lane.b32.xlu0 %v1367_v33, %s5339_s4  ;;  %v1567_v33 = vld [vmem:[#allocation2 + $0x189] sm:$0xff] }
 0x1c3   : > { %1455 = vrot.lane.b32.xlu1 %v1368_v23, %s5339_s4  ;;  %v1759_v23 = vld [vmem:[#allocation2 + $0x182] sm:$0xff] }
 0x1c4   : > { %v1619_v30 = vpop.permute.xlu0 %1618  ;;  %v1931_v43 = vld [vmem:[#allocation3 + $0x38] sm:$0xff] }
 0x1c5   : > { %v1621_v32 = vpop.permute.xlu1 %1620  ;;  %1707 = vst.msk [vmem:[#allocation3 + $0x40] sm:$0xff] %vm1698_vm9, %v1619_v30  ;;  %5194 = vmatmul.mubr.msk.f32.gmra.mrb[6].mxu0 %vm1961_vm11, %v1931_v43 }
 0x1c6   : > { %1708 = vst.msk [vmem:[#allocation3 + $0x48] sm:$0xff] %vm1698_vm9, %v1621_v32  ;;  %1646 = vrot.lane.b32.xlu0 %v1560_v29, %s5340_s5  ;;  %v1760_v32 = vld [vmem:[#allocation2 + $0x18a] sm:$0xff] }
 0x1c7   : > { %1070 = vrot.lane.b32.xlu1 %v1560_v29, %s5337_s21 }
 0x1c8   : > { %v1812_v9 = vpop.permute.xlu0 %1811 }
 0x1c9   : > { %v1236_v36 = vpop.permute.xlu1 %1235  ;;  %1900 = vst.msk [vmem:[#allocation3 + $0x40] sm:$0xff] %vm1891_vm10, %v1812_v9  ;;  %v1376_v9 = vld [vmem:[#allocation2 + $0x1a0] sm:$0xff] }
 0x1ca   : > { %1322 = vst.msk [vmem:[#allocation3 + $0x50] sm:$0xff] %vm1311_vm7, %v1236_v36  ;;  %1648 = vrot.lane.b32.xlu0 %v1561_v57, %s5340_s5 }
 0x1cb   : > { %1839 = vrot.lane.b32.xlu1 %v1753_v24, %s5341_s8 }
 0x1cc   : > { %v1814_v44 = vpop.permute.xlu0 %1813 }
 0x1cd   : > { %v1238_v49 = vpop.permute.xlu1 %1237  ;;  %1901 = vst.msk [vmem:[#allocation3 + $0x48] sm:$0xff] %vm1891_vm10, %v1814_v44 }
 0x1ce   : > { %1323 = vst.msk [vmem:[#allocation3 + $0x58] sm:$0xff] %vm1311_vm7, %v1238_v49  ;;  %1072 = vrot.lane.b32.xlu0 %v1561_v57, %s5337_s21 }
 0x1cf   : > { %1263 = vrot.lane.b32.xlu1 %v1753_v24, %s5338_s26  ;;  %v1375_v24 = vld [vmem:[#allocation2 + $0x198] sm:$0xff] }
 0x1d0   : > { %v1430_v53 = vpop.permute.xlu0 %1429  ;;  %v1932_v59 = vld [vmem:[#allocation3 + $0x40] sm:$0xff] }
 0x1d1   : > { %v1432_v54 = vpop.permute.xlu1 %1431  ;;  %1516 = vst.msk [vmem:[#allocation3 + $0x50] sm:$0xff] %vm1505_vm8, %v1430_v53  ;;  %5196 = vmatprep.mubr.msk.f32.mxu0 %vm1961_vm11, %v1932_v59  ;;  %v1569_v53 = vld [vmem:[#allocation2 + $0x1a1] sm:$0xff] }
 0x1d2   : > { %1517 = vst.msk [vmem:[#allocation3 + $0x58] sm:$0xff] %vm1505_vm8, %v1432_v54  ;;  %1841 = vrot.lane.b32.xlu0 %v1754_v50, %s5341_s8 }
 0x1d3   : > { %1265 = vrot.lane.b32.xlu1 %v1754_v50, %s5338_s26  ;;  %v1568_v50 = vld [vmem:[#allocation2 + $0x199] sm:$0xff] }
 0x1d4   : > { %v1623_v8 = vpop.permute.xlu0 %1622  ;;  %v1933_v16 = vld [vmem:[#allocation3 + $0x48] sm:$0xff] }
 0x1d5   : > { %v1625_v60 = vpop.permute.xlu1 %1624  ;;  %1709 = vst.msk [vmem:[#allocation3 + $0x50] sm:$0xff] %vm1698_vm9, %v1623_v8  ;;  %5197 = vmatmul.mubr.msk.f32.gmra.mrb[8].mxu0 %vm1961_vm11, %v1933_v16  ;;  %v1762_v8 = vld [vmem:[#allocation2 + $0x1a2] sm:$0xff] }
 0x1d6   : > { %1710 = vst.msk [vmem:[#allocation3 + $0x58] sm:$0xff] %vm1698_vm9, %v1625_v60  ;;  %1457 = vrot.lane.b32.xlu0 %v1369_v62, %s5339_s4 }
 0x1d7   : > { %1459 = vrot.lane.b32.xlu1 %v1370_v3, %s5339_s4  ;;  %v1761_v3 = vld [vmem:[#allocation2 + $0x19a] sm:$0xff] }
 0x1d8   : > { %v1816_v19 = vpop.permute.xlu0 %1815 }
 0x1d9   : > { %v1240_v11 = vpop.permute.xlu1 %1239  ;;  %1902 = vst.msk [vmem:[#allocation3 + $0x50] sm:$0xff] %vm1891_vm10, %v1816_v19 }
 0x1da   : > { %1324 = vst.msk [vmem:[#allocation3 + $0x60] sm:$0xff] %vm1311_vm7, %v1240_v11  ;;  %1650 = vrot.lane.b32.xlu0 %v1562_v34, %s5340_s5 }
 0x1db   : > { %1074 = vrot.lane.b32.xlu1 %v1562_v34, %s5337_s21 }
 0x1dc   : > { %v1818_v31 = vpop.permute.xlu0 %1817 }
 0x1dd   : > { %v1242_v63 = vpop.permute.xlu1 %1241  ;;  %1903 = vst.msk [vmem:[#allocation3 + $0x58] sm:$0xff] %vm1891_vm10, %v1818_v31 }
 0x1de   : > { %1325 = vst.msk [vmem:[#allocation3 + $0x68] sm:$0xff] %vm1311_vm7, %v1242_v63  ;;  %1652 = vrot.lane.b32.xlu0 %v1563_v38, %s5340_s5 }
 0x1df   : > { %1843 = vrot.lane.b32.xlu1 %v1755_v26, %s5341_s8 }
 0x1e0   : > { %v1434_v52 = vpop.permute.xlu0 %1433  ;;  %v1934_v14 = vld [vmem:[#allocation3 + $0x50] sm:$0xff] }
 0x1e1   : > { %v1436_v55 = vpop.permute.xlu1 %1435  ;;  %1518 = vst.msk [vmem:[#allocation3 + $0x60] sm:$0xff] %vm1505_vm8, %v1434_v52  ;;  %5199 = vmatprep.mubr.msk.f32.mxu0 %vm1961_vm11, %v1934_v14 }
 0x1e2   : > { %1519 = vst.msk [vmem:[#allocation3 + $0x68] sm:$0xff] %vm1505_vm8, %v1436_v55  ;;  %1076 = vrot.lane.b32.xlu0 %v1563_v38, %s5337_s21 }
 0x1e3   : > { %1267 = vrot.lane.b32.xlu1 %v1755_v26, %s5338_s26 }
 0x1e4   : > { %v1627_v1 = vpop.permute.xlu0 %1626  ;;  %v1935_v20 = vld [vmem:[#allocation3 + $0x58] sm:$0xff] }
 0x1e5   : > { %v1629_v4 = vpop.permute.xlu1 %1628  ;;  %1711 = vst.msk [vmem:[#allocation3 + $0x60] sm:$0xff] %vm1698_vm9, %v1627_v1  ;;  %5200 = vmatmul.mubr.msk.f32.gmra.mrb[10].mxu0 %vm1961_vm11, %v1935_v20 }
 0x1e6   : > { %1712 = vst.msk [vmem:[#allocation3 + $0x68] sm:$0xff] %vm1698_vm9, %v1629_v4  ;;  %1845 = vrot.lane.b32.xlu0 %v1756_v37, %s5341_s8 }
 0x1e7   : > { %1269 = vrot.lane.b32.xlu1 %v1756_v37, %s5338_s26 }
 0x1e8   : > { %v1820_v40 = vpop.permute.xlu0 %1819 }
 0x1e9   : > { %v1244_v17 = vpop.permute.xlu1 %1243  ;;  %1904 = vst.msk [vmem:[#allocation3 + $0x60] sm:$0xff] %vm1891_vm10, %v1820_v40 }
 0x1ea   : > { %1326 = vst.msk [vmem:[#allocation3 + $0x70] sm:$0xff] %vm1311_vm7, %v1244_v17  ;;  %1461 = vrot.lane.b32.xlu0 %v1371_v15, %s5339_s4 }
 0x1eb   : > { %1463 = vrot.lane.b32.xlu1 %v1372_v41, %s5339_s4 }
 0x1ec   : > { %v1822_v22 = vpop.permute.xlu0 %1821 }
 0x1ed   : > { %v1246_v45 = vpop.permute.xlu1 %1245  ;;  %1905 = vst.msk [vmem:[#allocation3 + $0x68] sm:$0xff] %vm1891_vm10, %v1822_v22 }
 0x1ee   : > { %1327 = vst.msk [vmem:[#allocation3 + $0x78] sm:$0xff] %vm1311_vm7, %v1246_v45  ;;  %1654 = vrot.lane.b32.xlu0 %v1564_v2, %s5340_s5 }
 0x1ef   : > { %1078 = vrot.lane.b32.xlu1 %v1564_v2, %s5337_s21 }
 0x1f0   : > { %v1438_v0 = vpop.permute.xlu0 %1437  ;;  %v1936_v5 = vld [vmem:[#allocation3 + $0x60] sm:$0xff] }
 0x1f1   : > { %v1440_v42 = vpop.permute.xlu1 %1439  ;;  %1520 = vst.msk [vmem:[#allocation3 + $0x70] sm:$0xff] %vm1505_vm8, %v1438_v0  ;;  %5202 = vmatprep.mubr.msk.f32.mxu0 %vm1961_vm11, %v1936_v5 }
 0x1f2   : > { %1521 = vst.msk [vmem:[#allocation3 + $0x78] sm:$0xff] %vm1505_vm8, %v1440_v42  ;;  %1656 = vrot.lane.b32.xlu0 %v1565_v47, %s5340_s5 }
 0x1f3   : > { %1847 = vrot.lane.b32.xlu1 %v1757_v39, %s5341_s8 }
 0x1f4   : > { %v1631_v18 = vpop.permute.xlu0 %1630  ;;  %v1937_v46 = vld [vmem:[#allocation3 + $0x68] sm:$0xff] }
 0x1f5   : > { %v1633_v51 = vpop.permute.xlu1 %1632  ;;  %1713 = vst.msk [vmem:[#allocation3 + $0x70] sm:$0xff] %vm1698_vm9, %v1631_v18  ;;  %5203 = vmatmul.mubr.msk.f32.gmra.mrb[12].mxu0 %vm1961_vm11, %v1937_v46 }
 0x1f6   : > { %1714 = vst.msk [vmem:[#allocation3 + $0x78] sm:$0xff] %vm1698_vm9, %v1633_v51  ;;  %1080 = vrot.lane.b32.xlu0 %v1565_v47, %s5337_s21 }
 0x1f7   : > { %1271 = vrot.lane.b32.xlu1 %v1757_v39, %s5338_s26 }
 0x1f8   : > { %v1824_v48 = vpop.permute.xlu0 %1823 }
 0x1f9   : > { %v1248_v61 = vpop.permute.xlu1 %1247  ;;  %1906 = vst.msk [vmem:[#allocation3 + $0x70] sm:$0xff] %vm1891_vm10, %v1824_v48 }
 0x1fa   : > { %1328 = vst.msk [vmem:[#allocation3 + $0x80] sm:$0xff] %vm1311_vm7, %v1248_v61  ;;  %1849 = vrot.lane.b32.xlu0 %v1758_v7, %s5341_s8 }
 0x1fb   : > { %1273 = vrot.lane.b32.xlu1 %v1758_v7, %s5338_s26 }
 0x1fc   : > { %v1826_v10 = vpop.permute.xlu0 %1825 }
 0x1fd   : > { %v1250_v6 = vpop.permute.xlu1 %1249  ;;  %1907 = vst.msk [vmem:[#allocation3 + $0x78] sm:$0xff] %vm1891_vm10, %v1826_v10 }
 0x1fe   : > { %1329 = vst.msk [vmem:[#allocation3 + $0x88] sm:$0xff] %vm1311_vm7, %v1250_v6  ;;  %1465 = vrot.lane.b32.xlu0 %v1373_v58, %s5339_s4 }
 0x1ff   : > { %1467 = vrot.lane.b32.xlu1 %v1374_v12, %s5339_s4 }
 0x200   : > { %v1442_v13 = vpop.permute.xlu0 %1441  ;;  %v1938_v56 = vld [vmem:[#allocation3 + $0x70] sm:$0xff] }
 0x201   : > { %v1444_v21 = vpop.permute.xlu1 %1443  ;;  %1522 = vst.msk [vmem:[#allocation3 + $0x80] sm:$0xff] %vm1505_vm8, %v1442_v13  ;;  %5205 = vmatprep.mubr.msk.f32.mxu0 %vm1961_vm11, %v1938_v56 }
 0x202   : > { %1523 = vst.msk [vmem:[#allocation3 + $0x88] sm:$0xff] %vm1505_vm8, %v1444_v21  ;;  %1658 = vrot.lane.b32.xlu0 %v1566_v35, %s5340_s5 }
 0x203   : > { %1082 = vrot.lane.b32.xlu1 %v1566_v35, %s5337_s21 }
 0x204   : > { %v1635_v25 = vpop.permute.xlu0 %1634  ;;  %v1939_v28 = vld [vmem:[#allocation3 + $0x78] sm:$0xff] }
 0x205   : > { %v1637_v27 = vpop.permute.xlu1 %1636  ;;  %1715 = vst.msk [vmem:[#allocation3 + $0x80] sm:$0xff] %vm1698_vm9, %v1635_v25  ;;  %5206 = vmatmul.mubr.msk.f32.gmra.mrb[14].mxu0 %vm1961_vm11, %v1939_v28 }
 0x206   : > { %1716 = vst.msk [vmem:[#allocation3 + $0x88] sm:$0xff] %vm1698_vm9, %v1637_v27  ;;  %1660 = vrot.lane.b32.xlu0 %v1567_v33, %s5340_s5 }
 0x207   : > { %1851 = vrot.lane.b32.xlu1 %v1759_v23, %s5341_s8 }
 0x208   : > { %v1828_v29 = vpop.permute.xlu0 %1827 }
 0x209   : > { %v1252_v30 = vpop.permute.xlu1 %1251  ;;  %1908 = vst.msk [vmem:[#allocation3 + $0x80] sm:$0xff] %vm1891_vm10, %v1828_v29 }
 0x20a   : > { %1330 = vst.msk [vmem:[#allocation3 + $0x90] sm:$0xff] %vm1311_vm7, %v1252_v30  ;;  %1084 = vrot.lane.b32.xlu0 %v1567_v33, %s5337_s21 }
 0x20b   : > { %1275 = vrot.lane.b32.xlu1 %v1759_v23, %s5338_s26 }
 0x20c   : > { %v1830_v43 = vpop.permute.xlu0 %1829 }
 0x20d   : > { %v1254_v57 = vpop.permute.xlu1 %1253  ;;  %1909 = vst.msk [vmem:[#allocation3 + $0x88] sm:$0xff] %vm1891_vm10, %v1830_v43 }
 0x20e   : > { %1331 = vst.msk [vmem:[#allocation3 + $0x98] sm:$0xff] %vm1311_vm7, %v1254_v57  ;;  %1853 = vrot.lane.b32.xlu0 %v1760_v32, %s5341_s8 }
 0x20f   : > { %1277 = vrot.lane.b32.xlu1 %v1760_v32, %s5338_s26 }
 0x210   : > { %v1446_v36 = vpop.permute.xlu0 %1445  ;;  %v1940_v49 = vld [vmem:[#allocation3 + $0x80] sm:$0xff] }
 0x211   : > { %v1448_v44 = vpop.permute.xlu1 %1447  ;;  %1524 = vst.msk [vmem:[#allocation3 + $0x90] sm:$0xff] %vm1505_vm8, %v1446_v36  ;;  %5208 = vmatprep.mubr.msk.f32.mxu0 %vm1961_vm11, %v1940_v49 }
 0x212   : > { %1525 = vst.msk [vmem:[#allocation3 + $0x98] sm:$0xff] %vm1505_vm8, %v1448_v44  ;;  %1469 = vrot.lane.b32.xlu0 %v1375_v24, %s5339_s4 }
 0x213   : > { %1471 = vrot.lane.b32.xlu1 %v1376_v9, %s5339_s4 }
 0x214   : > { %v1639_v54 = vpop.permute.xlu0 %1638  ;;  %v1941_v62 = vld [vmem:[#allocation3 + $0x88] sm:$0xff] }
 0x215   : > { %v1641_v59 = vpop.permute.xlu1 %1640  ;;  %1717 = vst.msk [vmem:[#allocation3 + $0x90] sm:$0xff] %vm1698_vm9, %v1639_v54  ;;  %5209 = vmatmul.mubr.msk.f32.gmra.mrb[16].mxu0 %vm1961_vm11, %v1941_v62 }
 0x216   : > { %1718 = vst.msk [vmem:[#allocation3 + $0x98] sm:$0xff] %vm1698_vm9, %v1641_v59  ;;  %1662 = vrot.lane.b32.xlu0 %v1568_v50, %s5340_s5 }
 0x217   : > { %1664 = vrot.lane.b32.xlu1 %v1569_v53, %s5340_s5 }
 0x218   : > { %v1832_v60 = vpop.permute.xlu0 %1831 }
 0x219   : > { %v1256_v16 = vpop.permute.xlu1 %1255  ;;  %1910 = vst.msk [vmem:[#allocation3 + $0x90] sm:$0xff] %vm1891_vm10, %v1832_v60 }
 0x21a   : > { %1332 = vst.msk [vmem:[#allocation3 + $0xa0] sm:$0xff] %vm1311_vm7, %v1256_v16  ;;  %1855 = vrot.lane.b32.xlu0 %v1761_v3, %s5341_s8 }
 0x21b   : > { %1857 = vrot.lane.b32.xlu1 %v1762_v8, %s5341_s8 }
 0x21c   : > { %v1834_v34 = vpop.permute.xlu0 %1833 }
 0x21d   : > { %v1258_v19 = vpop.permute.xlu1 %1257  ;;  %1911 = vst.msk [vmem:[#allocation3 + $0x98] sm:$0xff] %vm1891_vm10, %v1834_v34 }
 0x21e   : > { %1333 = vst.msk [vmem:[#allocation3 + $0xa8] sm:$0xff] %vm1311_vm7, %v1258_v19 }
 0x220   : > { %v1450_v11 = vpop.permute.xlu0 %1449  ;;  %v1942_v26 = vld [vmem:[#allocation3 + $0x90] sm:$0xff] }
 0x221   : > { %v1452_v38 = vpop.permute.xlu1 %1451  ;;  %1526 = vst.msk [vmem:[#allocation3 + $0xa0] sm:$0xff] %vm1505_vm8, %v1450_v11  ;;  %5211 = vmatprep.mubr.msk.f32.mxu0 %vm1961_vm11, %v1942_v26 }
 0x222   : > { %1527 = vst.msk [vmem:[#allocation3 + $0xa8] sm:$0xff] %vm1505_vm8, %v1452_v38 }
 0x224   : > { %v1643_v31 = vpop.permute.xlu0 %1642  ;;  %v1943_v52 = vld [vmem:[#allocation3 + $0x98] sm:$0xff] }
 0x225   : > { %v1067_v63 = vpop.permute.xlu1 %1066  ;;  %1719 = vst.msk [vmem:[#allocation3 + $0xa0] sm:$0xff] %vm1698_vm9, %v1643_v31  ;;  %5212 = vmatmul.mubr.msk.f32.gmra.mrb[18].mxu0 %vm1961_vm11, %v1943_v52 }
 0x226   : > { %1141 = vst.msk [vmem:[#allocation3 + $0xb0] sm:$0xff] %vm1118_vm6, %v1067_v63 }
 0x228   : > { %v1645_v55 = vpop.permute.xlu0 %1644 }
 0x229   : > { %v1836_v14 = vpop.permute.xlu1 %1835  ;;  %1720 = vst.msk [vmem:[#allocation3 + $0xa8] sm:$0xff] %vm1698_vm9, %v1645_v55 }
 0x22a   : > { %1912 = vst.msk [vmem:[#allocation3 + $0xa0] sm:$0xff] %vm1891_vm10, %v1836_v14 }
 0x22c   : > { %v1069_v37 = vpop.permute.xlu0 %1068 }
 0x22d   : > { %v1260_v1 = vpop.permute.xlu1 %1259  ;;  %1142 = vst.msk [vmem:[#allocation3 + $0xb8] sm:$0xff] %vm1118_vm6, %v1069_v37 }
 0x22e   : > { %1334 = vst.msk [vmem:[#allocation3 + $0xb0] sm:$0xff] %vm1311_vm7, %v1260_v1 }
 0x230   : > { %v1838_v4 = vpop.permute.xlu0 %1837 }
 0x231   : > { %v1262_v20 = vpop.permute.xlu1 %1261  ;;  %v1944_v15 = vld [vmem:[#allocation3 + $0xa0] sm:$0xff]  ;;  %1913 = vst.msk [vmem:[#allocation3 + $0xa8] sm:$0xff] %vm1891_vm10, %v1838_v4 }
 0x232   : > { %1335 = vst.msk [vmem:[#allocation3 + $0xb8] sm:$0xff] %vm1311_vm7, %v1262_v20  ;;  %5214 = vmatprep.mubr.msk.f32.mxu0 %vm1961_vm11, %v1944_v15 }
 0x234   : > { %v1454_v41 = vpop.permute.xlu0 %1453 }
 0x235   : > { %v1456_v40 = vpop.permute.xlu1 %1455  ;;  %1528 = vst.msk [vmem:[#allocation3 + $0xb0] sm:$0xff] %vm1505_vm8, %v1454_v41 }
 0x236   : > { %1529 = vst.msk [vmem:[#allocation3 + $0xb8] sm:$0xff] %vm1505_vm8, %v1456_v40 }
 0x238   : > { %v1647_v17 = vpop.permute.xlu0 %1646  ;;  %v1945_v22 = vld [vmem:[#allocation3 + $0xa8] sm:$0xff] }
 0x239   : > { %v1071_v2 = vpop.permute.xlu1 %1070  ;;  %1721 = vst.msk [vmem:[#allocation3 + $0xb0] sm:$0xff] %vm1698_vm9, %v1647_v17  ;;  %5215 = vmatmul.mubr.msk.f32.gmra.mrb[20].mxu0 %vm1961_vm11, %v1945_v22 }
 0x23a   : > { %1143 = vst.msk [vmem:[#allocation3 + $0xc0] sm:$0xff] %vm1118_vm6, %v1071_v2 }
 0x23c   : > { %v1649_v45 = vpop.permute.xlu0 %1648 }
 0x23d   : > { %v1840_v47 = vpop.permute.xlu1 %1839  ;;  %1722 = vst.msk [vmem:[#allocation3 + $0xb8] sm:$0xff] %vm1698_vm9, %v1649_v45 }
 0x23e   : > { %1914 = vst.msk [vmem:[#allocation3 + $0xb0] sm:$0xff] %vm1891_vm10, %v1840_v47 }
 0x240   : > { %v1073_v39 = vpop.permute.xlu0 %1072 }
 0x241   : > { %v1264_v0 = vpop.permute.xlu1 %1263  ;;  %1144 = vst.msk [vmem:[#allocation3 + $0xc8] sm:$0xff] %vm1118_vm6, %v1073_v39 }
 0x242   : > { %1336 = vst.msk [vmem:[#allocation3 + $0xc0] sm:$0xff] %vm1311_vm7, %v1264_v0 }
 0x244   : > { %v1842_v42 = vpop.permute.xlu0 %1841 }
 0x245   : > { %v1266_v5 = vpop.permute.xlu1 %1265  ;;  %v1946_v18 = vld [vmem:[#allocation3 + $0xb0] sm:$0xff]  ;;  %1915 = vst.msk [vmem:[#allocation3 + $0xb8] sm:$0xff] %vm1891_vm10, %v1842_v42 }
 0x246   : > { %1337 = vst.msk [vmem:[#allocation3 + $0xc8] sm:$0xff] %vm1311_vm7, %v1266_v5  ;;  %5217 = vmatprep.mubr.msk.f32.mxu0 %vm1961_vm11, %v1946_v18 }
 0x248   : > { %v1458_v51 = vpop.permute.xlu0 %1457 }
 0x249   : > { %v1460_v46 = vpop.permute.xlu1 %1459  ;;  %1530 = vst.msk [vmem:[#allocation3 + $0xc0] sm:$0xff] %vm1505_vm8, %v1458_v51 }
 0x24a   : > { %1531 = vst.msk [vmem:[#allocation3 + $0xc8] sm:$0xff] %vm1505_vm8, %v1460_v46 }
 0x24c   : > { %v1651_v7 = vpop.permute.xlu0 %1650  ;;  %v1947_v61 = vld [vmem:[#allocation3 + $0xb8] sm:$0xff] }
 0x24d   : > { %v1075_v48 = vpop.permute.xlu1 %1074  ;;  %1723 = vst.msk [vmem:[#allocation3 + $0xc0] sm:$0xff] %vm1698_vm9, %v1651_v7  ;;  %5218 = vmatmul.mubr.msk.f32.gmra.mrb[22].mxu0 %vm1961_vm11, %v1947_v61 }
 0x24e   : > { %1145 = vst.msk [vmem:[#allocation3 + $0xd0] sm:$0xff] %vm1118_vm6, %v1075_v48 }
 0x250   : > { %v1653_v58 = vpop.permute.xlu0 %1652 }
 0x251   : > { %v1844_v12 = vpop.permute.xlu1 %1843  ;;  %1724 = vst.msk [vmem:[#allocation3 + $0xc8] sm:$0xff] %vm1698_vm9, %v1653_v58 }
 0x252   : > { %1916 = vst.msk [vmem:[#allocation3 + $0xc0] sm:$0xff] %vm1891_vm10, %v1844_v12 }
 0x254   : > { %v1077_v10 = vpop.permute.xlu0 %1076 }
 0x255   : > { %v1268_v6 = vpop.permute.xlu1 %1267  ;;  %1146 = vst.msk [vmem:[#allocation3 + $0xd8] sm:$0xff] %vm1118_vm6, %v1077_v10 }
 0x256   : > { %1338 = vst.msk [vmem:[#allocation3 + $0xd0] sm:$0xff] %vm1311_vm7, %v1268_v6 }
 0x258   : > { %v1846_v35 = vpop.permute.xlu0 %1845 }
 0x259   : > { %v1270_v13 = vpop.permute.xlu1 %1269  ;;  %v1948_v21 = vld [vmem:[#allocation3 + $0xc0] sm:$0xff]  ;;  %1917 = vst.msk [vmem:[#allocation3 + $0xc8] sm:$0xff] %vm1891_vm10, %v1846_v35 }
 0x25a   : > { %1339 = vst.msk [vmem:[#allocation3 + $0xd8] sm:$0xff] %vm1311_vm7, %v1270_v13  ;;  %5220 = vmatprep.mubr.msk.f32.mxu0 %vm1961_vm11, %v1948_v21 }
 0x25c   : > { %v1462_v56 = vpop.permute.xlu0 %1461 }
 0x25d   : > { %v1464_v33 = vpop.permute.xlu1 %1463  ;;  %1532 = vst.msk [vmem:[#allocation3 + $0xd0] sm:$0xff] %vm1505_vm8, %v1462_v56 }
 0x25e   : > { %1533 = vst.msk [vmem:[#allocation3 + $0xd8] sm:$0xff] %vm1505_vm8, %v1464_v33 }
 0x260   : > { %v1655_v23 = vpop.permute.xlu0 %1654  ;;  %v1949_v27 = vld [vmem:[#allocation3 + $0xc8] sm:$0xff] }
 0x261   : > { %v1079_v25 = vpop.permute.xlu1 %1078  ;;  %1725 = vst.msk [vmem:[#allocation3 + $0xd0] sm:$0xff] %vm1698_vm9, %v1655_v23  ;;  %5221 = vmatmul.mubr.msk.f32.gmra.mrb[24].mxu0 %vm1961_vm11, %v1949_v27 }
 0x262   : > { %1147 = vst.msk [vmem:[#allocation3 + $0xe0] sm:$0xff] %vm1118_vm6, %v1079_v25 }
 0x264   : > { %v1657_v28 = vpop.permute.xlu0 %1656 }
 0x265   : > { %v1848_v29 = vpop.permute.xlu1 %1847  ;;  %1726 = vst.msk [vmem:[#allocation3 + $0xd8] sm:$0xff] %vm1698_vm9, %v1657_v28 }
 0x266   : > { %1918 = vst.msk [vmem:[#allocation3 + $0xd0] sm:$0xff] %vm1891_vm10, %v1848_v29 }
 0x268   : > { %v6315_v30 = vpop.f32.mrb[0].mxu0  ;;  %v1081_v32 = vpop.permute.xlu0 %1080 }
 0x269   : > { %v2288_v43 = vsel %vm204_vm0, %v6315_v30, 0.0  ;;  %v2358_v57 = vmul.f32 %v6315_v30, %v6315_v30  ;;  %1148 = vst.msk [vmem:[#allocation3 + $0xe8] sm:$0xff] %vm1118_vm6, %v1081_v32  ;;  %v1272_v24 = vpop.permute.xlu1 %1271  ;;  %v6322_v9 = vpop.f32.mrb[1].mxu0 }
 0x26a   : > { %1340 = vst.msk [vmem:[#allocation3 + $0xe0] sm:$0xff] %vm1311_vm7, %v1272_v24  ;;  %v2287_v36 = vsel %vm204_vm0, %v6322_v9, 0.0  ;;  %v2357_v44 = vmul.f32 %v6322_v9, %v6322_v9 }
 0x26b   : > { %v2390_v49 = vsel %vm204_vm0, %v2358_v57, 0.0  ;;  %v2289_v50 = vadd.f32 %v2288_v43, %v2287_v36 }
 0x26c   : > { %v2389_v53 = vsel %vm204_vm0, %v2357_v44, 0.0  ;;  %v1850_v54 = vpop.permute.xlu0 %1849 }
 0x26d   : > { %v1950_v59 = vld [vmem:[#allocation3 + $0xd0] sm:$0xff]  ;;  %v2391_v62 = vadd.f32 %v2390_v49, %v2389_v53  ;;  %1919 = vst.msk [vmem:[#allocation3 + $0xd8] sm:$0xff] %vm1891_vm10, %v1850_v54  ;;  %v1274_v3 = vpop.permute.xlu1 %1273 }
 0x26e   : > { %5223 = vmatprep.mubr.msk.f32.mxu0 %vm1961_vm11, %v1950_v59  ;;  %1341 = vst.msk [vmem:[#allocation3 + $0xe8] sm:$0xff] %vm1311_vm7, %v1274_v3 }
 0x270   : > { %v1466_v8 = vpop.permute.xlu0 %1465 }
 0x271   : > { %1534 = vst.msk [vmem:[#allocation3 + $0xe0] sm:$0xff] %vm1505_vm8, %v1466_v8  ;;  %v1468_v60 = vpop.permute.xlu1 %1467 }
 0x272   : > { %1535 = vst.msk [vmem:[#allocation3 + $0xe8] sm:$0xff] %vm1505_vm8, %v1468_v60 }
 0x274   : > { %v1659_v16 = vpop.permute.xlu0 %1658  ;;  %v1951_v34 = vld [vmem:[#allocation3 + $0xd8] sm:$0xff] }
 0x275   : > { %1727 = vst.msk [vmem:[#allocation3 + $0xe0] sm:$0xff] %vm1698_vm9, %v1659_v16  ;;  %v1083_v19 = vpop.permute.xlu1 %1082  ;;  %5224 = vmatmul.mubr.msk.f32.gmra.mrb[26].mxu0 %vm1961_vm11, %v1951_v34 }
 0x276   : > { %1149 = vst.msk [vmem:[#allocation3 + $0xf0] sm:$0xff] %vm1118_vm6, %v1083_v19 }
 0x278   : > { %v1661_v11 = vpop.permute.xlu0 %1660  ;;  %v6339_v38 = vpop.f32.mrb[2].mxu0 }
 0x279   : > { %1728 = vst.msk [vmem:[#allocation3 + $0xe8] sm:$0xff] %vm1698_vm9, %v1661_v11  ;;  %v1852_v26 = vpop.permute.xlu1 %1851  ;;  %v6342_v31 = vpop.f32.mrb[3].mxu0  ;;  %v2360_v63 = vmul.f32 %v6339_v38, %v6339_v38  ;;  %v2292_v37 = vsel %vm204_vm0, %v6339_v38, 0.0 }
 0x27a   : > { %1920 = vst.msk [vmem:[#allocation3 + $0xe0] sm:$0xff] %vm1891_vm10, %v1852_v26  ;;  %v2290_v52 = vsel %vm204_vm0, %v6342_v31, 0.0  ;;  %v2359_v55 = vmul.f32 %v6342_v31, %v6342_v31 }
 0x27b   : > { %v2291_v14 = vadd.f32 %v2290_v52, %v2289_v50  ;;  %v2394_v40 = vsel %vm204_vm0, %v2360_v63, 0.0 }
 0x27c   : > { %v2392_v1 = vsel %vm204_vm0, %v2359_v55, 0.0  ;;  %v1085_v4 = vpop.permute.xlu0 %1084 }
 0x27d   : > { %v2393_v20 = vadd.f32 %v2392_v1, %v2391_v62  ;;  %1150 = vst.msk [vmem:[#allocation3 + $0xf8] sm:$0xff] %vm1118_vm6, %v1085_v4  ;;  %v1276_v15 = vpop.permute.xlu1 %1275  ;;  %v2293_v41 = vadd.f32 %v2292_v37, %v2291_v14 }
 0x27e   : > { %1342 = vst.msk [vmem:[#allocation3 + $0xf0] sm:$0xff] %vm1311_vm7, %v1276_v15 }
 0x27f   : > { %v2395_v17 = vadd.f32 %v2394_v40, %v2393_v20 }
 0x280   : > { %v1854_v2 = vpop.permute.xlu0 %1853 }
 0x281   : > { %1921 = vst.msk [vmem:[#allocation3 + $0xe8] sm:$0xff] %vm1891_vm10, %v1854_v2  ;;  %v1278_v22 = vpop.permute.xlu1 %1277  ;;  %v1952_v45 = vld [vmem:[#allocation3 + $0xe0] sm:$0xff] }
 0x282   : > { %1343 = vst.msk [vmem:[#allocation3 + $0xf8] sm:$0xff] %vm1311_vm7, %v1278_v22  ;;  %5226 = vmatprep.mubr.msk.f32.mxu0 %vm1961_vm11, %v1952_v45 }
 0x284   : > { %v1470_v47 = vpop.permute.xlu0 %1469 }
 0x285   : > { %1536 = vst.msk [vmem:[#allocation3 + $0xf0] sm:$0xff] %vm1505_vm8, %v1470_v47  ;;  %v1472_v39 = vpop.permute.xlu1 %1471 }
 0x286   : > { %1537 = vst.msk [vmem:[#allocation3 + $0xf8] sm:$0xff] %vm1505_vm8, %v1472_v39 }
 0x288   : > { %v1663_v0 = vpop.permute.xlu0 %1662  ;;  %v6362_v42 = vpop.f32.mrb[4].mxu0  ;;  %v1953_v5 = vld [vmem:[#allocation3 + $0xe8] sm:$0xff] }
 0x289   : > { %1729 = vst.msk [vmem:[#allocation3 + $0xf0] sm:$0xff] %vm1698_vm9, %v1663_v0  ;;  %v1665_v18 = vpop.permute.xlu1 %1664  ;;  %v6365_v51 = vpop.f32.mrb[5].mxu0  ;;  %5227 = vmatmul.mubr.msk.f32.gmra.mrb[28].mxu0 %vm1961_vm11, %v1953_v5  ;;  %v2362_v46 = vmul.f32 %v6362_v42, %v6362_v42  ;;  %v2296_v58 = vsel %vm204_vm0, %v6362_v42, 0.0 }
 0x28a   : > { %1730 = vst.msk [vmem:[#allocation3 + $0xf8] sm:$0xff] %vm1698_vm9, %v1665_v18  ;;  %v2294_v7 = vsel %vm204_vm0, %v6365_v51, 0.0  ;;  %v2361_v48 = vmul.f32 %v6365_v51, %v6365_v51 }
 0x28b   : > { %v2295_v61 = vadd.f32 %v2294_v7, %v2293_v41  ;;  %v2398_v21 = vsel %vm204_vm0, %v2362_v46, 0.0 }
 0x28c   : > { %v2396_v12 = vsel %vm204_vm0, %v2361_v48, 0.0  ;;  %v1856_v10 = vpop.permute.xlu0 %1855 }
 0x28d   : > { %v2397_v6 = vadd.f32 %v2396_v12, %v2395_v17  ;;  %1922 = vst.msk [vmem:[#allocation3 + $0xf0] sm:$0xff] %vm1891_vm10, %v1856_v10  ;;  %v1858_v35 = vpop.permute.xlu1 %1857  ;;  %v2297_v13 = vadd.f32 %v2296_v58, %v2295_v61 }
 0x28e   : > { %1923 = vst.msk [vmem:[#allocation3 + $0xf8] sm:$0xff] %vm1891_vm10, %v1858_v35 }
 0x28f   : > { %v2399_v56 = vadd.f32 %v2398_v21, %v2397_v6 }
 0x294   : > { %v1954_v33 = vld [vmem:[#allocation3 + $0xf0] sm:$0xff] }
 0x295   : > { %5229 = vmatprep.mubr.msk.f32.mxu0 %vm1961_vm11, %v1954_v33  ;;  %v1955_v23 = vld [vmem:[#allocation3 + $0xf8] sm:$0xff] }
 0x296   : > { %5230 = vmatmul.mubr.msk.f32.gmra.mrb[30].mxu0 %vm1961_vm11, %v1955_v23 }
 0x298   : > { %v6383_v25 = vpop.f32.mrb[6].mxu0 }
 0x299   : > { %v6385_v27 = vpop.f32.mrb[7].mxu0  ;;  %v2364_v28 = vmul.f32 %v6383_v25, %v6383_v25  ;;  %v2300_v57 = vsel %vm204_vm0, %v6383_v25, 0.0 }
 0x29a   : > { %v2298_v29 = vsel %vm204_vm0, %v6385_v27, 0.0  ;;  %v2363_v32 = vmul.f32 %v6385_v27, %v6385_v27 }
 0x29b   : > { %v2299_v43 = vadd.f32 %v2298_v29, %v2297_v13  ;;  %v2402_v49 = vsel %vm204_vm0, %v2364_v28, 0.0 }
 0x29c   : > { %v2400_v24 = vsel %vm204_vm0, %v2363_v32, 0.0 }
 0x29d   : > { %v2401_v36 = vadd.f32 %v2400_v24, %v2399_v56  ;;  %v2301_v44 = vadd.f32 %v2300_v57, %v2299_v43 }
 0x29f   : > { %v2403_v50 = vadd.f32 %v2402_v49, %v2401_v36 }
 0x2a8   : > { %v6397_v53 = vpop.f32.mrb[8].mxu0 }
 0x2a9   : > { %v6399_v54 = vpop.f32.mrb[9].mxu0  ;;  %v2366_v59 = vmul.f32 %v6397_v53, %v6397_v53  ;;  %v2304_v60 = vsel %vm204_vm0, %v6397_v53, 0.0 }
 0x2aa   : > { %v2302_v62 = vsel %vm204_vm0, %v6399_v54, 0.0  ;;  %v2365_v3 = vmul.f32 %v6399_v54, %v6399_v54 }
 0x2ab   : > { %v2303_v8 = vadd.f32 %v2302_v62, %v2301_v44  ;;  %v2406_v11 = vsel %vm204_vm0, %v2366_v59, 0.0 }
 0x2ac   : > { %v2404_v16 = vsel %vm204_vm0, %v2365_v3, 0.0 }
 0x2ad   : > { %v2405_v34 = vadd.f32 %v2404_v16, %v2403_v50  ;;  %v2305_v19 = vadd.f32 %v2304_v60, %v2303_v8 }
 0x2af   : > { %v2407_v26 = vadd.f32 %v2406_v11, %v2405_v34 }
 0x2b8   : > { %v6411_v63 = vpop.f32.mrb[10].mxu0 }
 0x2b9   : > { %v6413_v52 = vpop.f32.mrb[11].mxu0  ;;  %v2368_v55 = vmul.f32 %v6411_v63, %v6411_v63  ;;  %v2308_v4 = vsel %vm204_vm0, %v6411_v63, 0.0 }
 0x2ba   : > { %v2306_v14 = vsel %vm204_vm0, %v6413_v52, 0.0  ;;  %v2367_v37 = vmul.f32 %v6413_v52, %v6413_v52 }
 0x2bb   : > { %v2307_v1 = vadd.f32 %v2306_v14, %v2305_v19  ;;  %v2410_v40 = vsel %vm204_vm0, %v2368_v55, 0.0 }
 0x2bc   : > { %v2408_v20 = vsel %vm204_vm0, %v2367_v37, 0.0 }
 0x2bd   : > { %v2409_v15 = vadd.f32 %v2408_v20, %v2407_v26  ;;  %v2309_v41 = vadd.f32 %v2308_v4, %v2307_v1 }
 0x2bf   : > { %v2411_v17 = vadd.f32 %v2410_v40, %v2409_v15 }
 0x2c8   : > { %v6425_v2 = vpop.f32.mrb[12].mxu0 }
 0x2c9   : > { %v6427_v22 = vpop.f32.mrb[13].mxu0  ;;  %v2370_v45 = vmul.f32 %v6425_v2, %v6425_v2  ;;  %v2312_v5 = vsel %vm204_vm0, %v6425_v2, 0.0 }
 0x2ca   : > { %v2310_v47 = vsel %vm204_vm0, %v6427_v22, 0.0  ;;  %v2369_v39 = vmul.f32 %v6427_v22, %v6427_v22 }
 0x2cb   : > { %v2311_v0 = vadd.f32 %v2310_v47, %v2309_v41  ;;  %v2414_v48 = vsel %vm204_vm0, %v2370_v45, 0.0 }
 0x2cc   : > { %v2412_v18 = vsel %vm204_vm0, %v2369_v39, 0.0 }
 0x2cd   : > { %v2413_v46 = vadd.f32 %v2412_v18, %v2411_v17  ;;  %v2313_v7 = vadd.f32 %v2312_v5, %v2311_v0 }
 0x2cf   : > { %v2415_v61 = vadd.f32 %v2414_v48, %v2413_v46 }
 0x2d8   : > { %v6439_v58 = vpop.f32.mrb[14].mxu0 }
 0x2d9   : > { %v6441_v12 = vpop.f32.mrb[15].mxu0  ;;  %v2372_v10 = vmul.f32 %v6439_v58, %v6439_v58  ;;  %v2316_v21 = vsel %vm204_vm0, %v6439_v58, 0.0 }
 0x2da   : > { %v2314_v6 = vsel %vm204_vm0, %v6441_v12, 0.0  ;;  %v2371_v35 = vmul.f32 %v6441_v12, %v6441_v12 }
 0x2db   : > { %v2315_v13 = vadd.f32 %v2314_v6, %v2313_v7  ;;  %v2418_v28 = vsel %vm204_vm0, %v2372_v10, 0.0 }
 0x2dc   : > { %v2416_v56 = vsel %vm204_vm0, %v2371_v35, 0.0 }
 0x2dd   : > { %v2417_v33 = vadd.f32 %v2416_v56, %v2415_v61  ;;  %v2317_v23 = vadd.f32 %v2316_v21, %v2315_v13 }
 0x2df   : > { %v2419_v29 = vadd.f32 %v2418_v28, %v2417_v33 }
 0x2e8   : > { %v6453_v32 = vpop.f32.mrb[16].mxu0 }
 0x2e9   : > { %v6455_v43 = vpop.f32.mrb[17].mxu0  ;;  %v2374_v57 = vmul.f32 %v6453_v32, %v6453_v32  ;;  %v2320_v49 = vsel %vm204_vm0, %v6453_v32, 0.0 }
 0x2ea   : > { %v2318_v24 = vsel %vm204_vm0, %v6455_v43, 0.0  ;;  %v2373_v36 = vmul.f32 %v6455_v43, %v6455_v43 }
 0x2eb   : > { %v2319_v44 = vadd.f32 %v2318_v24, %v2317_v23  ;;  %v2422_v3 = vsel %vm204_vm0, %v2374_v57, 0.0 }
 0x2ec   : > { %v2420_v50 = vsel %vm204_vm0, %v2373_v36, 0.0 }
 0x2ed   : > { %v2421_v59 = vadd.f32 %v2420_v50, %v2419_v29  ;;  %v2321_v62 = vadd.f32 %v2320_v49, %v2319_v44 }
 0x2ef   : > { %v2423_v8 = vadd.f32 %v2422_v3, %v2421_v59 }
 0x2f8   : > { %v6467_v60 = vpop.f32.mrb[18].mxu0 }
 0x2f9   : > { %v6469_v16 = vpop.f32.mrb[19].mxu0  ;;  %v2376_v34 = vmul.f32 %v6467_v60, %v6467_v60  ;;  %v2324_v55 = vsel %vm204_vm0, %v6467_v60, 0.0 }
 0x2fa   : > { %v2322_v19 = vsel %vm204_vm0, %v6469_v16, 0.0  ;;  %v2375_v11 = vmul.f32 %v6469_v16, %v6469_v16 }
 0x2fb   : > { %v2323_v26 = vadd.f32 %v2322_v19, %v2321_v62  ;;  %v2426_v4 = vsel %vm204_vm0, %v2376_v34, 0.0 }
 0x2fc   : > { %v2424_v14 = vsel %vm204_vm0, %v2375_v11, 0.0 }
 0x2fd   : > { %v2425_v37 = vadd.f32 %v2424_v14, %v2423_v8  ;;  %v2325_v1 = vadd.f32 %v2324_v55, %v2323_v26 }
 0x2ff   : > { %v2427_v20 = vadd.f32 %v2426_v4, %v2425_v37 }
 0x30c   : > { %v6481_v15 = vpop.f32.mrb[20].mxu0 }
 0x30d   : > { %v6483_v41 = vpop.f32.mrb[21].mxu0  ;;  %v2378_v40 = vmul.f32 %v6481_v15, %v6481_v15  ;;  %v2328_v39 = vsel %vm204_vm0, %v6481_v15, 0.0 }
 0x30e   : > { %v2326_v17 = vsel %vm204_vm0, %v6483_v41, 0.0  ;;  %v2377_v45 = vmul.f32 %v6483_v41, %v6483_v41 }
 0x30f   : > { %v2327_v47 = vadd.f32 %v2326_v17, %v2325_v1  ;;  %v2430_v46 = vsel %vm204_vm0, %v2378_v40, 0.0 }
 0x310   : > { %v2428_v0 = vsel %vm204_vm0, %v2377_v45, 0.0 }
 0x311   : > { %v2429_v5 = vadd.f32 %v2428_v0, %v2427_v20  ;;  %v2329_v18 = vadd.f32 %v2328_v39, %v2327_v47 }
 0x313   : > { %v2431_v7 = vadd.f32 %v2430_v46, %v2429_v5 }
 0x320   : > { %v6495_v48 = vpop.f32.mrb[22].mxu0 }
 0x321   : > { %v6497_v61 = vpop.f32.mrb[23].mxu0  ;;  %v2380_v10 = vmul.f32 %v6495_v48, %v6495_v48  ;;  %v2332_v21 = vsel %vm204_vm0, %v6495_v48, 0.0 }
 0x322   : > { %v2330_v6 = vsel %vm204_vm0, %v6497_v61, 0.0  ;;  %v2379_v35 = vmul.f32 %v6497_v61, %v6497_v61 }
 0x323   : > { %v2331_v13 = vadd.f32 %v2330_v6, %v2329_v18  ;;  %v2434_v28 = vsel %vm204_vm0, %v2380_v10, 0.0 }
 0x324   : > { %v2432_v56 = vsel %vm204_vm0, %v2379_v35, 0.0 }
 0x325   : > { %v2433_v33 = vadd.f32 %v2432_v56, %v2431_v7  ;;  %v2333_v23 = vadd.f32 %v2332_v21, %v2331_v13 }
 0x327   : > { %v2435_v29 = vadd.f32 %v2434_v28, %v2433_v33 }
 0x334   : > { %v6509_v57 = vpop.f32.mrb[24].mxu0 }
 0x335   : > { %v6511_v24 = vpop.f32.mrb[25].mxu0  ;;  %v2382_v36 = vmul.f32 %v6509_v57, %v6509_v57  ;;  %v2336_v59 = vsel %vm204_vm0, %v6509_v57, 0.0 }
 0x336   : > { %v2334_v44 = vsel %vm204_vm0, %v6511_v24, 0.0  ;;  %v2381_v49 = vmul.f32 %v6511_v24, %v6511_v24 }
 0x337   : > { %v2335_v50 = vadd.f32 %v2334_v44, %v2333_v23  ;;  %v2438_v34 = vsel %vm204_vm0, %v2382_v36, 0.0 }
 0x338   : > { %v2436_v62 = vsel %vm204_vm0, %v2381_v49, 0.0 }
 0x339   : > { %v2437_v3 = vadd.f32 %v2436_v62, %v2435_v29  ;;  %v2337_v8 = vadd.f32 %v2336_v59, %v2335_v50 }
 0x33b   : > { %v2439_v19 = vadd.f32 %v2438_v34, %v2437_v3 }
 0x348   : > { %v6523_v11 = vpop.f32.mrb[26].mxu0 }
 0x349   : > { %v6525_v26 = vpop.f32.mrb[27].mxu0  ;;  %v2384_v55 = vmul.f32 %v6523_v11, %v6523_v11  ;;  %v2340_v4 = vsel %vm204_vm0, %v6523_v11, 0.0 }
 0x34a   : > { %v2338_v14 = vsel %vm204_vm0, %v6525_v26, 0.0  ;;  %v2383_v37 = vmul.f32 %v6525_v26, %v6525_v26 }
 0x34b   : > { %v2339_v1 = vadd.f32 %v2338_v14, %v2337_v8  ;;  %v2442_v45 = vsel %vm204_vm0, %v2384_v55, 0.0 }
 0x34c   : > { %v2440_v20 = vsel %vm204_vm0, %v2383_v37, 0.0 }
 0x34d   : > { %v2441_v40 = vadd.f32 %v2440_v20, %v2439_v19  ;;  %v2341_v17 = vadd.f32 %v2340_v4, %v2339_v1 }
 0x34f   : > { %v2443_v47 = vadd.f32 %v2442_v45, %v2441_v40 }
 0x35c   : > { %v6537_v39 = vpop.f32.mrb[28].mxu0 }
 0x35d   : > { %v6539_v0 = vpop.f32.mrb[29].mxu0  ;;  %v2386_v5 = vmul.f32 %v6537_v39, %v6537_v39  ;;  %v2344_v10 = vsel %vm204_vm0, %v6537_v39, 0.0 }
 0x35e   : > { %v2342_v18 = vsel %vm204_vm0, %v6539_v0, 0.0  ;;  %v2385_v46 = vmul.f32 %v6539_v0, %v6539_v0 }
 0x35f   : > { %v2343_v7 = vadd.f32 %v2342_v18, %v2341_v17  ;;  %v2446_v21 = vsel %vm204_vm0, %v2386_v5, 0.0 }
 0x360   : > { %v2444_v6 = vsel %vm204_vm0, %v2385_v46, 0.0 }
 0x361   : > { %v2445_v35 = vadd.f32 %v2444_v6, %v2443_v47  ;;  %v2345_v13 = vadd.f32 %v2344_v10, %v2343_v7 }
 0x363   : > { %v2447_v56 = vadd.f32 %v2446_v21, %v2445_v35 }
 0x369   : > { %v6551_v33 = vpop.f32.mrb[30].mxu0 }
 0x36a   : > { %v6553_v23 = vpop.f32.mrb[31].mxu0  ;;  %v2388_v28 = vmul.f32 %v6551_v33, %v6551_v33  ;;  %v2348_v49 = vsel %vm204_vm0, %v6551_v33, 0.0 }
 0x36b   : > { %v2346_v29 = vsel %vm204_vm0, %v6553_v23, 0.0  ;;  %v2387_v36 = vmul.f32 %v6553_v23, %v6553_v23 }
 0x36c   : > { %v2347_v44 = vadd.f32 %v2346_v29, %v2345_v13  ;;  %v2450_v3 = vsel %vm204_vm0, %v2388_v28, 0.0 }
 0x36d   : > { %v2448_v50 = vsel %vm204_vm0, %v2387_v36, 0.0 }
 0x36e   : > { %v2349_v59 = vadd.f32 %v2348_v49, %v2347_v44  ;;  %v2449_v62 = vadd.f32 %v2448_v50, %v2447_v56 }
 0x370   : > { %v2350_v8 = vrot.slane %v2349_v59, 4  ;;  %v2451_v34 = vadd.f32 %v2450_v3, %v2449_v62 }
 0x372   : > { %v2351_v19 = vadd.f32 %v2350_v8, %v2349_v59  ;;  %v2452_v55 = vrot.slane %v2451_v34, 4 }
 0x374   : > { %v2352_v14 = vrot.slane %v2351_v19, 2  ;;  %v2453_v37 = vadd.f32 %v2452_v55, %v2451_v34 }
 0x376   : > { %v2353_v1 = vadd.f32 %v2352_v14, %v2351_v19  ;;  %v2454_v4 = vrot.slane %v2453_v37, 2 }
 0x378   : > { %v2354_v20 = vrot.slane %v2353_v1, 1  ;;  %v2455_v40 = vadd.f32 %v2454_v4, %v2453_v37 }
 0x37a   : > { %v2355_v17 = vadd.f32 %v2354_v20, %v2353_v1  ;;  %v2456_v45 = vrot.slane %v2455_v40, 1 }
 0x37c   : > { %v6565_v47 = vmul.f32 0.00390625, %v2355_v17  ;;  %v2457_v5 = vadd.f32 %v2456_v45, %v2455_v40 }
 0x37e   : > { %v2458_v18 = vmul.f32 0.00390625, %v2457_v5  ;;  %v2459_v46 = vmul.f32 %v6565_v47, %v6565_v47  ;;  %v2492_v7 = vsub.f32 %v6553_v23, %v6565_v47  ;;  %v2462_v10 = vsub.f32 %v6322_v9, %v6565_v47 }
 0x37f   : > { %v2463_v6 = vsub.f32 %v6315_v30, %v6565_v47  ;;  %v2464_v35 = vsub.f32 %v6342_v31, %v6565_v47  ;;  %v2465_v13 = vsub.f32 %v6339_v38, %v6565_v47  ;;  %v2466_v21 = vsub.f32 %v6365_v51, %v6565_v47 }
 0x380   : > { %v2460_v56 = vsub.f32 %v2458_v18, %v2459_v46  ;;  %v2467_v28 = vsub.f32 %v6362_v42, %v6565_v47  ;;  %v2468_v23 = vsub.f32 %v6385_v27, %v6565_v47  ;;  %v2469_v9 = vsub.f32 %v6383_v25, %v6565_v47 }
 0x381   : > { %v2470_v30 = vsub.f32 %v6399_v54, %v6565_v47  ;;  %v2471_v31 = vsub.f32 %v6397_v53, %v6565_v47  ;;  %v2472_v38 = vsub.f32 %v6413_v52, %v6565_v47  ;;  %v2473_v51 = vsub.f32 %v6411_v63, %v6565_v47 }
 0x382   : > { %v2461_v29 = vmax.f32 %v2460_v56, 0.0  ;;  %v2474_v42 = vsub.f32 %v6427_v22, %v6565_v47  ;;  %v2475_v27 = vsub.f32 %v6425_v2, %v6565_v47  ;;  %v2476_v25 = vsub.f32 %v6441_v12, %v6565_v47 }
 0x383   : > { %v2477_v54 = vsub.f32 %v6439_v58, %v6565_v47  ;;  %v2478_v53 = vsub.f32 %v6455_v43, %v6565_v47  ;;  %v2479_v52 = vsub.f32 %v6453_v32, %v6565_v47  ;;  %v2480_v63 = vsub.f32 %v6469_v16, %v6565_v47 }
 0x384   : > { %v2494_v36 = vadd.f32 1e-05, %v2461_v29  ;;  %v2481_v22 = vsub.f32 %v6467_v60, %v6565_v47  ;;  %v2482_v2 = vsub.f32 %v6483_v41, %v6565_v47  ;;  %v2483_v12 = vsub.f32 %v6481_v15, %v6565_v47 }
 0x385   : > { %v2484_v58 = vsub.f32 %v6497_v61, %v6565_v47  ;;  %v2485_v43 = vsub.f32 %v6495_v48, %v6565_v47  ;;  %v2486_v32 = vsub.f32 %v6511_v24, %v6565_v47  ;;  %v2487_v16 = vsub.f32 %v6509_v57, %v6565_v47 }
 0x386   : > { %5322 = vrsqrt.f32 %v2494_v36  ;;  %v2488_v60 = vsub.f32 %v6525_v26, %v6565_v47  ;;  %v2489_v41 = vsub.f32 %v6523_v11, %v6565_v47  ;;  %v2490_v15 = vsub.f32 %v6539_v0, %v6565_v47 }
 0x387   : > { %v2491_v61 = vsub.f32 %v6537_v39, %v6565_v47  ;;  %v2493_v48 = vsub.f32 %v6551_v33, %v6565_v47 }
 0x390   : > { %v5323_v24 = vpop.eup %5322 }
 0x391   : > { %v2526_v44 = vmul.f32 %v5323_v24, %v2492_v7  ;;  %v2499_v49 = vmul.f32 %v5323_v24, %v2465_v13  ;;  %v2496_v57 = vmul.f32 %v5323_v24, %v2462_v10  ;;  %v2497_v50 = vmul.f32 %v5323_v24, %v2463_v6 }
 0x392   : > { %v2498_v59 = vmul.f32 %v5323_v24, %v2464_v35  ;;  %v2500_v62 = vmul.f32 %v5323_v24, %v2466_v21  ;;  %v2501_v26 = vmul.f32 %v5323_v24, %v2467_v28  ;;  %v2502_v3 = vmul.f32 %v5323_v24, %v2468_v23 }
 0x393   : > { %v2558_v8 = vmax.f32 %v2526_v44, 0.0  ;;  %v2531_v11 = vmax.f32 %v2499_v49, 0.0  ;;  %v2503_v34 = vmul.f32 %v5323_v24, %v2469_v9  ;;  %v2504_v19 = vmul.f32 %v5323_v24, %v2470_v30 }
 0x394   : > { %v2505_v0 = vmul.f32 %v5323_v24, %v2471_v31  ;;  %v2506_v55 = vmul.f32 %v5323_v24, %v2472_v38  ;;  %v2507_v14 = vmul.f32 %v5323_v24, %v2473_v51  ;;  %v2508_v39 = vmul.f32 %v5323_v24, %v2474_v42 }
 0x395   : > { %2590 = vst.msk [vmem:[#allocation2 + $0x181] sm:$0xff] %vm204_vm0, %v2558_v8  ;;  %2593 = vst.msk [vmem:[#allocation2 + $0x9] sm:$0xff] %vm204_vm0, %v2531_v11  ;;  %v2509_v33 = vmul.f32 %v5323_v24, %v2475_v27  ;;  %v2510_v37 = vmul.f32 %v5323_v24, %v2476_v25  ;;  %v6635_v1 = vmul.f32 %v5323_v24, %v2477_v54  ;;  %v2530_v56 = vmax.f32 %v2498_v59, 0.0 }
 0x396   : > { %v6637_v4 = vmul.f32 %v5323_v24, %v2478_v53  ;;  %2563 = vst.msk [vmem:[#allocation2 + $0x39] sm:$0xff] %vm204_vm0, %v2531_v11  ;;  %v6640_v20 = vmul.f32 %v5323_v24, %v2479_v52  ;;  %v6642_v40 = vmul.f32 %v5323_v24, %v2480_v63  ;;  %v6644_v17 = vmul.f32 %v5323_v24, %v2481_v22 }
 0x397   : > { %v6646_v45 = vmul.f32 %v5323_v24, %v2482_v2  ;;  %v6648_v47 = vmul.f32 %v5323_v24, %v2483_v12  ;;  %v6650_v5 = vmul.f32 %v5323_v24, %v2484_v58  ;;  %v6652_v18 = vmul.f32 %v5323_v24, %v2485_v43  ;;  %2592 = vst.msk [vmem:[#allocation2 + $0x1] sm:$0xff] %vm204_vm0, %v2530_v56 }
 0x398   : > { %v6654_v46 = vmul.f32 %v5323_v24, %v2486_v32  ;;  %v6656_v7 = vmul.f32 %v5323_v24, %v2487_v16  ;;  %v6658_v10 = vmul.f32 %v5323_v24, %v2488_v60  ;;  %v6660_v6 = vmul.f32 %v5323_v24, %v2489_v41  ;;  %2562 = vst.msk [vmem:[#allocation2 + $0x31] sm:$0xff] %vm204_vm0, %v2530_v56 }
 0x399   : > { %v6662_v35 = vmul.f32 %v5323_v24, %v2490_v15  ;;  %v6664_v13 = vmul.f32 %v5323_v24, %v2491_v61  ;;  %v6666_v21 = vmul.f32 %v5323_v24, %v2493_v48  ;;  %v2528_v28 = vmax.f32 %v2496_v57, 0.0 }
 0x39a   : > { %v2529_v23 = vmax.f32 %v2497_v50, 0.0  ;;  %v2532_v9 = vmax.f32 %v2500_v62, 0.0  ;;  %v2533_v30 = vmax.f32 %v2501_v26, 0.0  ;;  %v2534_v31 = vmax.f32 %v2502_v3, 0.0 }
 0x39b   : > { %v2535_v38 = vmax.f32 %v2503_v34, 0.0  ;;  %v2536_v51 = vmax.f32 %v2504_v19, 0.0  ;;  %v2537_v29 = vmax.f32 %v2505_v0, 0.0  ;;  %v2538_v42 = vmax.f32 %v2506_v55, 0.0  ;;  %2560 = vst.msk [vmem:[#allocation2 + $0x19] sm:$0xff] %vm204_vm0, %v2528_v28 }
 0x39c   : > { %v2733_v27 = vld [vmem:[#allocation2 + $0x9] sm:$0xff]  ;;  %v2539_v25 = vmax.f32 %v2507_v14, 0.0  ;;  %v2540_v54 = vmax.f32 %v2508_v39, 0.0  ;;  %v2541_v53 = vmax.f32 %v2509_v33, 0.0  ;;  %v2542_v52 = vmax.f32 %v2510_v37, 0.0  ;;  %2561 = vst.msk [vmem:[#allocation2 + $0x21] sm:$0xff] %vm204_vm0, %v2529_v23 }
 0x39d   : > { %2564 = vst.msk [vmem:[#allocation2 + $0x49] sm:$0xff] %vm204_vm0, %v2532_v9  ;;  %2565 = vst.msk [vmem:[#allocation2 + $0x51] sm:$0xff] %vm204_vm0, %v2533_v30  ;;  %2798 = vrot.lane.b32.xlu1 %v2733_v27, %s5334_s18  ;;  %v2543_v63 = vmax.f32 %v6635_v1, 0.0  ;;  %v2544_v36 = vmax.f32 %v6637_v4, 0.0  ;;  %v2545_v22 = vmax.f32 %v6640_v20, 0.0  ;;  %v2546_v2 = vmax.f32 %v6642_v40, 0.0 }
 0x39e   : > { %2566 = vst.msk [vmem:[#allocation2 + $0x61] sm:$0xff] %vm204_vm0, %v2534_v31  ;;  %2567 = vst.msk [vmem:[#allocation2 + $0x69] sm:$0xff] %vm204_vm0, %v2535_v38  ;;  %v2632_v12 = vld [vmem:[#allocation2 + $0xf] sm:$0x1]  ;;  %v2547_v58 = vmax.f32 %v6644_v17, 0.0  ;;  %v2548_v43 = vmax.f32 %v6646_v45, 0.0 }
 0x39f   : > { %2568 = vst.msk [vmem:[#allocation2 + $0x79] sm:$0xff] %vm204_vm0, %v2536_v51  ;;  %2569 = vst.msk [vmem:[#allocation2 + $0x81] sm:$0xff] %vm204_vm0, %v2537_v29  ;;  %v2549_v32 = vmax.f32 %v6648_v47, 0.0  ;;  %v2550_v16 = vmax.f32 %v6650_v5, 0.0  ;;  %v2634_v60 = vld [vmem:[#allocation2 + $0x3f] sm:$0x1] }
 0x3a0   : > { %2570 = vst.msk [vmem:[#allocation2 + $0x91] sm:$0xff] %vm204_vm0, %v2538_v42  ;;  %2571 = vst.msk [vmem:[#allocation2 + $0x99] sm:$0xff] %vm204_vm0, %v2539_v25  ;;  %v2551_v41 = vmax.f32 %v6652_v18, 0.0  ;;  %v2552_v15 = vmax.f32 %v6654_v46, 0.0  ;;  %v2553_v61 = vmax.f32 %v6656_v7, 0.0  ;;  %v2554_v48 = vmax.f32 %v6658_v10, 0.0 }
 0x3a1   : > { %2572 = vst.msk [vmem:[#allocation2 + $0xa9] sm:$0xff] %vm204_vm0, %v2540_v54  ;;  %2573 = vst.msk [vmem:[#allocation2 + $0xb1] sm:$0xff] %vm204_vm0, %v2541_v53  ;;  %v2612_v24 = vld [vmem:[#allocation2 + $0x182] sm:$0x1]  ;;  %v2555_v44 = vmax.f32 %v6660_v6, 0.0  ;;  %v2556_v49 = vmax.f32 %v6662_v35, 0.0 }
 0x3a2   : > { %2574 = vst.msk [vmem:[#allocation2 + $0xc1] sm:$0xff] %vm204_vm0, %v2542_v52  ;;  %2575 = vst.msk [vmem:[#allocation2 + $0xc9] sm:$0xff] %vm204_vm0, %v2543_v63  ;;  %v2557_v57 = vmax.f32 %v6664_v13, 0.0  ;;  %v2559_v50 = vmax.f32 %v6666_v21, 0.0  ;;  %v2732_v59 = vld [vmem:[#allocation2 + $0x1] sm:$0xff]  ;;  %v6726_v26 = vld [vmem:[#allocation2 + $0x19] sm:$0xff] }
 0x3a3   : > { %2650 = vst.msk [vmem:[#allocation2 + $0x11] sm:$0x1] %vm260_vm1, %v2632_v12  ;;  %2652 = vst.msk [vmem:[#allocation2 + $0x41] sm:$0x1] %vm260_vm1, %v2634_v60  ;;  %2796 = vrot.lane.b32.xlu0 %v2732_v59, %s5334_s18  ;;  %v6722_v62 = vld [vmem:[#allocation2 + $0x21] sm:$0xff]  ;;  %v6730_v3 = vld [vmem:[#allocation2 + $0x39] sm:$0xff] }
 0x3a4   : > { %2576 = vst.msk [vmem:[#allocation2 + $0xd9] sm:$0xff] %vm204_vm0, %v2544_v36  ;;  %2577 = vst.msk [vmem:[#allocation2 + $0xe1] sm:$0xff] %vm204_vm0, %v2545_v22  ;;  %2802 = vrot.lane.b32.xlu1 %v6722_v62, %s5334_s18  ;;  %v6734_v8 = vld [vmem:[#allocation2 + $0x31] sm:$0xff]  ;;  %v2633_v34 = vld [vmem:[#allocation2 + $0x27] sm:$0x1] }
 0x3a5   : > { %2578 = vst.msk [vmem:[#allocation2 + $0xf1] sm:$0xff] %vm204_vm0, %v2546_v2  ;;  %2579 = vst.msk [vmem:[#allocation2 + $0xf9] sm:$0xff] %vm204_vm0, %v2547_v58  ;;  %v6738_v11 = vld [vmem:[#allocation2 + $0x51] sm:$0xff]  ;;  %v6743_v19 = vld [vmem:[#allocation2 + $0x49] sm:$0xff] }
 0x3a6   : > { %2580 = vst.msk [vmem:[#allocation2 + $0x109] sm:$0xff] %vm204_vm0, %v2548_v43  ;;  %2581 = vst.msk [vmem:[#allocation2 + $0x111] sm:$0xff] %vm204_vm0, %v2549_v32  ;;  %v2635_v0 = vld [vmem:[#allocation2 + $0x57] sm:$0x1]  ;;  %v2636_v55 = vld [vmem:[#allocation2 + $0x6f] sm:$0x1] }
 0x3a7   : > { %2582 = vst.msk [vmem:[#allocation2 + $0x121] sm:$0xff] %vm204_vm0, %v2550_v16  ;;  %2583 = vst.msk [vmem:[#allocation2 + $0x129] sm:$0xff] %vm204_vm0, %v2551_v41  ;;  %2800 = vrot.lane.b32.xlu0 %v6726_v26, %s5334_s18  ;;  %v6747_v14 = vld [vmem:[#allocation2 + $0x69] sm:$0xff]  ;;  %v2637_v39 = vld [vmem:[#allocation2 + $0x87] sm:$0x1] }
 0x3a8   : > { %2630 = vst.msk [vmem:[#allocation2 + $0x180] sm:$0x1] %vm260_vm1, %v2612_v24  ;;  %2806 = vrot.lane.b32.xlu1 %v6730_v3, %s5334_s18  ;;  %2651 = vst.msk [vmem:[#allocation2 + $0x29] sm:$0x1] %vm260_vm1, %v2633_v34  ;;  %v2638_v33 = vld [vmem:[#allocation2 + $0x9f] sm:$0x1] }
 0x3a9   : > { %2584 = vst.msk [vmem:[#allocation2 + $0x139] sm:$0xff] %vm204_vm0, %v2552_v15  ;;  %2585 = vst.msk [vmem:[#allocation2 + $0x141] sm:$0xff] %vm204_vm0, %v2553_v61  ;;  %v2639_v37 = vld [vmem:[#allocation2 + $0xb7] sm:$0x1]  ;;  %v2640_v1 = vld [vmem:[#allocation2 + $0xcf] sm:$0x1] }
 0x3aa   : > { %2586 = vst.msk [vmem:[#allocation2 + $0x151] sm:$0xff] %vm204_vm0, %v2554_v48  ;;  %2587 = vst.msk [vmem:[#allocation2 + $0x159] sm:$0xff] %vm204_vm0, %v2555_v44  ;;  %v6756_v4 = vld [vmem:[#allocation2 + $0x61] sm:$0xff]  ;;  %v6769_v7 = vld [vmem:[#allocation2 + $0x79] sm:$0xff] }
 0x3ab   : > { %2588 = vst.msk [vmem:[#allocation2 + $0x169] sm:$0xff] %vm204_vm0, %v2556_v49  ;;  %2589 = vst.msk [vmem:[#allocation2 + $0x171] sm:$0xff] %vm204_vm0, %v2557_v57  ;;  %2804 = vrot.lane.b32.xlu0 %v6734_v8, %s5334_s18  ;;  %v2641_v20 = vld [vmem:[#allocation2 + $0xe7] sm:$0x1]  ;;  %v2669_v5 = vld [vmem:[#allocation2 + $0x8] sm:$0xff] }
 0x3ac   : > { %2591 = vst.msk [vmem:[#allocation2 + $0x189] sm:$0xff] %vm204_vm0, %v2559_v50  ;;  %2594 = vst.msk [vmem:[#allocation2 + $0x199] sm:$0xff] %vm204_vm0, %v2556_v49  ;;  %2810 = vrot.lane.b32.xlu1 %v6738_v11, %s5334_s18  ;;  %v2642_v40 = vld [vmem:[#allocation2 + $0xff] sm:$0x1]  ;;  %v6761_v17 = vld [vmem:[#allocation2 + $0x81] sm:$0xff] }
 0x3ad   : > { %2595 = vst.msk [vmem:[#allocation2 + $0x1a1] sm:$0xff] %vm204_vm0, %v2557_v57  ;;  %v2643_v45 = vld [vmem:[#allocation2 + $0x117] sm:$0x1]  ;;  %v2596_v18 = vld [vmem:[#allocation2 + $0x2] sm:$0x1]  ;;  %2701 = vst.msk [vmem:[#allocation3 + $0x8] sm:$0xff] %vm204_vm0, %v2669_v5 }
 0x3ae   : > { %2653 = vst.msk [vmem:[#allocation2 + $0x59] sm:$0x1] %vm260_vm1, %v2635_v0  ;;  %2654 = vst.msk [vmem:[#allocation2 + $0x71] sm:$0x1] %vm260_vm1, %v2636_v55  ;;  %v2644_v47 = vld [vmem:[#allocation2 + $0x12f] sm:$0x1] }
 0x3af   : > { %2808 = vrot.lane.b32.xlu0 %v6743_v19, %s5334_s18  ;;  %2655 = vst.msk [vmem:[#allocation2 + $0x89] sm:$0x1] %vm260_vm1, %v2637_v39  ;;  %2656 = vst.msk [vmem:[#allocation2 + $0xa1] sm:$0x1] %vm260_vm1, %v2638_v33  ;;  %v6776_v10 = vld [vmem:[#allocation2 + $0x99] sm:$0xff]  ;;  %v6788_v56 = vld [vmem:[#allocation2 + $0x91] sm:$0xff] }
 0x3b0   : > { %2814 = vrot.lane.b32.xlu1 %v6747_v14, %s5334_s18  ;;  %2657 = vst.msk [vmem:[#allocation2 + $0xb9] sm:$0x1] %vm260_vm1, %v2639_v37  ;;  %2658 = vst.msk [vmem:[#allocation2 + $0xd1] sm:$0x1] %vm260_vm1, %v2640_v1  ;;  %v2645_v46 = vld [vmem:[#allocation2 + $0x147] sm:$0x1] }
 0x3b1   : > { %2659 = vst.msk [vmem:[#allocation2 + $0xe9] sm:$0x1] %vm260_vm1, %v2641_v20  ;;  %2660 = vst.msk [vmem:[#allocation2 + $0x101] sm:$0x1] %vm260_vm1, %v2642_v40  ;;  %v6778_v6 = vld [vmem:[#allocation2 + $0x20] sm:$0xff]  ;;  %v6786_v21 = vld [vmem:[#allocation2 + $0x38] sm:$0xff] }
 0x3b2   : > { %2661 = vst.msk [vmem:[#allocation2 + $0x119] sm:$0x1] %vm260_vm1, %v2643_v45  ;;  %2662 = vst.msk [vmem:[#allocation2 + $0x131] sm:$0x1] %vm260_vm1, %v2644_v47  ;;  %v2597_v35 = vld [vmem:[#allocation2 + $0x1a] sm:$0x1] }
 0x3b3   : > { %2812 = vrot.lane.b32.xlu0 %v6756_v4, %s5334_s18  ;;  %2614 = vst.msk [vmem:[#allocation2] sm:$0x1] %vm260_vm1, %v2596_v18  ;;  %2663 = vst.msk [vmem:[#allocation2 + $0x149] sm:$0x1] %vm260_vm1, %v2645_v46  ;;  %v2646_v13 = vld [vmem:[#allocation2 + $0x15f] sm:$0x1] }
 0x3b4   : > { %2818 = vrot.lane.b32.xlu1 %v6761_v17, %s5334_s18  ;;  %2703 = vst.msk [vmem:[#allocation3 + $0x18] sm:$0xff] %vm204_vm0, %v6778_v6  ;;  %2705 = vst.msk [vmem:[#allocation3 + $0x28] sm:$0xff] %vm204_vm0, %v6786_v21  ;;  %v2598_v28 = vld [vmem:[#allocation2 + $0x32] sm:$0x1]  ;;  %v6798_v30 = vld [vmem:[#allocation2 + $0xa9] sm:$0xff] }
 0x3b5   : > { %2615 = vst.msk [vmem:[#allocation2 + $0x18] sm:$0x1] %vm260_vm1, %v2597_v35  ;;  %2664 = vst.msk [vmem:[#allocation2 + $0x161] sm:$0x1] %vm260_vm1, %v2646_v13  ;;  %v2747_v23 = vld [vmem:[#allocation2 + $0xb1] sm:$0xff]  ;;  %v6802_v38 = vld [vmem:[#allocation2 + $0x68] sm:$0xff] }
 0x3b6   : > { %2616 = vst.msk [vmem:[#allocation2 + $0x30] sm:$0x1] %vm260_vm1, %v2598_v28  ;;  %v6795_v9 = vld [vmem:[#allocation2 + $0x50] sm:$0xff]  ;;  %v2599_v31 = vld [vmem:[#allocation2 + $0x4a] sm:$0x1]  ;;  %v6809_v27 = vld [vmem:[#allocation2 + $0x80] sm:$0xff] }
 0x3b7   : > { %2816 = vrot.lane.b32.xlu0 %v6769_v7, %s5334_s18  ;;  %2707 = vst.msk [vmem:[#allocation3 + $0x38] sm:$0xff] %vm204_vm0, %v6795_v9  ;;  %v2749_v51 = vld [vmem:[#allocation2 + $0xc9] sm:$0xff]  ;;  %2709 = vst.msk [vmem:[#allocation3 + $0x48] sm:$0xff] %vm204_vm0, %v6802_v38  ;;  %v2600_v42 = vld [vmem:[#allocation2 + $0x62] sm:$0x1] }
 0x3b8   : > { %2822 = vrot.lane.b32.xlu1 %v6776_v10, %s5334_s18  ;;  %2617 = vst.msk [vmem:[#allocation2 + $0x48] sm:$0x1] %vm260_vm1, %v2599_v31  ;;  %2618 = vst.msk [vmem:[#allocation2 + $0x60] sm:$0x1] %vm260_vm1, %v2600_v42  ;;  %v2601_v25 = vld [vmem:[#allocation2 + $0x7a] sm:$0x1] }
 0x3b9   : > { %v6811_v54 = vld [vmem:[#allocation2 + $0x98] sm:$0xff]  ;;  %2711 = vst.msk [vmem:[#allocation3 + $0x58] sm:$0xff] %vm204_vm0, %v6809_v27  ;;  %v2602_v52 = vld [vmem:[#allocation2 + $0x92] sm:$0x1]  ;;  %v2748_v36 = vld [vmem:[#allocation2 + $0xc1] sm:$0xff] }
 0x3ba   : > { %v2668_v29 = vld [vmem:[#allocation2] sm:$0xff]  ;;  %2619 = vst.msk [vmem:[#allocation2 + $0x78] sm:$0x1] %vm260_vm1, %v2601_v25  ;;  %v6822_v63 = vld [vmem:[#allocation2 + $0xb0] sm:$0xff]  ;;  %2620 = vst.msk [vmem:[#allocation2 + $0x90] sm:$0x1] %vm260_vm1, %v2602_v52 }
 0x3bb   : > { %2820 = vrot.lane.b32.xlu0 %v6788_v56, %s5334_s18  ;;  %2700 = vst.msk [vmem:[#allocation3] sm:$0xff] %vm204_vm0, %v2668_v29  ;;  %2713 = vst.msk [vmem:[#allocation3 + $0x68] sm:$0xff] %vm204_vm0, %v6811_v54  ;;  %v2603_v22 = vld [vmem:[#allocation2 + $0xaa] sm:$0x1]  ;;  %v2751_v12 = vld [vmem:[#allocation2 + $0xe1] sm:$0xff] }
 0x3bc   : > { %2826 = vrot.lane.b32.xlu1 %v2747_v23, %s5334_s18  ;;  %v6815_v53 = vld [vmem:[#allocation2 + $0x18] sm:$0xff]  ;;  %2715 = vst.msk [vmem:[#allocation3 + $0x78] sm:$0xff] %vm204_vm0, %v6822_v63  ;;  %v6830_v2 = vld [vmem:[#allocation2 + $0xc8] sm:$0xff]  ;;  %v2604_v58 = vld [vmem:[#allocation2 + $0xc2] sm:$0x1] }
 0x3bd   : > { %2702 = vst.msk [vmem:[#allocation3 + $0x10] sm:$0xff] %vm204_vm0, %v6815_v53  ;;  %2717 = vst.msk [vmem:[#allocation3 + $0x88] sm:$0xff] %vm204_vm0, %v6830_v2  ;;  %v6835_v43 = vld [vmem:[#allocation2 + $0xe0] sm:$0xff]  ;;  %v2605_v32 = vld [vmem:[#allocation2 + $0xda] sm:$0x1] }
 0x3be   : > { %2621 = vst.msk [vmem:[#allocation2 + $0xa8] sm:$0x1] %vm260_vm1, %v2603_v22  ;;  %v6837_v16 = vld [vmem:[#allocation2 + $0x30] sm:$0xff]  ;;  %2622 = vst.msk [vmem:[#allocation2 + $0xc0] sm:$0x1] %vm260_vm1, %v2604_v58  ;;  %v6843_v60 = vld [vmem:[#allocation2 + $0xf8] sm:$0xff] }
 0x3bf   : > { %2824 = vrot.lane.b32.xlu0 %v6798_v30, %s5334_s18  ;;  %2719 = vst.msk [vmem:[#allocation3 + $0x98] sm:$0xff] %vm204_vm0, %v6835_v43  ;;  %v2606_v41 = vld [vmem:[#allocation2 + $0xf2] sm:$0x1]  ;;  %2704 = vst.msk [vmem:[#allocation3 + $0x20] sm:$0xff] %vm204_vm0, %v6837_v16  ;;  %v2607_v61 = vld [vmem:[#allocation2 + $0x10a] sm:$0x1] }
 0x3c0   : > { %2830 = vrot.lane.b32.xlu1 %v2749_v51, %s5334_s18  ;;  %2623 = vst.msk [vmem:[#allocation2 + $0xd8] sm:$0x1] %vm260_vm1, %v2605_v32  ;;  %2624 = vst.msk [vmem:[#allocation2 + $0xf0] sm:$0x1] %vm260_vm1, %v2606_v41  ;;  %v6851_v15 = vld [vmem:[#allocation2 + $0x110] sm:$0xff]  ;;  %v6853_v48 = vld [vmem:[#allocation2 + $0x128] sm:$0xff] }
 0x3c1   : > { %2721 = vst.msk [vmem:[#allocation3 + $0xa8] sm:$0xff] %vm204_vm0, %v6843_v60  ;;  %v2750_v24 = vld [vmem:[#allocation2 + $0xd9] sm:$0xff]  ;;  %v6856_v44 = vld [vmem:[#allocation2 + $0x48] sm:$0xff]  ;;  %2723 = vst.msk [vmem:[#allocation3 + $0xb8] sm:$0xff] %vm204_vm0, %v6851_v15 }
 0x3c2   : > { %2625 = vst.msk [vmem:[#allocation2 + $0x108] sm:$0x1] %vm260_vm1, %v2607_v61  ;;  %v2608_v49 = vld [vmem:[#allocation2 + $0x122] sm:$0x1]  ;;  %v2609_v59 = vld [vmem:[#allocation2 + $0x13a] sm:$0x1] }
 0x3c3   : > { %2828 = vrot.lane.b32.xlu0 %v2748_v36, %s5334_s18  ;;  %2725 = vst.msk [vmem:[#allocation3 + $0xc8] sm:$0xff] %vm204_vm0, %v6853_v48  ;;  %v2695_v57 = vld [vmem:[#allocation2 + $0x140] sm:$0xff]  ;;  %2706 = vst.msk [vmem:[#allocation3 + $0x30] sm:$0xff] %vm204_vm0, %v6856_v44  ;;  %v2697_v34 = vld [vmem:[#allocation2 + $0x158] sm:$0xff] }
 0x3c4   : > { %2834 = vrot.lane.b32.xlu1 %v2751_v12, %s5334_s18  ;;  %v6865_v50 = vld [vmem:[#allocation2 + $0x60] sm:$0xff]  ;;  %2626 = vst.msk [vmem:[#allocation2 + $0x120] sm:$0x1] %vm260_vm1, %v2608_v49  ;;  %v6871_v0 = vld [vmem:[#allocation2 + $0x78] sm:$0xff]  ;;  %2627 = vst.msk [vmem:[#allocation2 + $0x138] sm:$0x1] %vm260_vm1, %v2609_v59 }
 0x3c5   : > { %2727 = vst.msk [vmem:[#allocation3 + $0xd8] sm:$0xff] %vm204_vm0, %v2695_v57  ;;  %2708 = vst.msk [vmem:[#allocation3 + $0x40] sm:$0xff] %vm204_vm0, %v6865_v50  ;;  %v2610_v55 = vld [vmem:[#allocation2 + $0x152] sm:$0x1]  ;;  %v2753_v33 = vld [vmem:[#allocation2 + $0xf9] sm:$0xff] }
 0x3c6   : > { %2729 = vst.msk [vmem:[#allocation3 + $0xe8] sm:$0xff] %vm204_vm0, %v2697_v34  ;;  %v2699_v39 = vld [vmem:[#allocation2 + $0x170] sm:$0xff]  ;;  %2710 = vst.msk [vmem:[#allocation3 + $0x50] sm:$0xff] %vm204_vm0, %v6871_v0  ;;  %v2611_v1 = vld [vmem:[#allocation2 + $0x16a] sm:$0x1] }
 0x3c7   : > { %2832 = vrot.lane.b32.xlu0 %v2750_v24, %s5334_s18  ;;  %v6878_v37 = vld [vmem:[#allocation2 + $0x90] sm:$0xff]  ;;  %2628 = vst.msk [vmem:[#allocation2 + $0x150] sm:$0x1] %vm260_vm1, %v2610_v55  ;;  %v6885_v20 = vld [vmem:[#allocation2 + $0xa8] sm:$0xff]  ;;  %2629 = vst.msk [vmem:[#allocation2 + $0x168] sm:$0x1] %vm260_vm1, %v2611_v1 }
 0x3c8   : > { %2731 = vst.msk [vmem:[#allocation3 + $0xf8] sm:$0xff] %vm204_vm0, %v2699_v39  ;;  %2838 = vrot.lane.b32.xlu1 %v2753_v33, %s5334_s18  ;;  %2712 = vst.msk [vmem:[#allocation3 + $0x60] sm:$0xff] %vm204_vm0, %v6878_v37  ;;  %v6890_v40 = vld [vmem:[#allocation2 + $0xc0] sm:$0xff]  ;;  %v6892_v45 = vld [vmem:[#allocation2 + $0xd8] sm:$0xff] }
 0x3c9   : > { %2714 = vst.msk [vmem:[#allocation3 + $0x70] sm:$0xff] %vm204_vm0, %v6885_v20  ;;  %v2752_v47 = vld [vmem:[#allocation2 + $0xf1] sm:$0xff]  ;;  %2716 = vst.msk [vmem:[#allocation3 + $0x80] sm:$0xff] %vm204_vm0, %v6890_v40  ;;  %v6903_v46 = vld [vmem:[#allocation2 + $0x108] sm:$0xff] }
 0x3ca   : > { %2718 = vst.msk [vmem:[#allocation3 + $0x90] sm:$0xff] %vm204_vm0, %v6892_v45  ;;  %v6898_v5 = vld [vmem:[#allocation2 + $0xf0] sm:$0xff]  ;;  %2722 = vst.msk [vmem:[#allocation3 + $0xb0] sm:$0xff] %vm204_vm0, %v6903_v46  ;;  %v2756_v29 = vld [vmem:[#allocation2 + $0x121] sm:$0xff] }
 0x3cb   : > { %2836 = vrot.lane.b32.xlu0 %v2752_v47, %s5334_s18  ;;  %v2755_v18 = vld [vmem:[#allocation2 + $0x111] sm:$0xff]  ;;  %2720 = vst.msk [vmem:[#allocation3 + $0xa0] sm:$0xff] %vm204_vm0, %v6898_v5  ;;  %v6908_v35 = vld [vmem:[#allocation2 + $0x120] sm:$0xff]  ;;  %v2754_v28 = vld [vmem:[#allocation2 + $0x109] sm:$0xff] }
 0x3cc   : > { %2842 = vrot.lane.b32.xlu1 %v2755_v18, %s5334_s18  ;;  %2724 = vst.msk [vmem:[#allocation3 + $0xc0] sm:$0xff] %vm204_vm0, %v6908_v35  ;;  %v2694_v13 = vld [vmem:[#allocation2 + $0x138] sm:$0xff]  ;;  %v2757_v31 = vld [vmem:[#allocation2 + $0x129] sm:$0xff]  ;;  %v2759_v42 = vld [vmem:[#allocation2 + $0x141] sm:$0xff] }
 0x3cd   : > { %2726 = vst.msk [vmem:[#allocation3 + $0xd0] sm:$0xff] %vm204_vm0, %v2694_v13  ;;  %v2758_v25 = vld [vmem:[#allocation2 + $0x139] sm:$0xff]  ;;  %v2647_v36 = vld [vmem:[#allocation2 + $0x177] sm:$0x1]  ;;  %v2648_v22 = vld [vmem:[#allocation2 + $0x18f] sm:$0x1] }
 0x3ce   : > { %v2696_v23 = vld [vmem:[#allocation2 + $0x150] sm:$0xff]  ;;  %v2698_v51 = vld [vmem:[#allocation2 + $0x168] sm:$0xff]  ;;  %v2761_v52 = vld [vmem:[#allocation2 + $0x159] sm:$0xff]  ;;  %2665 = vst.msk [vmem:[#allocation2 + $0x179] sm:$0x1] %vm260_vm1, %v2647_v36 }
 0x3cf   : > { %2840 = vrot.lane.b32.xlu0 %v2754_v28, %s5334_s18  ;;  %2728 = vst.msk [vmem:[#allocation3 + $0xe0] sm:$0xff] %vm204_vm0, %v2696_v23  ;;  %2730 = vst.msk [vmem:[#allocation3 + $0xf0] sm:$0xff] %vm204_vm0, %v2698_v51  ;;  %v2613_v12 = vld [vmem:[#allocation2 + $0x19a] sm:$0x1]  ;;  %v2760_v58 = vld [vmem:[#allocation2 + $0x151] sm:$0xff] }
 0x3d0   : > { %2846 = vrot.lane.b32.xlu1 %v2757_v31, %s5334_s18  ;;  %2666 = vst.msk [vmem:[#allocation2 + $0x191] sm:$0x1] %vm260_vm1, %v2648_v22  ;;  %2631 = vst.msk [vmem:[#allocation2 + $0x198] sm:$0x1] %vm260_vm1, %v2613_v12  ;;  %v2763_v32 = vld [vmem:[#allocation2 + $0x171] sm:$0xff]  ;;  %v2762_v61 = vld [vmem:[#allocation2 + $0x169] sm:$0xff] }
 0x3d1   : > { %v2649_v41 = vld [vmem:[#allocation2 + $0x1a7] sm:$0x1]  ;;  %v2925_v24 = vld [vmem:[#allocation2 + $0xa] sm:$0xff]  ;;  %v6934_v59 = vld [vmem:[#allocation2 + $0x1a] sm:$0xff] }
 0x3d2   : > { %2667 = vst.msk [vmem:[#allocation2 + $0x1a9] sm:$0x1] %vm260_vm1, %v2649_v41  ;;  %v2924_v49 = vld [vmem:[#allocation2 + $0x2] sm:$0xff]  ;;  %v6938_v34 = vld [vmem:[#allocation2 + $0x3a] sm:$0xff]  ;;  %v6942_v55 = vld [vmem:[#allocation2 + $0x32] sm:$0xff] }
 0x3d3   : > { %2844 = vrot.lane.b32.xlu0 %v2756_v29, %s5334_s18  ;;  %v6930_v57 = vld [vmem:[#allocation2 + $0x22] sm:$0xff]  ;;  %v6946_v39 = vld [vmem:[#allocation2 + $0x52] sm:$0xff]  ;;  %v6950_v33 = vld [vmem:[#allocation2 + $0x4a] sm:$0xff] }
 0x3d4   : > { %2850 = vrot.lane.b32.xlu1 %v2759_v42, %s5334_s18  ;;  %v6954_v1 = vld [vmem:[#allocation2 + $0x6a] sm:$0xff]  ;;  %v6958_v47 = vld [vmem:[#allocation2 + $0x62] sm:$0xff]  ;;  %v6966_v13 = vld [vmem:[#allocation2 + $0x7a] sm:$0xff] }
 0x3d5   : > { %v6962_v18 = vld [vmem:[#allocation2 + $0x82] sm:$0xff]  ;;  %v6970_v28 = vld [vmem:[#allocation2 + $0x9a] sm:$0xff]  ;;  %v6974_v23 = vld [vmem:[#allocation2 + $0x92] sm:$0xff] }
 0x3d6   : > { %v6978_v31 = vld [vmem:[#allocation2 + $0xb2] sm:$0xff]  ;;  %v6982_v51 = vld [vmem:[#allocation2 + $0xaa] sm:$0xff]  ;;  %v6987_v42 = vld [vmem:[#allocation2 + $0xc2] sm:$0xff] }
 0x3d7   : > { %2848 = vrot.lane.b32.xlu0 %v2758_v25, %s5334_s18  ;;  %v2941_v29 = vld [vmem:[#allocation2 + $0xca] sm:$0xff]  ;;  %v2943_v25 = vld [vmem:[#allocation2 + $0xe2] sm:$0xff]  ;;  %v2945_v36 = vld [vmem:[#allocation2 + $0xfa] sm:$0xff] }
 0x3d8   : > { %2854 = vrot.lane.b32.xlu1 %v2761_v52, %s5334_s18  ;;  %v2942_v52 = vld [vmem:[#allocation2 + $0xda] sm:$0xff]  ;;  %v2944_v22 = vld [vmem:[#allocation2 + $0xf2] sm:$0xff] }
 0x3d9   : > { %v2947_v12 = vld [vmem:[#allocation2 + $0x112] sm:$0xff] }
 0x3db   : > { %2852 = vrot.lane.b32.xlu0 %v2760_v58, %s5334_s18  ;;  %v2946_v58 = vld [vmem:[#allocation2 + $0x10a] sm:$0xff] }
 0x3dc   : > { %2858 = vrot.lane.b32.xlu1 %v2763_v32, %s5334_s18  ;;  %v2949_v32 = vld [vmem:[#allocation2 + $0x12a] sm:$0xff] }
 0x3df   : > { %2856 = vrot.lane.b32.xlu0 %v2762_v61, %s5334_s18  ;;  %v2948_v61 = vld [vmem:[#allocation2 + $0x122] sm:$0xff] }
 0x3e0   : > { %2990 = vrot.lane.b32.xlu1 %v2925_v24, %s5335_s19  ;;  %v2951_v24 = vld [vmem:[#allocation2 + $0x142] sm:$0xff] }
 0x3e3   : > { %2988 = vrot.lane.b32.xlu0 %v2924_v49, %s5335_s19 }
 0x3e4   : > { %2994 = vrot.lane.b32.xlu1 %v6930_v57, %s5335_s19 }
 0x3e7   : > { %2992 = vrot.lane.b32.xlu0 %v6934_v59, %s5335_s19 }
 0x3e8   : > { %2998 = vrot.lane.b32.xlu1 %v6938_v34, %s5335_s19 }
 0x3eb   : > { %2996 = vrot.lane.b32.xlu0 %v6942_v55, %s5335_s19 }
 0x3ec   : > { %3002 = vrot.lane.b32.xlu1 %v6946_v39, %s5335_s19 }
 0x3ef   : > { %3000 = vrot.lane.b32.xlu0 %v6950_v33, %s5335_s19 }
 0x3f0   : > { %3006 = vrot.lane.b32.xlu1 %v6954_v1, %s5335_s19 }
 0x3f3   : > { %3004 = vrot.lane.b32.xlu0 %v6958_v47, %s5335_s19 }
 0x3f4   : > { %3010 = vrot.lane.b32.xlu1 %v6962_v18, %s5335_s19 }
 0x3f7   : > { %3008 = vrot.lane.b32.xlu0 %v6966_v13, %s5335_s19 }
 0x3f8   : > { %3014 = vrot.lane.b32.xlu1 %v6970_v28, %s5335_s19 }
 0x3fb   : > { %3012 = vrot.lane.b32.xlu0 %v6974_v23, %s5335_s19 }
 0x3fc   : > { %3018 = vrot.lane.b32.xlu1 %v6978_v31, %s5335_s19 }
 0x3ff   : > { %3016 = vrot.lane.b32.xlu0 %v6982_v51, %s5335_s19 }
 0x400   : > { %3022 = vrot.lane.b32.xlu1 %v2941_v29, %s5335_s19  ;;  %v2950_v29 = vld [vmem:[#allocation2 + $0x13a] sm:$0xff] }
 0x403   : > { %3020 = vrot.lane.b32.xlu0 %v6987_v42, %s5335_s19 }
 0x404   : > { %3026 = vrot.lane.b32.xlu1 %v2943_v25, %s5335_s19 }
 0x407   : > { %3024 = vrot.lane.b32.xlu0 %v2942_v52, %s5335_s19  ;;  %v2953_v52 = vld [vmem:[#allocation2 + $0x15a] sm:$0xff] }
 0x408   : > { %3030 = vrot.lane.b32.xlu1 %v2945_v36, %s5335_s19 }
 0x40b   : > { %3028 = vrot.lane.b32.xlu0 %v2944_v22, %s5335_s19  ;;  %v2952_v22 = vld [vmem:[#allocation2 + $0x152] sm:$0xff] }
 0x40c   : > { %3034 = vrot.lane.b32.xlu1 %v2947_v12, %s5335_s19 }
 0x40f   : > { %3032 = vrot.lane.b32.xlu0 %v2946_v58, %s5335_s19  ;;  %v2799_v41 = vpop.permute.xlu1 %2798 }
 0x410   : > { %3038 = vrot.lane.b32.xlu1 %v2949_v32, %s5335_s19  ;;  %2893 = vst.msk [vmem:[#allocation3 + $0x8] sm:$0xff] %vm539_vm2, %v2799_v41  ;;  %v2954_v32 = vld [vmem:[#allocation2 + $0x16a] sm:$0xff] }
 0x413   : > { %3036 = vrot.lane.b32.xlu0 %v2948_v61, %s5335_s19 }
 0x414   : > { %3042 = vrot.lane.b32.xlu1 %v2951_v24, %s5335_s19 }
 0x415   : > { %v2797_v49 = vpop.permute.xlu0 %2796 }
 0x416   : > { %2892 = vst.msk [vmem:[#allocation3] sm:$0xff] %vm539_vm2, %v2797_v49  ;;  %v2803_v25 = vpop.permute.xlu1 %2802 }
 0x417   : > { %3040 = vrot.lane.b32.xlu0 %v2950_v29, %s5335_s19  ;;  %2895 = vst.msk [vmem:[#allocation3 + $0x18] sm:$0xff] %vm539_vm2, %v2803_v25  ;;  %v4300_v29 = vld [vmem:[%s8058_s2] sm:$0xff] }
 0x418   : > { %3046 = vrot.lane.b32.xlu1 %v2953_v52, %s5335_s19 }
 0x419   : > { %v2801_v36 = vpop.permute.xlu0 %2800 }
 0x41a   : > { %2894 = vst.msk [vmem:[#allocation3 + $0x10] sm:$0xff] %vm539_vm2, %v2801_v36  ;;  %v2807_v12 = vpop.permute.xlu1 %2806 }
 0x41b   : > { %3044 = vrot.lane.b32.xlu0 %v2952_v22, %s5335_s19  ;;  %2897 = vst.msk [vmem:[#allocation3 + $0x28] sm:$0xff] %vm539_vm2, %v2807_v12 }
 0x41c   : > { %3180 = vrot.lane.b32.xlu1 %v6815_v53, %s5336_s20 }
 0x41d   : > { %v2805_v58 = vpop.permute.xlu0 %2804 }
 0x41e   : > { %2896 = vst.msk [vmem:[#allocation3 + $0x20] sm:$0xff] %vm539_vm2, %v2805_v58  ;;  %v2811_v41 = vpop.permute.xlu1 %2810 }
 0x41f   : > { %3048 = vrot.lane.b32.xlu0 %v2954_v32, %s5335_s19  ;;  %2899 = vst.msk [vmem:[#allocation3 + $0x38] sm:$0xff] %vm539_vm2, %v2811_v41  ;;  %v4304_v32 = vld [vmem:[%s8058_s2 + $0x20] sm:$0xf] }
 0x420   : > { %3372 = vrot.lane.b32.xlu1 %v6726_v26, %s5337_s21 }
 0x421   : > { %v2809_v61 = vpop.permute.xlu0 %2808 }
 0x422   : > { %2898 = vst.msk [vmem:[#allocation3 + $0x30] sm:$0xff] %vm539_vm2, %v2809_v61  ;;  %v2815_v24 = vpop.permute.xlu1 %2814 }
 0x423   : > { %3182 = vrot.lane.b32.xlu0 %v6778_v6, %s5336_s20  ;;  %2901 = vst.msk [vmem:[#allocation3 + $0x48] sm:$0xff] %vm539_vm2, %v2815_v24 }
 0x424   : > { %3564 = vrot.lane.b32.xlu1 %v6934_v59, %s5338_s26 }
 0x425   : > { %v2813_v53 = vpop.permute.xlu0 %2812 }
 0x426   : > { %2900 = vst.msk [vmem:[#allocation3 + $0x40] sm:$0xff] %vm539_vm2, %v2813_v53  ;;  %v2819_v49 = vpop.permute.xlu1 %2818 }
 0x427   : > { %3374 = vrot.lane.b32.xlu0 %v6722_v62, %s5337_s21  ;;  %2903 = vst.msk [vmem:[#allocation3 + $0x58] sm:$0xff] %vm539_vm2, %v2819_v49 }
 0x428   : > { %3756 = vrot.lane.b32.xlu1 %v6837_v16, %s5339_s4 }
 0x429   : > { %v2817_v26 = vpop.permute.xlu0 %2816 }
 0x42a   : > { %2902 = vst.msk [vmem:[#allocation3 + $0x50] sm:$0xff] %vm539_vm2, %v2817_v26  ;;  %v2823_v6 = vpop.permute.xlu1 %2822 }
 0x42b   : > { %3566 = vrot.lane.b32.xlu0 %v6930_v57, %s5338_s26  ;;  %2905 = vst.msk [vmem:[#allocation3 + $0x68] sm:$0xff] %vm539_vm2, %v2823_v6  ;;  %v4301_v57 = vld [vmem:[%s8058_s2 + $0x8] sm:$0xff] }
 0x42c   : > { %3758 = vrot.lane.b32.xlu1 %v6786_v21, %s5339_s4  ;;  %v5298_v25 = vpack.c.bf16 %v4301_v57, %v4300_v29 }
 0x42d   : > { %v2821_v59 = vpop.permute.xlu0 %2820 }
 0x42e   : > { %2904 = vst.msk [vmem:[#allocation3 + $0x60] sm:$0xff] %vm539_vm2, %v2821_v59  ;;  %v2827_v62 = vpop.permute.xlu1 %2826  ;;  %5299 = vmatprep.subr.bf16.mxu1 %v5298_v25 }
 0x42f   : > { %3184 = vrot.lane.b32.xlu0 %v6837_v16, %s5336_s20  ;;  %2907 = vst.msk [vmem:[#allocation3 + $0x78] sm:$0xff] %vm539_vm2, %v2827_v62  ;;  %5301 = vmatpush3.bf16.msra.mxu1 %v5298_v25  ;;  %v4302_v16 = vld [vmem:[%s8058_s2 + $0x10] sm:$0xff] }
 0x430   : > { %3186 = vrot.lane.b32.xlu1 %v6786_v21, %s5336_s20  ;;  %v4303_v21 = vld [vmem:[%s8058_s2 + $0x18] sm:$0xff] }
 0x431   : > { %v2825_v52 = vpop.permute.xlu0 %2824  ;;  %v5302_v22 = vpack.c.bf16 %v4303_v21, %v4302_v16 }
 0x432   : > { %2906 = vst.msk [vmem:[#allocation3 + $0x70] sm:$0xff] %vm539_vm2, %v2825_v52  ;;  %v2831_v36 = vpop.permute.xlu1 %2830 }
 0x433   : > { %3948 = vrot.lane.b32.xlu0 %v6734_v8, %s5340_s5  ;;  %2909 = vst.msk [vmem:[#allocation3 + $0x88] sm:$0xff] %vm539_vm2, %v2831_v36  ;;  %5303 = vmatprep.subr.bf16.mxu1 %v5302_v22 }
 0x434   : > { %3950 = vrot.lane.b32.xlu1 %v6730_v3, %s5340_s5  ;;  %5305 = vmatpush3.bf16.msra.mxu1 %v5302_v22 }
 0x435   : > { %v2829_v12 = vpop.permute.xlu0 %2828  ;;  %5240 = vmatprep.subr.msk.mxu1 %vm2058_vm5, %v4304_v32 }
 0x436   : > { %2908 = vst.msk [vmem:[#allocation3 + $0x80] sm:$0xff] %vm539_vm2, %v2829_v12  ;;  %v2835_v58 = vpop.permute.xlu1 %2834 }
 0x437   : > { %3376 = vrot.lane.b32.xlu0 %v6734_v8, %s5337_s21  ;;  %2911 = vst.msk [vmem:[#allocation3 + $0x98] sm:$0xff] %vm539_vm2, %v2835_v58 }
 0x438   : > { %3378 = vrot.lane.b32.xlu1 %v6730_v3, %s5337_s21  ;;  %5241 = vmatpush3.msk.msra.mxu1 %vm2058_vm5, %v4304_v32 }
 0x439   : > { %v2833_v41 = vpop.permute.xlu0 %2832 }
 0x43a   : > { %2910 = vst.msk [vmem:[#allocation3 + $0x90] sm:$0xff] %vm539_vm2, %v2833_v41  ;;  %v2839_v61 = vpop.permute.xlu1 %2838 }
 0x43b   : > { %4140 = vrot.lane.b32.xlu0 %v6942_v55, %s5341_s8  ;;  %2913 = vst.msk [vmem:[#allocation3 + $0xa8] sm:$0xff] %vm539_vm2, %v2839_v61 }
 0x43c   : > { %4142 = vrot.lane.b32.xlu1 %v6938_v34, %s5341_s8 }
 0x43d   : > { %v2837_v8 = vpop.permute.xlu0 %2836 }
 0x43e   : > { %2912 = vst.msk [vmem:[#allocation3 + $0xa0] sm:$0xff] %vm539_vm2, %v2837_v8  ;;  %v2843_v3 = vpop.permute.xlu1 %2842 }
 0x43f   : > { %3568 = vrot.lane.b32.xlu0 %v6942_v55, %s5338_s26  ;;  %2915 = vst.msk [vmem:[#allocation3 + $0xb8] sm:$0xff] %vm539_vm2, %v2843_v3 }
 0x440   : > { %3760 = vrot.lane.b32.xlu1 %v6856_v44, %s5339_s4 }
 0x441   : > { %v2841_v24 = vpop.permute.xlu0 %2840 }
 0x442   : > { %2914 = vst.msk [vmem:[#allocation3 + $0xb0] sm:$0xff] %vm539_vm2, %v2841_v24  ;;  %v2847_v53 = vpop.permute.xlu1 %2846 }
 0x443   : > { %3570 = vrot.lane.b32.xlu0 %v6938_v34, %s5338_s26  ;;  %2917 = vst.msk [vmem:[#allocation3 + $0xc8] sm:$0xff] %vm539_vm2, %v2847_v53 }
 0x444   : > { %3762 = vrot.lane.b32.xlu1 %v6795_v9, %s5339_s4 }
 0x445   : > { %v2845_v49 = vpop.permute.xlu0 %2844 }
 0x446   : > { %2916 = vst.msk [vmem:[#allocation3 + $0xc0] sm:$0xff] %vm539_vm2, %v2845_v49  ;;  %v2851_v55 = vpop.permute.xlu1 %2850 }
 0x447   : > { %3188 = vrot.lane.b32.xlu0 %v6856_v44, %s5336_s20  ;;  %2919 = vst.msk [vmem:[#allocation3 + $0xd8] sm:$0xff] %vm539_vm2, %v2851_v55 }
 0x448   : > { %3190 = vrot.lane.b32.xlu1 %v6795_v9, %s5336_s20 }
 0x449   : > { %v2849_v26 = vpop.permute.xlu0 %2848 }
 0x44a   : > { %2918 = vst.msk [vmem:[#allocation3 + $0xd0] sm:$0xff] %vm539_vm2, %v2849_v26  ;;  %v2855_v34 = vpop.permute.xlu1 %2854 }
 0x44b   : > { %3952 = vrot.lane.b32.xlu0 %v6743_v19, %s5340_s5  ;;  %2921 = vst.msk [vmem:[#allocation3 + $0xe8] sm:$0xff] %vm539_vm2, %v2855_v34 }
 0x44c   : > { %3954 = vrot.lane.b32.xlu1 %v6738_v11, %s5340_s5 }
 0x44d   : > { %v2853_v6 = vpop.permute.xlu0 %2852 }
 0x44e   : > { %2920 = vst.msk [vmem:[#allocation3 + $0xe0] sm:$0xff] %vm539_vm2, %v2853_v6  ;;  %v2859_v44 = vpop.permute.xlu1 %2858  ;;  %v3895_v6 = vld [vmem:[#allocation2 + $0xb1] sm:$0xff] }
 0x44f   : > { %3380 = vrot.lane.b32.xlu0 %v6743_v19, %s5337_s21  ;;  %2923 = vst.msk [vmem:[#allocation3 + $0xf8] sm:$0xff] %vm539_vm2, %v2859_v44 }
 0x450   : > { %3382 = vrot.lane.b32.xlu1 %v6738_v11, %s5337_s21 }
 0x451   : > { %v2857_v9 = vpop.permute.xlu0 %2856 }
 0x452   : > { %2922 = vst.msk [vmem:[#allocation3 + $0xf0] sm:$0xff] %vm539_vm2, %v2857_v9  ;;  %v2991_v59 = vpop.permute.xlu1 %2990 }
 0x453   : > { %4144 = vrot.lane.b32.xlu0 %v6950_v33, %s5341_s8  ;;  %3085 = vst.msk [vmem:[#allocation3 + $0x8] sm:$0xff] %vm732_vm3, %v2991_v59 }
 0x454   : > { %4146 = vrot.lane.b32.xlu1 %v6946_v39, %s5341_s8 }
 0x455   : > { %v2989_v62 = vpop.permute.xlu0 %2988 }
 0x456   : > { %3084 = vst.msk [vmem:[#allocation3] sm:$0xff] %vm732_vm3, %v2989_v62  ;;  %v2995_v19 = vpop.permute.xlu1 %2994 }
 0x457   : > { %3572 = vrot.lane.b32.xlu0 %v6950_v33, %s5338_s26  ;;  %3087 = vst.msk [vmem:[#allocation3 + $0x18] sm:$0xff] %vm732_vm3, %v2995_v19 }
 0x458   : > { %3764 = vrot.lane.b32.xlu1 %v6865_v50, %s5339_s4 }
 0x459   : > { %v2993_v11 = vpop.permute.xlu0 %2992 }
 0x45a   : > { %3086 = vst.msk [vmem:[#allocation3 + $0x10] sm:$0xff] %vm732_vm3, %v2993_v11  ;;  %v2999_v29 = vpop.permute.xlu1 %2998 }
 0x45b   : > { %3574 = vrot.lane.b32.xlu0 %v6946_v39, %s5338_s26  ;;  %3089 = vst.msk [vmem:[#allocation3 + $0x28] sm:$0xff] %vm732_vm3, %v2999_v29 }
 0x45c   : > { %3766 = vrot.lane.b32.xlu1 %v6802_v38, %s5339_s4 }
 0x45d   : > { %v2997_v57 = vpop.permute.xlu0 %2996 }
 0x45e   : > { %3088 = vst.msk [vmem:[#allocation3 + $0x20] sm:$0xff] %vm732_vm3, %v2997_v57  ;;  %v3003_v33 = vpop.permute.xlu1 %3002 }
 0x45f   : > { %3192 = vrot.lane.b32.xlu0 %v6865_v50, %s5336_s20  ;;  %3091 = vst.msk [vmem:[#allocation3 + $0x38] sm:$0xff] %vm732_vm3, %v3003_v33 }
 0x460   : > { %3194 = vrot.lane.b32.xlu1 %v6802_v38, %s5336_s20 }
 0x461   : > { %v3001_v25 = vpop.permute.xlu0 %3000 }
 0x462   : > { %3090 = vst.msk [vmem:[#allocation3 + $0x30] sm:$0xff] %vm732_vm3, %v3001_v25  ;;  %v3007_v39 = vpop.permute.xlu1 %3006 }
 0x463   : > { %3956 = vrot.lane.b32.xlu0 %v6756_v4, %s5340_s5  ;;  %3093 = vst.msk [vmem:[#allocation3 + $0x48] sm:$0xff] %vm732_vm3, %v3007_v39 }
 0x464   : > { %3958 = vrot.lane.b32.xlu1 %v6747_v14, %s5340_s5 }
 0x465   : > { %v3005_v52 = vpop.permute.xlu0 %3004 }
 0x466   : > { %3092 = vst.msk [vmem:[#allocation3 + $0x40] sm:$0xff] %vm732_vm3, %v3005_v52  ;;  %v3011_v50 = vpop.permute.xlu1 %3010  ;;  %v3897_v52 = vld [vmem:[#allocation2 + $0xc9] sm:$0xff] }
 0x467   : > { %3384 = vrot.lane.b32.xlu0 %v6756_v4, %s5337_s21  ;;  %3095 = vst.msk [vmem:[#allocation3 + $0x58] sm:$0xff] %vm732_vm3, %v3011_v50 }
 0x468   : > { %3386 = vrot.lane.b32.xlu1 %v6747_v14, %s5337_s21 }
 0x469   : > { %v3009_v38 = vpop.permute.xlu0 %3008 }
 0x46a   : > { %3094 = vst.msk [vmem:[#allocation3 + $0x50] sm:$0xff] %vm732_vm3, %v3009_v38  ;;  %v3015_v36 = vpop.permute.xlu1 %3014 }
 0x46b   : > { %4148 = vrot.lane.b32.xlu0 %v6958_v47, %s5341_s8  ;;  %3097 = vst.msk [vmem:[#allocation3 + $0x68] sm:$0xff] %vm732_vm3, %v3015_v36  ;;  %v4089_v36 = vld [vmem:[#allocation2 + $0xca] sm:$0xff] }
 0x46c   : > { %4150 = vrot.lane.b32.xlu1 %v6954_v1, %s5341_s8 }
 0x46d   : > { %v3013_v16 = vpop.permute.xlu0 %3012 }
 0x46e   : > { %3096 = vst.msk [vmem:[#allocation3 + $0x60] sm:$0xff] %vm732_vm3, %v3013_v16  ;;  %v3019_v4 = vpop.permute.xlu1 %3018 }
 0x46f   : > { %3576 = vrot.lane.b32.xlu0 %v6958_v47, %s5338_s26  ;;  %3099 = vst.msk [vmem:[#allocation3 + $0x78] sm:$0xff] %vm732_vm3, %v3019_v4 }
 0x470   : > { %3768 = vrot.lane.b32.xlu1 %v6871_v0, %s5339_s4 }
 0x471   : > { %v3017_v14 = vpop.permute.xlu0 %3016 }
 0x472   : > { %3098 = vst.msk [vmem:[#allocation3 + $0x70] sm:$0xff] %vm732_vm3, %v3017_v14  ;;  %v3023_v21 = vpop.permute.xlu1 %3022  ;;  %v3514_v14 = vld [vmem:[#allocation2 + $0xc2] sm:$0xff] }
 0x473   : > { %3578 = vrot.lane.b32.xlu0 %v6954_v1, %s5338_s26  ;;  %3101 = vst.msk [vmem:[#allocation3 + $0x88] sm:$0xff] %vm732_vm3, %v3023_v21 }
 0x474   : > { %3770 = vrot.lane.b32.xlu1 %v6809_v27, %s5339_s4 }
 0x475   : > { %v3021_v22 = vpop.permute.xlu0 %3020 }
 0x476   : > { %3100 = vst.msk [vmem:[#allocation3 + $0x80] sm:$0xff] %vm732_vm3, %v3021_v22  ;;  %v3027_v47 = vpop.permute.xlu1 %3026 }
 0x477   : > { %3196 = vrot.lane.b32.xlu0 %v6871_v0, %s5336_s20  ;;  %3103 = vst.msk [vmem:[#allocation3 + $0x98] sm:$0xff] %vm732_vm3, %v3027_v47 }
 0x478   : > { %3198 = vrot.lane.b32.xlu1 %v6809_v27, %s5336_s20 }
 0x479   : > { %v3025_v12 = vpop.permute.xlu0 %3024 }
 0x47a   : > { %3102 = vst.msk [vmem:[#allocation3 + $0x90] sm:$0xff] %vm732_vm3, %v3025_v12  ;;  %v3031_v1 = vpop.permute.xlu1 %3030 }
 0x47b   : > { %3960 = vrot.lane.b32.xlu0 %v6769_v7, %s5340_s5  ;;  %3105 = vst.msk [vmem:[#allocation3 + $0xa8] sm:$0xff] %vm732_vm3, %v3031_v1 }
 0x47c   : > { %3962 = vrot.lane.b32.xlu1 %v6761_v17, %s5340_s5 }
 0x47d   : > { %v3029_v58 = vpop.permute.xlu0 %3028 }
 0x47e   : > { %3104 = vst.msk [vmem:[#allocation3 + $0xa0] sm:$0xff] %vm732_vm3, %v3029_v58  ;;  %v3035_v0 = vpop.permute.xlu1 %3034 }
 0x47f   : > { %3388 = vrot.lane.b32.xlu0 %v6769_v7, %s5337_s21  ;;  %3107 = vst.msk [vmem:[#allocation3 + $0xb8] sm:$0xff] %vm732_vm3, %v3035_v0  ;;  %v3898_v0 = vld [vmem:[#allocation2 + $0xd9] sm:$0xff] }
 0x480   : > { %3390 = vrot.lane.b32.xlu1 %v6761_v17, %s5337_s21 }
 0x481   : > { %v3033_v27 = vpop.permute.xlu0 %3032 }
 0x482   : > { %3106 = vst.msk [vmem:[#allocation3 + $0xb0] sm:$0xff] %vm732_vm3, %v3033_v27  ;;  %v3039_v32 = vpop.permute.xlu1 %3038 }
 0x483   : > { %4152 = vrot.lane.b32.xlu0 %v6966_v13, %s5341_s8  ;;  %3109 = vst.msk [vmem:[#allocation3 + $0xc8] sm:$0xff] %vm732_vm3, %v3039_v32  ;;  %v3899_v32 = vld [vmem:[#allocation2 + $0xe1] sm:$0xff] }
 0x484   : > { %4154 = vrot.lane.b32.xlu1 %v6962_v18, %s5341_s8 }
 0x485   : > { %v3037_v41 = vpop.permute.xlu0 %3036 }
 0x486   : > { %3108 = vst.msk [vmem:[#allocation3 + $0xc0] sm:$0xff] %vm732_vm3, %v3037_v41  ;;  %v3043_v7 = vpop.permute.xlu1 %3042 }
 0x487   : > { %3580 = vrot.lane.b32.xlu0 %v6966_v13, %s5338_s26  ;;  %3111 = vst.msk [vmem:[#allocation3 + $0xd8] sm:$0xff] %vm732_vm3, %v3043_v7  ;;  %v4090_v7 = vld [vmem:[#allocation2 + $0xda] sm:$0xff] }
 0x488   : > { %3772 = vrot.lane.b32.xlu1 %v6878_v37, %s5339_s4 }
 0x489   : > { %v3041_v17 = vpop.permute.xlu0 %3040 }
 0x48a   : > { %3110 = vst.msk [vmem:[#allocation3 + $0xd0] sm:$0xff] %vm732_vm3, %v3041_v17  ;;  %v3047_v61 = vpop.permute.xlu1 %3046 }
 0x48b   : > { %3582 = vrot.lane.b32.xlu0 %v6962_v18, %s5338_s26  ;;  %3113 = vst.msk [vmem:[#allocation3 + $0xe8] sm:$0xff] %vm732_vm3, %v3047_v61  ;;  %v4091_v61 = vld [vmem:[#allocation2 + $0xe2] sm:$0xff] }
 0x48c   : > { %3774 = vrot.lane.b32.xlu1 %v6811_v54, %s5339_s4 }
 0x48d   : > { %v3045_v8 = vpop.permute.xlu0 %3044 }
 0x48e   : > { %3112 = vst.msk [vmem:[#allocation3 + $0xe0] sm:$0xff] %vm732_vm3, %v3045_v8  ;;  %v3181_v13 = vpop.permute.xlu1 %3180 }
 0x48f   : > { %3200 = vrot.lane.b32.xlu0 %v6878_v37, %s5336_s20  ;;  %3276 = vst.msk [vmem:[#allocation3] sm:$0xff] %vm925_vm4, %v3181_v13 }
 0x490   : > { %3202 = vrot.lane.b32.xlu1 %v6811_v54, %s5336_s20 }
 0x491   : > { %v3049_v3 = vpop.permute.xlu0 %3048 }
 0x492   : > { %3114 = vst.msk [vmem:[#allocation3 + $0xf0] sm:$0xff] %vm732_vm3, %v3049_v3  ;;  %v3373_v18 = vpop.permute.xlu1 %3372 }
 0x493   : > { %3964 = vrot.lane.b32.xlu0 %v6788_v56, %s5340_s5  ;;  %3468 = vst.msk [vmem:[#allocation3] sm:$0xff] %vm1118_vm6, %v3373_v18 }
 0x494   : > { %3966 = vrot.lane.b32.xlu1 %v6776_v10, %s5340_s5 }
 0x495   : > { %v3183_v24 = vpop.permute.xlu0 %3182 }
 0x496   : > { %3277 = vst.msk [vmem:[#allocation3 + $0x8] sm:$0xff] %vm925_vm4, %v3183_v24  ;;  %v3565_v37 = vpop.permute.xlu1 %3564 }
 0x497   : > { %3392 = vrot.lane.b32.xlu0 %v6788_v56, %s5337_s21  ;;  %3660 = vst.msk [vmem:[#allocation3] sm:$0xff] %vm1311_vm7, %v3565_v37 }
 0x498   : > { %3394 = vrot.lane.b32.xlu1 %v6776_v10, %s5337_s21 }
 0x499   : > { %v3375_v54 = vpop.permute.xlu0 %3374 }
 0x49a   : > { %3469 = vst.msk [vmem:[#allocation3 + $0x8] sm:$0xff] %vm1118_vm6, %v3375_v54  ;;  %v3757_v53 = vpop.permute.xlu1 %3756 }
 0x49b   : > { %4156 = vrot.lane.b32.xlu0 %v6974_v23, %s5341_s8  ;;  %3852 = vst.msk [vmem:[#allocation3] sm:$0xff] %vm1505_vm8, %v3757_v53 }
 0x49c   : > { %4158 = vrot.lane.b32.xlu1 %v6970_v28, %s5341_s8 }
 0x49d   : > { %v3567_v49 = vpop.permute.xlu0 %3566 }
 0x49e   : > { %3661 = vst.msk [vmem:[#allocation3 + $0x8] sm:$0xff] %vm1311_vm7, %v3567_v49  ;;  %v3759_v56 = vpop.permute.xlu1 %3758 }
 0x49f   : > { %3584 = vrot.lane.b32.xlu0 %v6974_v23, %s5338_s26  ;;  %3853 = vst.msk [vmem:[#allocation3 + $0x8] sm:$0xff] %vm1505_vm8, %v3759_v56  ;;  %v3900_v56 = vld [vmem:[#allocation2 + $0xf1] sm:$0xff] }
 0x4a0   : > { %3776 = vrot.lane.b32.xlu1 %v6885_v20, %s5339_s4 }
 0x4a1   : > { %v3185_v10 = vpop.permute.xlu0 %3184 }
 0x4a2   : > { %3278 = vst.msk [vmem:[#allocation3 + $0x10] sm:$0xff] %vm925_vm4, %v3185_v10  ;;  %v3187_v55 = vpop.permute.xlu1 %3186 }
 0x4a3   : > { %3586 = vrot.lane.b32.xlu0 %v6970_v28, %s5338_s26  ;;  %3279 = vst.msk [vmem:[#allocation3 + $0x18] sm:$0xff] %vm925_vm4, %v3187_v55  ;;  %v3901_v55 = vld [vmem:[#allocation2 + $0xf9] sm:$0xff] }
 0x4a4   : > { %3778 = vrot.lane.b32.xlu1 %v6822_v63, %s5339_s4 }
 0x4a5   : > { %v3949_v26 = vpop.permute.xlu0 %3948 }
 0x4a6   : > { %4044 = vst.msk [vmem:[#allocation3] sm:$0xff] %vm1698_vm9, %v3949_v26  ;;  %v3951_v23 = vpop.permute.xlu1 %3950 }
 0x4a7   : > { %3204 = vrot.lane.b32.xlu0 %v6885_v20, %s5336_s20  ;;  %4045 = vst.msk [vmem:[#allocation3 + $0x8] sm:$0xff] %vm1698_vm9, %v3951_v23  ;;  %v3320_v20 = vld [vmem:[#allocation2 + $0xa9] sm:$0xff]  ;;  %v4092_v23 = vld [vmem:[#allocation2 + $0xf2] sm:$0xff] }
 0x4a8   : > { %3206 = vrot.lane.b32.xlu1 %v6822_v63, %s5336_s20 }
 0x4a9   : > { %v3377_v34 = vpop.permute.xlu0 %3376 }
 0x4aa   : > { %3470 = vst.msk [vmem:[#allocation3 + $0x10] sm:$0xff] %vm1118_vm6, %v3377_v34  ;;  %v3379_v28 = vpop.permute.xlu1 %3378 }
 0x4ab   : > { %3968 = vrot.lane.b32.xlu0 %v6798_v30, %s5340_s5  ;;  %3471 = vst.msk [vmem:[#allocation3 + $0x18] sm:$0xff] %vm1118_vm6, %v3379_v28  ;;  %v4093_v28 = vld [vmem:[#allocation2 + $0xfa] sm:$0xff] }
 0x4ac   : > { %3970 = vrot.lane.b32.xlu1 %v3895_v6, %s5340_s5 }
 0x4ad   : > { %v4141_v44 = vpop.permute.xlu0 %4140 }
 0x4ae   : > { %4236 = vst.msk [vmem:[#allocation3] sm:$0xff] %vm1891_vm10, %v4141_v44  ;;  %v4143_v9 = vpop.permute.xlu1 %4142 }
 0x4af   : > { %3396 = vrot.lane.b32.xlu0 %v3320_v20, %s5337_s21  ;;  %4237 = vst.msk [vmem:[#allocation3 + $0x8] sm:$0xff] %vm1891_vm10, %v4143_v9 }
 0x4b0   : > { %3398 = vrot.lane.b32.xlu1 %v3895_v6, %s5337_s21 }
 0x4b1   : > { %v3569_v63 = vpop.permute.xlu0 %3568 }
 0x4b2   : > { %3662 = vst.msk [vmem:[#allocation3 + $0x10] sm:$0xff] %vm1311_vm7, %v3569_v63  ;;  %v3761_v30 = vpop.permute.xlu1 %3760 }
 0x4b3   : > { %4160 = vrot.lane.b32.xlu0 %v6982_v51, %s5341_s8  ;;  %3854 = vst.msk [vmem:[#allocation3 + $0x10] sm:$0xff] %vm1505_vm8, %v3761_v30 }
 0x4b4   : > { %4162 = vrot.lane.b32.xlu1 %v6978_v31, %s5341_s8 }
 0x4b5   : > { %v3571_v59 = vpop.permute.xlu0 %3570  ;;  %v4268_v62 = vld [vmem:[#allocation3] sm:$0xff] }
 0x4b6   : > { %3663 = vst.msk [vmem:[#allocation3 + $0x18] sm:$0xff] %vm1311_vm7, %v3571_v59  ;;  %5242 = vmatprep.mubr.msk.f32.mxu1 %vm1961_vm11, %v4268_v62  ;;  %v3763_v19 = vpop.permute.xlu1 %3762  ;;  %v4269_v11 = vld [vmem:[#allocation3 + $0x8] sm:$0xff] }
 0x4b7   : > { %3588 = vrot.lane.b32.xlu0 %v6982_v51, %s5338_s26  ;;  %3855 = vst.msk [vmem:[#allocation3 + $0x18] sm:$0xff] %vm1505_vm8, %v3763_v19  ;;  %5243 = vmatmul.mubr.msk.f32.vlgmr.msra.gmra.mrb[0].mxu1 %vm1961_vm11, %v4269_v11  ;;  %v3902_v11 = vld [vmem:[#allocation2 + $0x109] sm:$0xff] }
 0x4b8   : > { %3780 = vrot.lane.b32.xlu1 %v6890_v40, %s5339_s4 }
 0x4b9   : > { %v3189_v29 = vpop.permute.xlu0 %3188 }
 0x4ba   : > { %3280 = vst.msk [vmem:[#allocation3 + $0x20] sm:$0xff] %vm925_vm4, %v3189_v29  ;;  %v3191_v57 = vpop.permute.xlu1 %3190 }
 0x4bb   : > { %3590 = vrot.lane.b32.xlu0 %v6978_v31, %s5338_s26  ;;  %3281 = vst.msk [vmem:[#allocation3 + $0x28] sm:$0xff] %vm925_vm4, %v3191_v57  ;;  %v3896_v31 = vld [vmem:[#allocation2 + $0xc1] sm:$0xff]  ;;  %v3903_v57 = vld [vmem:[#allocation2 + $0x111] sm:$0xff] }
 0x4bc   : > { %3782 = vrot.lane.b32.xlu1 %v6830_v2, %s5339_s4 }
 0x4bd   : > { %v3953_v51 = vpop.permute.xlu0 %3952 }
 0x4be   : > { %4046 = vst.msk [vmem:[#allocation3 + $0x10] sm:$0xff] %vm1698_vm9, %v3953_v51  ;;  %v3955_v33 = vpop.permute.xlu1 %3954 }
 0x4bf   : > { %3208 = vrot.lane.b32.xlu0 %v6890_v40, %s5336_s20  ;;  %4047 = vst.msk [vmem:[#allocation3 + $0x18] sm:$0xff] %vm1698_vm9, %v3955_v33  ;;  %v4094_v33 = vld [vmem:[#allocation2 + $0x10a] sm:$0xff] }
 0x4c0   : > { %3210 = vrot.lane.b32.xlu1 %v6830_v2, %s5336_s20 }
 0x4c1   : > { %v3381_v25 = vpop.permute.xlu0 %3380 }
 0x4c2   : > { %3472 = vst.msk [vmem:[#allocation3 + $0x20] sm:$0xff] %vm1118_vm6, %v3381_v25  ;;  %v3383_v39 = vpop.permute.xlu1 %3382 }
 0x4c3   : > { %3972 = vrot.lane.b32.xlu0 %v3896_v31, %s5340_s5  ;;  %3473 = vst.msk [vmem:[#allocation3 + $0x28] sm:$0xff] %vm1118_vm6, %v3383_v39 }
 0x4c4   : > { %3974 = vrot.lane.b32.xlu1 %v3897_v52, %s5340_s5 }
 0x4c5   : > { %v4145_v50 = vpop.permute.xlu0 %4144 }
 0x4c6   : > { %4238 = vst.msk [vmem:[#allocation3 + $0x10] sm:$0xff] %vm1891_vm10, %v4145_v50  ;;  %v4147_v40 = vpop.permute.xlu1 %4146 }
 0x4c7   : > { %3400 = vrot.lane.b32.xlu0 %v3896_v31, %s5337_s21  ;;  %4239 = vst.msk [vmem:[#allocation3 + $0x18] sm:$0xff] %vm1891_vm10, %v4147_v40  ;;  %v4095_v31 = vld [vmem:[#allocation2 + $0x112] sm:$0xff] }
 0x4c8   : > { %3402 = vrot.lane.b32.xlu1 %v3897_v52, %s5337_s21 }
 0x4c9   : > { %v3573_v2 = vpop.permute.xlu0 %3572 }
 0x4ca   : > { %3664 = vst.msk [vmem:[#allocation3 + $0x20] sm:$0xff] %vm1311_vm7, %v3573_v2  ;;  %v3765_v38 = vpop.permute.xlu1 %3764 }
 0x4cb   : > { %4164 = vrot.lane.b32.xlu0 %v6987_v42, %s5341_s8  ;;  %3856 = vst.msk [vmem:[#allocation3 + $0x20] sm:$0xff] %vm1505_vm8, %v3765_v38 }
 0x4cc   : > { %4166 = vrot.lane.b32.xlu1 %v4089_v36, %s5341_s8 }
 0x4cd   : > { %v3575_v16 = vpop.permute.xlu0 %3574  ;;  %v4270_v4 = vld [vmem:[#allocation3 + $0x10] sm:$0xff] }
 0x4ce   : > { %3665 = vst.msk [vmem:[#allocation3 + $0x28] sm:$0xff] %vm1311_vm7, %v3575_v16  ;;  %5245 = vmatprep.mubr.msk.f32.mxu1 %vm1961_vm11, %v4270_v4  ;;  %v3767_v21 = vpop.permute.xlu1 %3766  ;;  %v4271_v22 = vld [vmem:[#allocation3 + $0x18] sm:$0xff] }
 0x4cf   : > { %3592 = vrot.lane.b32.xlu0 %v3514_v14, %s5338_s26  ;;  %3857 = vst.msk [vmem:[#allocation3 + $0x28] sm:$0xff] %vm1505_vm8, %v3767_v21  ;;  %5246 = vmatmul.mubr.msk.f32.gmra.mrb[2].mxu1 %vm1961_vm11, %v4271_v22  ;;  %v3904_v14 = vld [vmem:[#allocation2 + $0x121] sm:$0xff]  ;;  %v3905_v22 = vld [vmem:[#allocation2 + $0x129] sm:$0xff] }
 0x4d0   : > { %3784 = vrot.lane.b32.xlu1 %v6892_v45, %s5339_s4 }
 0x4d1   : > { %v3193_v42 = vpop.permute.xlu0 %3192 }
 0x4d2   : > { %3282 = vst.msk [vmem:[#allocation3 + $0x30] sm:$0xff] %vm925_vm4, %v3193_v42  ;;  %v3195_v47 = vpop.permute.xlu1 %3194 }
 0x4d3   : > { %3594 = vrot.lane.b32.xlu0 %v4089_v36, %s5338_s26  ;;  %3283 = vst.msk [vmem:[#allocation3 + $0x38] sm:$0xff] %vm925_vm4, %v3195_v47  ;;  %v4096_v47 = vld [vmem:[#allocation2 + $0x122] sm:$0xff] }
 0x4d4   : > { %3786 = vrot.lane.b32.xlu1 %v6835_v43, %s5339_s4 }
 0x4d5   : > { %v3957_v12 = vpop.permute.xlu0 %3956 }
 0x4d6   : > { %4048 = vst.msk [vmem:[#allocation3 + $0x20] sm:$0xff] %vm1698_vm9, %v3957_v12  ;;  %v3959_v1 = vpop.permute.xlu1 %3958 }
 0x4d7   : > { %3212 = vrot.lane.b32.xlu0 %v6892_v45, %s5336_s20  ;;  %4049 = vst.msk [vmem:[#allocation3 + $0x28] sm:$0xff] %vm1698_vm9, %v3959_v1  ;;  %v4097_v1 = vld [vmem:[#allocation2 + $0x12a] sm:$0xff] }
 0x4d8   : > { %3214 = vrot.lane.b32.xlu1 %v6835_v43, %s5336_s20 }
 0x4d9   : > { %v3385_v58 = vpop.permute.xlu0 %3384 }
 0x4da   : > { %3474 = vst.msk [vmem:[#allocation3 + $0x30] sm:$0xff] %vm1118_vm6, %v3385_v58  ;;  %v3387_v27 = vpop.permute.xlu1 %3386 }
 0x4db   : > { %3976 = vrot.lane.b32.xlu0 %v3898_v0, %s5340_s5  ;;  %3475 = vst.msk [vmem:[#allocation3 + $0x38] sm:$0xff] %vm1118_vm6, %v3387_v27 }
 0x4dc   : > { %3978 = vrot.lane.b32.xlu1 %v3899_v32, %s5340_s5 }
 0x4dd   : > { %v4149_v41 = vpop.permute.xlu0 %4148 }
 0x4de   : > { %4240 = vst.msk [vmem:[#allocation3 + $0x20] sm:$0xff] %vm1891_vm10, %v4149_v41  ;;  %v4151_v45 = vpop.permute.xlu1 %4150  ;;  %v3714_v41 = vld [vmem:[#allocation2 + $0x138] sm:$0xff] }
 0x4df   : > { %3404 = vrot.lane.b32.xlu0 %v3898_v0, %s5337_s21  ;;  %4241 = vst.msk [vmem:[#allocation3 + $0x28] sm:$0xff] %vm1891_vm10, %v4151_v45 }
 0x4e0   : > { %3406 = vrot.lane.b32.xlu1 %v3899_v32, %s5337_s21 }
 0x4e1   : > { %v3577_v43 = vpop.permute.xlu0 %3576 }
 0x4e2   : > { %3666 = vst.msk [vmem:[#allocation3 + $0x30] sm:$0xff] %vm1311_vm7, %v3577_v43  ;;  %v3769_v17 = vpop.permute.xlu1 %3768 }
 0x4e3   : > { %4168 = vrot.lane.b32.xlu0 %v4090_v7, %s5341_s8  ;;  %3858 = vst.msk [vmem:[#allocation3 + $0x30] sm:$0xff] %vm1505_vm8, %v3769_v17 }
 0x4e4   : > { %4170 = vrot.lane.b32.xlu1 %v4091_v61, %s5341_s8 }
 0x4e5   : > { %v3579_v8 = vpop.permute.xlu0 %3578  ;;  %v4272_v13 = vld [vmem:[#allocation3 + $0x20] sm:$0xff] }
 0x4e6   : > { %3667 = vst.msk [vmem:[#allocation3 + $0x38] sm:$0xff] %vm1311_vm7, %v3579_v8  ;;  %5248 = vmatprep.mubr.msk.f32.mxu1 %vm1961_vm11, %v4272_v13  ;;  %v3771_v3 = vpop.permute.xlu1 %3770  ;;  %v4273_v18 = vld [vmem:[#allocation3 + $0x28] sm:$0xff] }
 0x4e7   : > { %3596 = vrot.lane.b32.xlu0 %v4090_v7, %s5338_s26  ;;  %3859 = vst.msk [vmem:[#allocation3 + $0x38] sm:$0xff] %vm1505_vm8, %v3771_v3  ;;  %5249 = vmatmul.mubr.msk.f32.gmra.mrb[4].mxu1 %vm1961_vm11, %v4273_v18  ;;  %v3715_v7 = vld [vmem:[#allocation2 + $0x140] sm:$0xff] }
 0x4e8   : > { %3788 = vrot.lane.b32.xlu1 %v6898_v5, %s5339_s4  ;;  %v3906_v13 = vld [vmem:[#allocation2 + $0x139] sm:$0xff]  ;;  %v3907_v18 = vld [vmem:[#allocation2 + $0x141] sm:$0xff] }
 0x4e9   : > { %v3197_v24 = vpop.permute.xlu0 %3196 }
 0x4ea   : > { %3284 = vst.msk [vmem:[#allocation3 + $0x40] sm:$0xff] %vm925_vm4, %v3197_v24  ;;  %v3199_v37 = vpop.permute.xlu1 %3198 }
 0x4eb   : > { %3598 = vrot.lane.b32.xlu0 %v4091_v61, %s5338_s26  ;;  %3285 = vst.msk [vmem:[#allocation3 + $0x48] sm:$0xff] %vm925_vm4, %v3199_v37 }
 0x4ec   : > { %3790 = vrot.lane.b32.xlu1 %v6843_v60, %s5339_s4 }
 0x4ed   : > { %v3961_v54 = vpop.permute.xlu0 %3960 }
 0x4ee   : > { %4050 = vst.msk [vmem:[#allocation3 + $0x30] sm:$0xff] %vm1698_vm9, %v3961_v54  ;;  %v3963_v53 = vpop.permute.xlu1 %3962 }
 0x4ef   : > { %3216 = vrot.lane.b32.xlu0 %v6898_v5, %s5336_s20  ;;  %4051 = vst.msk [vmem:[#allocation3 + $0x38] sm:$0xff] %vm1698_vm9, %v3963_v53  ;;  %v4098_v53 = vld [vmem:[#allocation2 + $0x13a] sm:$0xff] }
 0x4f0   : > { %3218 = vrot.lane.b32.xlu1 %v6843_v60, %s5336_s20 }
 0x4f1   : > { %v3389_v49 = vpop.permute.xlu0 %3388 }
 0x4f2   : > { %3476 = vst.msk [vmem:[#allocation3 + $0x40] sm:$0xff] %vm1118_vm6, %v3389_v49  ;;  %v3391_v10 = vpop.permute.xlu1 %3390 }
 0x4f3   : > { %3980 = vrot.lane.b32.xlu0 %v3900_v56, %s5340_s5  ;;  %3477 = vst.msk [vmem:[#allocation3 + $0x48] sm:$0xff] %vm1118_vm6, %v3391_v10 }
 0x4f4   : > { %3982 = vrot.lane.b32.xlu1 %v3901_v55, %s5340_s5 }
 0x4f5   : > { %v4153_v26 = vpop.permute.xlu0 %4152 }
 0x4f6   : > { %4242 = vst.msk [vmem:[#allocation3 + $0x30] sm:$0xff] %vm1891_vm10, %v4153_v26  ;;  %v4155_v5 = vpop.permute.xlu1 %4154 }
 0x4f7   : > { %3408 = vrot.lane.b32.xlu0 %v3900_v56, %s5337_s21  ;;  %4243 = vst.msk [vmem:[#allocation3 + $0x38] sm:$0xff] %vm1891_vm10, %v4155_v5  ;;  %v4099_v56 = vld [vmem:[#allocation2 + $0x142] sm:$0xff] }
 0x4f8   : > { %3410 = vrot.lane.b32.xlu1 %v3901_v55, %s5337_s21 }
 0x4f9   : > { %v3581_v60 = vpop.permute.xlu0 %3580 }
 0x4fa   : > { %3668 = vst.msk [vmem:[#allocation3 + $0x40] sm:$0xff] %vm1311_vm7, %v3581_v60  ;;  %v3773_v34 = vpop.permute.xlu1 %3772  ;;  %v3716_v60 = vld [vmem:[#allocation2 + $0x150] sm:$0xff] }
 0x4fb   : > { %4172 = vrot.lane.b32.xlu0 %v4092_v23, %s5341_s8  ;;  %3860 = vst.msk [vmem:[#allocation3 + $0x40] sm:$0xff] %vm1505_vm8, %v3773_v34 }
 0x4fc   : > { %4174 = vrot.lane.b32.xlu1 %v4093_v28, %s5341_s8 }
 0x4fd   : > { %v3583_v6 = vpop.permute.xlu0 %3582  ;;  %v4274_v44 = vld [vmem:[#allocation3 + $0x30] sm:$0xff] }
 0x4fe   : > { %3669 = vst.msk [vmem:[#allocation3 + $0x48] sm:$0xff] %vm1311_vm7, %v3583_v6  ;;  %5251 = vmatprep.mubr.msk.f32.mxu1 %vm1961_vm11, %v4274_v44  ;;  %v3775_v20 = vpop.permute.xlu1 %3774  ;;  %v4275_v9 = vld [vmem:[#allocation3 + $0x38] sm:$0xff] }
 0x4ff   : > { %3600 = vrot.lane.b32.xlu0 %v4092_v23, %s5338_s26  ;;  %3861 = vst.msk [vmem:[#allocation3 + $0x48] sm:$0xff] %vm1505_vm8, %v3775_v20  ;;  %5252 = vmatmul.mubr.msk.f32.gmra.mrb[6].mxu1 %vm1961_vm11, %v4275_v9  ;;  %v3908_v9 = vld [vmem:[#allocation2 + $0x151] sm:$0xff] }
 0x500   : > { %3792 = vrot.lane.b32.xlu1 %v6903_v46, %s5339_s4 }
 0x501   : > { %v3201_v63 = vpop.permute.xlu0 %3200 }
 0x502   : > { %3286 = vst.msk [vmem:[#allocation3 + $0x50] sm:$0xff] %vm925_vm4, %v3201_v63  ;;  %v3203_v30 = vpop.permute.xlu1 %3202 }
 0x503   : > { %3602 = vrot.lane.b32.xlu0 %v4093_v28, %s5338_s26  ;;  %3287 = vst.msk [vmem:[#allocation3 + $0x58] sm:$0xff] %vm925_vm4, %v3203_v30  ;;  %v3717_v28 = vld [vmem:[#allocation2 + $0x158] sm:$0xff] }
 0x504   : > { %3794 = vrot.lane.b32.xlu1 %v6851_v15, %s5339_s4  ;;  %v3909_v30 = vld [vmem:[#allocation2 + $0x159] sm:$0xff] }
 0x505   : > { %v3965_v59 = vpop.permute.xlu0 %3964 }
 0x506   : > { %4052 = vst.msk [vmem:[#allocation3 + $0x40] sm:$0xff] %vm1698_vm9, %v3965_v59  ;;  %v3967_v62 = vpop.permute.xlu1 %3966 }
 0x507   : > { %3220 = vrot.lane.b32.xlu0 %v6903_v46, %s5336_s20  ;;  %4053 = vst.msk [vmem:[#allocation3 + $0x48] sm:$0xff] %vm1698_vm9, %v3967_v62 }
 0x508   : > { %3222 = vrot.lane.b32.xlu1 %v6851_v15, %s5336_s20 }
 0x509   : > { %v3393_v19 = vpop.permute.xlu0 %3392 }
 0x50a   : > { %3478 = vst.msk [vmem:[#allocation3 + $0x50] sm:$0xff] %vm1118_vm6, %v3393_v19  ;;  %v3395_v29 = vpop.permute.xlu1 %3394 }
 0x50b   : > { %3984 = vrot.lane.b32.xlu0 %v3902_v11, %s5340_s5  ;;  %3479 = vst.msk [vmem:[#allocation3 + $0x58] sm:$0xff] %vm1118_vm6, %v3395_v29 }
 0x50c   : > { %3986 = vrot.lane.b32.xlu1 %v3903_v57, %s5340_s5 }
 0x50d   : > { %v4157_v51 = vpop.permute.xlu0 %4156 }
 0x50e   : > { %4244 = vst.msk [vmem:[#allocation3 + $0x40] sm:$0xff] %vm1891_vm10, %v4157_v51  ;;  %v4159_v46 = vpop.permute.xlu1 %4158 }
 0x50f   : > { %3412 = vrot.lane.b32.xlu0 %v3902_v11, %s5337_s21  ;;  %4245 = vst.msk [vmem:[#allocation3 + $0x48] sm:$0xff] %vm1891_vm10, %v4159_v46  ;;  %v4100_v11 = vld [vmem:[#allocation2 + $0x152] sm:$0xff] }
 0x510   : > { %3414 = vrot.lane.b32.xlu1 %v3903_v57, %s5337_s21  ;;  %v4101_v57 = vld [vmem:[#allocation2 + $0x15a] sm:$0xff] }
 0x511   : > { %v3585_v15 = vpop.permute.xlu0 %3584 }
 0x512   : > { %3670 = vst.msk [vmem:[#allocation3 + $0x50] sm:$0xff] %vm1311_vm7, %v3585_v15  ;;  %v3777_v25 = vpop.permute.xlu1 %3776 }
 0x513   : > { %4176 = vrot.lane.b32.xlu0 %v4094_v33, %s5341_s8  ;;  %3862 = vst.msk [vmem:[#allocation3 + $0x50] sm:$0xff] %vm1505_vm8, %v3777_v25  ;;  %v3718_v25 = vld [vmem:[#allocation2 + $0x168] sm:$0xff] }
 0x514   : > { %4178 = vrot.lane.b32.xlu1 %v4095_v31, %s5341_s8 }
 0x515   : > { %v3587_v39 = vpop.permute.xlu0 %3586  ;;  %v4276_v52 = vld [vmem:[#allocation3 + $0x40] sm:$0xff] }
 0x516   : > { %3671 = vst.msk [vmem:[#allocation3 + $0x58] sm:$0xff] %vm1311_vm7, %v3587_v39  ;;  %5254 = vmatprep.mubr.msk.f32.mxu1 %vm1961_vm11, %v4276_v52  ;;  %v3779_v50 = vpop.permute.xlu1 %3778  ;;  %v4277_v40 = vld [vmem:[#allocation3 + $0x48] sm:$0xff]  ;;  %v3719_v52 = vld [vmem:[#allocation2 + $0x170] sm:$0xff] }
 0x517   : > { %3604 = vrot.lane.b32.xlu0 %v4094_v33, %s5338_s26  ;;  %3863 = vst.msk [vmem:[#allocation3 + $0x58] sm:$0xff] %vm1505_vm8, %v3779_v50  ;;  %5255 = vmatmul.mubr.msk.f32.gmra.mrb[8].mxu1 %vm1961_vm11, %v4277_v40 }
 0x518   : > { %3796 = vrot.lane.b32.xlu1 %v6908_v35, %s5339_s4 }
 0x519   : > { %v3205_v2 = vpop.permute.xlu0 %3204 }
 0x51a   : > { %3288 = vst.msk [vmem:[#allocation3 + $0x60] sm:$0xff] %vm925_vm4, %v3205_v2  ;;  %v3207_v38 = vpop.permute.xlu1 %3206 }
 0x51b   : > { %3606 = vrot.lane.b32.xlu0 %v4095_v31, %s5338_s26  ;;  %3289 = vst.msk [vmem:[#allocation3 + $0x68] sm:$0xff] %vm925_vm4, %v3207_v38  ;;  %v3910_v38 = vld [vmem:[#allocation2 + $0x169] sm:$0xff] }
 0x51c   : > { %3798 = vrot.lane.b32.xlu1 %v6853_v48, %s5339_s4 }
 0x51d   : > { %v3969_v36 = vpop.permute.xlu0 %3968 }
 0x51e   : > { %4054 = vst.msk [vmem:[#allocation3 + $0x50] sm:$0xff] %vm1698_vm9, %v3969_v36  ;;  %v3971_v16 = vpop.permute.xlu1 %3970 }
 0x51f   : > { %3224 = vrot.lane.b32.xlu0 %v6908_v35, %s5336_s20  ;;  %4055 = vst.msk [vmem:[#allocation3 + $0x58] sm:$0xff] %vm1698_vm9, %v3971_v16  ;;  %v3911_v16 = vld [vmem:[#allocation2 + $0x171] sm:$0xff] }
 0x520   : > { %3226 = vrot.lane.b32.xlu1 %v6853_v48, %s5336_s20 }
 0x521   : > { %v3397_v4 = vpop.permute.xlu0 %3396 }
 0x522   : > { %3480 = vst.msk [vmem:[#allocation3 + $0x60] sm:$0xff] %vm1118_vm6, %v3397_v4  ;;  %v3399_v21 = vpop.permute.xlu1 %3398 }
 0x523   : > { %3988 = vrot.lane.b32.xlu0 %v3904_v14, %s5340_s5  ;;  %3481 = vst.msk [vmem:[#allocation3 + $0x68] sm:$0xff] %vm1118_vm6, %v3399_v21 }
 0x524   : > { %3990 = vrot.lane.b32.xlu1 %v3905_v22, %s5340_s5 }
 0x525   : > { %v4161_v42 = vpop.permute.xlu0 %4160 }
 0x526   : > { %4246 = vst.msk [vmem:[#allocation3 + $0x50] sm:$0xff] %vm1891_vm10, %v4161_v42  ;;  %v4163_v35 = vpop.permute.xlu1 %4162 }
 0x527   : > { %3416 = vrot.lane.b32.xlu0 %v3904_v14, %s5337_s21  ;;  %4247 = vst.msk [vmem:[#allocation3 + $0x58] sm:$0xff] %vm1891_vm10, %v4163_v35  ;;  %v4103_v35 = vld [vmem:[#allocation2 + $0x172] sm:$0xff] }
 0x528   : > { %3418 = vrot.lane.b32.xlu1 %v3905_v22, %s5337_s21  ;;  %v4102_v22 = vld [vmem:[#allocation2 + $0x16a] sm:$0xff] }
 0x529   : > { %v3589_v48 = vpop.permute.xlu0 %3588 }
 0x52a   : > { %3672 = vst.msk [vmem:[#allocation3 + $0x60] sm:$0xff] %vm1311_vm7, %v3589_v48  ;;  %v3781_v12 = vpop.permute.xlu1 %3780 }
 0x52b   : > { %4180 = vrot.lane.b32.xlu0 %v4096_v47, %s5341_s8  ;;  %3864 = vst.msk [vmem:[#allocation3 + $0x60] sm:$0xff] %vm1505_vm8, %v3781_v12 }
 0x52c   : > { %4182 = vrot.lane.b32.xlu1 %v4097_v1, %s5341_s8 }
 0x52d   : > { %v3591_v58 = vpop.permute.xlu0 %3590  ;;  %v4278_v0 = vld [vmem:[#allocation3 + $0x50] sm:$0xff] }
 0x52e   : > { %3673 = vst.msk [vmem:[#allocation3 + $0x68] sm:$0xff] %vm1311_vm7, %v3591_v58  ;;  %5257 = vmatprep.mubr.msk.f32.mxu1 %vm1961_vm11, %v4278_v0  ;;  %v3783_v27 = vpop.permute.xlu1 %3782  ;;  %v4279_v32 = vld [vmem:[#allocation3 + $0x58] sm:$0xff]  ;;  %v3720_v58 = vld [vmem:[#allocation2 + $0x180] sm:$0xff] }
 0x52f   : > { %3608 = vrot.lane.b32.xlu0 %v4096_v47, %s5338_s26  ;;  %3865 = vst.msk [vmem:[#allocation3 + $0x68] sm:$0xff] %vm1505_vm8, %v3783_v27  ;;  %5258 = vmatmul.mubr.msk.f32.gmra.mrb[10].mxu1 %vm1961_vm11, %v4279_v32 }
 0x530   : > { %3800 = vrot.lane.b32.xlu1 %v3714_v41, %s5339_s4 }
 0x531   : > { %v3209_v45 = vpop.permute.xlu0 %3208 }
 0x532   : > { %3290 = vst.msk [vmem:[#allocation3 + $0x70] sm:$0xff] %vm925_vm4, %v3209_v45  ;;  %v3211_v43 = vpop.permute.xlu1 %3210  ;;  %v3912_v45 = vld [vmem:[#allocation2 + $0x181] sm:$0xff] }
 0x533   : > { %3610 = vrot.lane.b32.xlu0 %v4097_v1, %s5338_s26  ;;  %3291 = vst.msk [vmem:[#allocation3 + $0x78] sm:$0xff] %vm925_vm4, %v3211_v43 }
 0x534   : > { %3802 = vrot.lane.b32.xlu1 %v3715_v7, %s5339_s4 }
 0x535   : > { %v3973_v17 = vpop.permute.xlu0 %3972 }
 0x536   : > { %4056 = vst.msk [vmem:[#allocation3 + $0x60] sm:$0xff] %vm1698_vm9, %v3973_v17  ;;  %v3975_v61 = vpop.permute.xlu1 %3974 }
 0x537   : > { %3228 = vrot.lane.b32.xlu0 %v3714_v41, %s5336_s20  ;;  %4057 = vst.msk [vmem:[#allocation3 + $0x68] sm:$0xff] %vm1698_vm9, %v3975_v61 }
 0x538   : > { %3230 = vrot.lane.b32.xlu1 %v3715_v7, %s5336_s20  ;;  %v3721_v7 = vld [vmem:[#allocation2 + $0x188] sm:$0xff] }
 0x539   : > { %v3401_v8 = vpop.permute.xlu0 %3400 }
 0x53a   : > { %3482 = vst.msk [vmem:[#allocation3 + $0x70] sm:$0xff] %vm1118_vm6, %v3401_v8  ;;  %v3403_v3 = vpop.permute.xlu1 %3402 }
 0x53b   : > { %3992 = vrot.lane.b32.xlu0 %v3906_v13, %s5340_s5  ;;  %3483 = vst.msk [vmem:[#allocation3 + $0x78] sm:$0xff] %vm1118_vm6, %v3403_v3 }
 0x53c   : > { %3994 = vrot.lane.b32.xlu1 %v3907_v18, %s5340_s5 }
 0x53d   : > { %v4165_v24 = vpop.permute.xlu0 %4164 }
 0x53e   : > { %4248 = vst.msk [vmem:[#allocation3 + $0x60] sm:$0xff] %vm1891_vm10, %v4165_v24  ;;  %v4167_v37 = vpop.permute.xlu1 %4166 }
 0x53f   : > { %3420 = vrot.lane.b32.xlu0 %v3906_v13, %s5337_s21  ;;  %4249 = vst.msk [vmem:[#allocation3 + $0x68] sm:$0xff] %vm1891_vm10, %v4167_v37  ;;  %v4104_v13 = vld [vmem:[#allocation2 + $0x182] sm:$0xff] }
 0x540   : > { %3422 = vrot.lane.b32.xlu1 %v3907_v18, %s5337_s21  ;;  %v3913_v18 = vld [vmem:[#allocation2 + $0x189] sm:$0xff] }
 0x541   : > { %v3593_v54 = vpop.permute.xlu0 %3592 }
 0x542   : > { %3674 = vst.msk [vmem:[#allocation3 + $0x70] sm:$0xff] %vm1311_vm7, %v3593_v54  ;;  %v3785_v49 = vpop.permute.xlu1 %3784 }
 0x543   : > { %4184 = vrot.lane.b32.xlu0 %v4098_v53, %s5341_s8  ;;  %3866 = vst.msk [vmem:[#allocation3 + $0x70] sm:$0xff] %vm1505_vm8, %v3785_v49 }
 0x544   : > { %4186 = vrot.lane.b32.xlu1 %v4099_v56, %s5341_s8 }
 0x545   : > { %v3595_v10 = vpop.permute.xlu0 %3594  ;;  %v4280_v55 = vld [vmem:[#allocation3 + $0x60] sm:$0xff] }
 0x546   : > { %3675 = vst.msk [vmem:[#allocation3 + $0x78] sm:$0xff] %vm1311_vm7, %v3595_v10  ;;  %5260 = vmatprep.mubr.msk.f32.mxu1 %vm1961_vm11, %v4280_v55  ;;  %v3787_v26 = vpop.permute.xlu1 %3786  ;;  %v4281_v5 = vld [vmem:[#allocation3 + $0x68] sm:$0xff] }
 0x547   : > { %3612 = vrot.lane.b32.xlu0 %v4098_v53, %s5338_s26  ;;  %3867 = vst.msk [vmem:[#allocation3 + $0x78] sm:$0xff] %vm1505_vm8, %v3787_v26  ;;  %5261 = vmatmul.mubr.msk.f32.gmra.mrb[12].mxu1 %vm1961_vm11, %v4281_v5 }
 0x548   : > { %3804 = vrot.lane.b32.xlu1 %v3716_v60, %s5339_s4 }
 0x549   : > { %v3213_v23 = vpop.permute.xlu0 %3212 }
 0x54a   : > { %3292 = vst.msk [vmem:[#allocation3 + $0x80] sm:$0xff] %vm925_vm4, %v3213_v23  ;;  %v3215_v34 = vpop.permute.xlu1 %3214 }
 0x54b   : > { %3614 = vrot.lane.b32.xlu0 %v4099_v56, %s5338_s26  ;;  %3293 = vst.msk [vmem:[#allocation3 + $0x88] sm:$0xff] %vm925_vm4, %v3215_v34 }
 0x54c   : > { %3806 = vrot.lane.b32.xlu1 %v3717_v28, %s5339_s4 }
 0x54d   : > { %v3977_v6 = vpop.permute.xlu0 %3976 }
 0x54e   : > { %4058 = vst.msk [vmem:[#allocation3 + $0x70] sm:$0xff] %vm1698_vm9, %v3977_v6  ;;  %v3979_v44 = vpop.permute.xlu1 %3978 }
 0x54f   : > { %3232 = vrot.lane.b32.xlu0 %v3716_v60, %s5336_s20  ;;  %4059 = vst.msk [vmem:[#allocation3 + $0x78] sm:$0xff] %vm1698_vm9, %v3979_v44  ;;  %v4105_v44 = vld [vmem:[#allocation2 + $0x18a] sm:$0xff] }
 0x550   : > { %3234 = vrot.lane.b32.xlu1 %v3717_v28, %s5336_s20 }
 0x551   : > { %v3405_v20 = vpop.permute.xlu0 %3404 }
 0x552   : > { %3484 = vst.msk [vmem:[#allocation3 + $0x80] sm:$0xff] %vm1118_vm6, %v3405_v20  ;;  %v3407_v63 = vpop.permute.xlu1 %3406 }
 0x553   : > { %3996 = vrot.lane.b32.xlu0 %v3908_v9, %s5340_s5  ;;  %3485 = vst.msk [vmem:[#allocation3 + $0x88] sm:$0xff] %vm1118_vm6, %v3407_v63  ;;  %v3723_v63 = vld [vmem:[#allocation2 + $0x1a0] sm:$0xff] }
 0x554   : > { %3998 = vrot.lane.b32.xlu1 %v3909_v30, %s5340_s5 }
 0x555   : > { %v4169_v59 = vpop.permute.xlu0 %4168 }
 0x556   : > { %4250 = vst.msk [vmem:[#allocation3 + $0x70] sm:$0xff] %vm1891_vm10, %v4169_v59  ;;  %v4171_v62 = vpop.permute.xlu1 %4170  ;;  %v3722_v59 = vld [vmem:[#allocation2 + $0x198] sm:$0xff] }
 0x557   : > { %3424 = vrot.lane.b32.xlu0 %v3908_v9, %s5337_s21  ;;  %4251 = vst.msk [vmem:[#allocation3 + $0x78] sm:$0xff] %vm1891_vm10, %v4171_v62 }
 0x558   : > { %3426 = vrot.lane.b32.xlu1 %v3909_v30, %s5337_s21 }
 0x559   : > { %v3597_v19 = vpop.permute.xlu0 %3596 }
 0x55a   : > { %3676 = vst.msk [vmem:[#allocation3 + $0x80] sm:$0xff] %vm1311_vm7, %v3597_v19  ;;  %v3789_v29 = vpop.permute.xlu1 %3788  ;;  %v3915_v19 = vld [vmem:[#allocation2 + $0x1a1] sm:$0xff] }
 0x55b   : > { %4188 = vrot.lane.b32.xlu0 %v4100_v11, %s5341_s8  ;;  %3868 = vst.msk [vmem:[#allocation3 + $0x80] sm:$0xff] %vm1505_vm8, %v3789_v29  ;;  %v3914_v29 = vld [vmem:[#allocation2 + $0x199] sm:$0xff] }
 0x55c   : > { %4190 = vrot.lane.b32.xlu1 %v4101_v57, %s5341_s8 }
 0x55d   : > { %v3599_v51 = vpop.permute.xlu0 %3598  ;;  %v4282_v46 = vld [vmem:[#allocation3 + $0x70] sm:$0xff] }
 0x55e   : > { %3677 = vst.msk [vmem:[#allocation3 + $0x88] sm:$0xff] %vm1311_vm7, %v3599_v51  ;;  %5263 = vmatprep.mubr.msk.f32.mxu1 %vm1961_vm11, %v4282_v46  ;;  %v3791_v15 = vpop.permute.xlu1 %3790  ;;  %v4283_v33 = vld [vmem:[#allocation3 + $0x78] sm:$0xff] }
 0x55f   : > { %3616 = vrot.lane.b32.xlu0 %v4100_v11, %s5338_s26  ;;  %3869 = vst.msk [vmem:[#allocation3 + $0x88] sm:$0xff] %vm1505_vm8, %v3791_v15  ;;  %5264 = vmatmul.mubr.msk.f32.gmra.mrb[14].mxu1 %vm1961_vm11, %v4283_v33  ;;  %v4107_v51 = vld [vmem:[#allocation2 + $0x1a2] sm:$0xff]  ;;  %v4106_v15 = vld [vmem:[#allocation2 + $0x19a] sm:$0xff] }
 0x560   : > { %3808 = vrot.lane.b32.xlu1 %v3718_v25, %s5339_s4 }
 0x561   : > { %v3217_v31 = vpop.permute.xlu0 %3216 }
 0x562   : > { %3294 = vst.msk [vmem:[#allocation3 + $0x90] sm:$0xff] %vm925_vm4, %v3217_v31  ;;  %v3219_v39 = vpop.permute.xlu1 %3218 }
 0x563   : > { %3618 = vrot.lane.b32.xlu0 %v4101_v57, %s5338_s26  ;;  %3295 = vst.msk [vmem:[#allocation3 + $0x98] sm:$0xff] %vm925_vm4, %v3219_v39 }
 0x564   : > { %3810 = vrot.lane.b32.xlu1 %v3719_v52, %s5339_s4 }
 0x565   : > { %v3981_v50 = vpop.permute.xlu0 %3980 }
 0x566   : > { %4060 = vst.msk [vmem:[#allocation3 + $0x80] sm:$0xff] %vm1698_vm9, %v3981_v50  ;;  %v3983_v40 = vpop.permute.xlu1 %3982 }
 0x567   : > { %3236 = vrot.lane.b32.xlu0 %v3718_v25, %s5336_s20  ;;  %4061 = vst.msk [vmem:[#allocation3 + $0x88] sm:$0xff] %vm1698_vm9, %v3983_v40 }
 0x568   : > { %3238 = vrot.lane.b32.xlu1 %v3719_v52, %s5336_s20 }
 0x569   : > { %v3409_v2 = vpop.permute.xlu0 %3408 }
 0x56a   : > { %3486 = vst.msk [vmem:[#allocation3 + $0x90] sm:$0xff] %vm1118_vm6, %v3409_v2  ;;  %v3411_v36 = vpop.permute.xlu1 %3410 }
 0x56b   : > { %4000 = vrot.lane.b32.xlu0 %v3910_v38, %s5340_s5  ;;  %3487 = vst.msk [vmem:[#allocation3 + $0x98] sm:$0xff] %vm1118_vm6, %v3411_v36 }
 0x56c   : > { %4002 = vrot.lane.b32.xlu1 %v3911_v16, %s5340_s5 }
 0x56d   : > { %v4173_v4 = vpop.permute.xlu0 %4172 }
 0x56e   : > { %4252 = vst.msk [vmem:[#allocation3 + $0x80] sm:$0xff] %vm1891_vm10, %v4173_v4  ;;  %v4175_v14 = vpop.permute.xlu1 %4174 }
 0x56f   : > { %3428 = vrot.lane.b32.xlu0 %v3910_v38, %s5337_s21  ;;  %4253 = vst.msk [vmem:[#allocation3 + $0x88] sm:$0xff] %vm1891_vm10, %v4175_v14 }
 0x570   : > { %3430 = vrot.lane.b32.xlu1 %v3911_v16, %s5337_s21 }
 0x571   : > { %v3601_v21 = vpop.permute.xlu0 %3600 }
 0x572   : > { %3678 = vst.msk [vmem:[#allocation3 + $0x90] sm:$0xff] %vm1311_vm7, %v3601_v21  ;;  %v3793_v42 = vpop.permute.xlu1 %3792 }
 0x573   : > { %4192 = vrot.lane.b32.xlu0 %v4102_v22, %s5341_s8  ;;  %3870 = vst.msk [vmem:[#allocation3 + $0x90] sm:$0xff] %vm1505_vm8, %v3793_v42 }
 0x574   : > { %4194 = vrot.lane.b32.xlu1 %v4103_v35, %s5341_s8 }
 0x575   : > { %v3603_v48 = vpop.permute.xlu0 %3602  ;;  %v4284_v47 = vld [vmem:[#allocation3 + $0x80] sm:$0xff] }
 0x576   : > { %3679 = vst.msk [vmem:[#allocation3 + $0x98] sm:$0xff] %vm1311_vm7, %v3603_v48  ;;  %5266 = vmatprep.mubr.msk.f32.mxu1 %vm1961_vm11, %v4284_v47  ;;  %v3795_v12 = vpop.permute.xlu1 %3794  ;;  %v4285_v1 = vld [vmem:[#allocation3 + $0x88] sm:$0xff] }
 0x577   : > { %3620 = vrot.lane.b32.xlu0 %v4102_v22, %s5338_s26  ;;  %3871 = vst.msk [vmem:[#allocation3 + $0x98] sm:$0xff] %vm1505_vm8, %v3795_v12  ;;  %5267 = vmatmul.mubr.msk.f32.gmra.mrb[16].mxu1 %vm1961_vm11, %v4285_v1 }
 0x578   : > { %3812 = vrot.lane.b32.xlu1 %v3720_v58, %s5339_s4 }
 0x579   : > { %v3221_v0 = vpop.permute.xlu0 %3220 }
 0x57a   : > { %3296 = vst.msk [vmem:[#allocation3 + $0xa0] sm:$0xff] %vm925_vm4, %v3221_v0  ;;  %v3223_v27 = vpop.permute.xlu1 %3222 }
 0x57b   : > { %3622 = vrot.lane.b32.xlu0 %v4103_v35, %s5338_s26  ;;  %3297 = vst.msk [vmem:[#allocation3 + $0xa8] sm:$0xff] %vm925_vm4, %v3223_v27 }
 0x57c   : > { %3240 = vrot.lane.b32.xlu1 %v3720_v58, %s5336_s20 }
 0x57d   : > { %v3985_v32 = vpop.permute.xlu0 %3984 }
 0x57e   : > { %4062 = vst.msk [vmem:[#allocation3 + $0x90] sm:$0xff] %vm1698_vm9, %v3985_v32  ;;  %v3987_v41 = vpop.permute.xlu1 %3986 }
 0x57f   : > { %3050 = vrot.lane.b32.xlu0 %v4103_v35, %s5335_s19  ;;  %4063 = vst.msk [vmem:[#allocation3 + $0x98] sm:$0xff] %vm1698_vm9, %v3987_v41 }
 0x580   : > { %4004 = vrot.lane.b32.xlu1 %v3912_v45, %s5340_s5 }
 0x581   : > { %v3413_v43 = vpop.permute.xlu0 %3412 }
 0x582   : > { %3488 = vst.msk [vmem:[#allocation3 + $0xa0] sm:$0xff] %vm1118_vm6, %v3413_v43  ;;  %v3415_v17 = vpop.permute.xlu1 %3414 }
 0x583   : > { %3814 = vrot.lane.b32.xlu0 %v3721_v7, %s5339_s4  ;;  %3489 = vst.msk [vmem:[#allocation3 + $0xa8] sm:$0xff] %vm1118_vm6, %v3415_v17 }
 0x584   : > { %3432 = vrot.lane.b32.xlu1 %v3912_v45, %s5337_s21 }
 0x585   : > { %v4177_v61 = vpop.permute.xlu0 %4176 }
 0x586   : > { %4254 = vst.msk [vmem:[#allocation3 + $0x90] sm:$0xff] %vm1891_vm10, %v4177_v61  ;;  %v4179_v8 = vpop.permute.xlu1 %4178 }
 0x587   : > { %3242 = vrot.lane.b32.xlu0 %v3721_v7, %s5336_s20  ;;  %4255 = vst.msk [vmem:[#allocation3 + $0x98] sm:$0xff] %vm1891_vm10, %v4179_v8 }
 0x588   : > { %4196 = vrot.lane.b32.xlu1 %v4104_v13, %s5341_s8 }
 0x589   : > { %v3605_v3 = vpop.permute.xlu0 %3604 }
 0x58a   : > { %3680 = vst.msk [vmem:[#allocation3 + $0xa0] sm:$0xff] %vm1311_vm7, %v3605_v3  ;;  %v7505_v24 = vpop.f32.mrb[0].mxu1  ;;  %v3797_v37 = vpop.permute.xlu1 %3796 }
 0x58b   : > { %4006 = vrot.lane.b32.xlu0 %v3913_v18, %s5340_s5  ;;  %v4630_v54 = vsel %vm204_vm0, %v7505_v24, 0.0  ;;  %v4700_v53 = vmul.f32 %v7505_v24, %v7505_v24  ;;  %3872 = vst.msk [vmem:[#allocation3 + $0xa0] sm:$0xff] %vm1505_vm8, %v3797_v37  ;;  %v7513_v49 = vpop.f32.mrb[1].mxu1 }
 0x58c   : > { %v4629_v56 = vsel %vm204_vm0, %v7513_v49, 0.0  ;;  %v4699_v10 = vmul.f32 %v7513_v49, %v7513_v49  ;;  %3624 = vrot.lane.b32.xlu1 %v4104_v13, %s5338_s26 }
 0x58d   : > { %v3607_v55 = vpop.permute.xlu0 %3606  ;;  %v4732_v26 = vsel %vm204_vm0, %v4700_v53, 0.0  ;;  %v4631_v5 = vadd.f32 %v4630_v54, %v4629_v56  ;;  %v4286_v60 = vld [vmem:[#allocation3 + $0x90] sm:$0xff] }
 0x58e   : > { %3681 = vst.msk [vmem:[#allocation3 + $0xa8] sm:$0xff] %vm1311_vm7, %v3607_v55  ;;  %v4731_v23 = vsel %vm204_vm0, %v4699_v10, 0.0  ;;  %5269 = vmatprep.mubr.msk.f32.mxu1 %vm1961_vm11, %v4286_v60  ;;  %v3799_v34 = vpop.permute.xlu1 %3798  ;;  %v4287_v28 = vld [vmem:[#allocation3 + $0x98] sm:$0xff] }
 0x58f   : > { %v4733_v6 = vadd.f32 %v4732_v26, %v4731_v23  ;;  %3434 = vrot.lane.b32.xlu0 %v3913_v18, %s5337_s21  ;;  %3873 = vst.msk [vmem:[#allocation3 + $0xa8] sm:$0xff] %vm1505_vm8, %v3799_v34  ;;  %5270 = vmatmul.mubr.msk.f32.gmra.mrb[18].mxu1 %vm1961_vm11, %v4287_v28  ;;  %s7941_s21 = scalar_lea.vmem %s8059_s3, %s5098_s14 }
 0x590   : > { %3626 = vrot.lane.b32.xlu1 %v4105_v44, %s5338_s26 }
 0x591   : > { %v3225_v20 = vpop.permute.xlu0 %3224 }
 0x592   : > { %3298 = vst.msk [vmem:[#allocation3 + $0xb0] sm:$0xff] %vm925_vm4, %v3225_v20  ;;  %v3227_v9 = vpop.permute.xlu1 %3226 }
 0x593   : > { %4198 = vrot.lane.b32.xlu0 %v4105_v44, %s5341_s8  ;;  %3299 = vst.msk [vmem:[#allocation3 + $0xb8] sm:$0xff] %vm925_vm4, %v3227_v9 }
 0x594   : > { %3818 = vrot.lane.b32.xlu1 %v3723_v63, %s5339_s4 }
 0x595   : > { %v3989_v30 = vpop.permute.xlu0 %3988 }
 0x596   : > { %4064 = vst.msk [vmem:[#allocation3 + $0xa0] sm:$0xff] %vm1698_vm9, %v3989_v30  ;;  %v3991_v62 = vpop.permute.xlu1 %3990 }
 0x597   : > { %3816 = vrot.lane.b32.xlu0 %v3722_v59, %s5339_s4  ;;  %4065 = vst.msk [vmem:[#allocation3 + $0xa8] sm:$0xff] %vm1698_vm9, %v3991_v62 }
 0x598   : > { %4010 = vrot.lane.b32.xlu1 %v3915_v19, %s5340_s5 }
 0x599   : > { %v3417_v11 = vpop.permute.xlu0 %3416 }
 0x59a   : > { %3490 = vst.msk [vmem:[#allocation3 + $0xb0] sm:$0xff] %vm1118_vm6, %v3417_v11  ;;  %v3419_v57 = vpop.permute.xlu1 %3418 }
 0x59b   : > { %4008 = vrot.lane.b32.xlu0 %v3914_v29, %s5340_s5  ;;  %3491 = vst.msk [vmem:[#allocation3 + $0xb8] sm:$0xff] %vm1118_vm6, %v3419_v57 }
 0x59c   : > { %4202 = vrot.lane.b32.xlu1 %v4107_v51, %s5341_s8 }
 0x59d   : > { %v4181_v46 = vpop.permute.xlu0 %4180 }
 0x59e   : > { %4256 = vst.msk [vmem:[#allocation3 + $0xa0] sm:$0xff] %vm1891_vm10, %v4181_v46  ;;  %v4183_v33 = vpop.permute.xlu1 %4182 }
 0x59f   : > { %4200 = vrot.lane.b32.xlu0 %v4106_v15, %s5341_s8  ;;  %4257 = vst.msk [vmem:[#allocation3 + $0xa8] sm:$0xff] %vm1891_vm10, %v4183_v33 }
 0x5a1   : > { %v3609_v25 = vpop.permute.xlu0 %3608 }
 0x5a2   : > { %3682 = vst.msk [vmem:[#allocation3 + $0xb0] sm:$0xff] %vm1311_vm7, %v3609_v25  ;;  %v3801_v31 = vpop.permute.xlu1 %3800  ;;  %v7544_v39 = vpop.f32.mrb[2].mxu1 }
 0x5a3   : > { %3874 = vst.msk [vmem:[#allocation3 + $0xb0] sm:$0xff] %vm1505_vm8, %v3801_v31  ;;  %v7547_v52 = vpop.f32.mrb[3].mxu1  ;;  %v4702_v50 = vmul.f32 %v7544_v39, %v7544_v39  ;;  %v4634_v4 = vsel %vm204_vm0, %v7544_v39, 0.0 }
 0x5a4   : > { %v4632_v40 = vsel %vm204_vm0, %v7547_v52, 0.0  ;;  %v4701_v2 = vmul.f32 %v7547_v52, %v7547_v52 }
 0x5a5   : > { %v3611_v38 = vpop.permute.xlu0 %3610  ;;  %v4633_v36 = vadd.f32 %v4632_v40, %v4631_v5  ;;  %v4288_v16 = vld [vmem:[#allocation3 + $0xa0] sm:$0xff]  ;;  %v4736_v48 = vsel %vm204_vm0, %v4702_v50, 0.0 }
 0x5a6   : > { %3683 = vst.msk [vmem:[#allocation3 + $0xb8] sm:$0xff] %vm1311_vm7, %v3611_v38  ;;  %v4734_v14 = vsel %vm204_vm0, %v4701_v2, 0.0  ;;  %5272 = vmatprep.mubr.msk.f32.mxu1 %vm1961_vm11, %v4288_v16  ;;  %v3803_v21 = vpop.permute.xlu1 %3802  ;;  %v4289_v22 = vld [vmem:[#allocation3 + $0xa8] sm:$0xff] }
 0x5a7   : > { %v4735_v42 = vadd.f32 %v4734_v14, %v4733_v6  ;;  %3875 = vst.msk [vmem:[#allocation3 + $0xb8] sm:$0xff] %vm1505_vm8, %v3803_v21  ;;  %5273 = vmatmul.mubr.msk.f32.gmra.mrb[20].mxu1 %vm1961_vm11, %v4289_v22  ;;  %v4635_v35 = vadd.f32 %v4634_v4, %v4633_v36 }
 0x5a9   : > { %v3229_v47 = vpop.permute.xlu0 %3228  ;;  %v4737_v12 = vadd.f32 %v4736_v48, %v4735_v42 }
 0x5aa   : > { %3300 = vst.msk [vmem:[#allocation3 + $0xc0] sm:$0xff] %vm925_vm4, %v3229_v47  ;;  %v3231_v1 = vpop.permute.xlu1 %3230 }
 0x5ab   : > { %3301 = vst.msk [vmem:[#allocation3 + $0xc8] sm:$0xff] %vm925_vm4, %v3231_v1 }
 0x5ad   : > { %v3993_v58 = vpop.permute.xlu0 %3992 }
 0x5ae   : > { %4066 = vst.msk [vmem:[#allocation3 + $0xb0] sm:$0xff] %vm1698_vm9, %v3993_v58  ;;  %v3995_v0 = vpop.permute.xlu1 %3994 }
 0x5af   : > { %4067 = vst.msk [vmem:[#allocation3 + $0xb8] sm:$0xff] %vm1698_vm9, %v3995_v0 }
 0x5b1   : > { %v3421_v27 = vpop.permute.xlu0 %3420 }
 0x5b2   : > { %3492 = vst.msk [vmem:[#allocation3 + $0xc0] sm:$0xff] %vm1118_vm6, %v3421_v27  ;;  %v3423_v32 = vpop.permute.xlu1 %3422 }
 0x5b3   : > { %3493 = vst.msk [vmem:[#allocation3 + $0xc8] sm:$0xff] %vm1118_vm6, %v3423_v32 }
 0x5b5   : > { %v4185_v41 = vpop.permute.xlu0 %4184 }
 0x5b6   : > { %4258 = vst.msk [vmem:[#allocation3 + $0xb0] sm:$0xff] %vm1891_vm10, %v4185_v41  ;;  %v4187_v45 = vpop.permute.xlu1 %4186 }
 0x5b7   : > { %4259 = vst.msk [vmem:[#allocation3 + $0xb8] sm:$0xff] %vm1891_vm10, %v4187_v45 }
 0x5b9   : > { %v3613_v43 = vpop.permute.xlu0 %3612 }
 0x5ba   : > { %3684 = vst.msk [vmem:[#allocation3 + $0xc0] sm:$0xff] %vm1311_vm7, %v3613_v43  ;;  %v3805_v7 = vpop.permute.xlu1 %3804  ;;  %v7572_v17 = vpop.f32.mrb[4].mxu1 }
 0x5bb   : > { %3876 = vst.msk [vmem:[#allocation3 + $0xc0] sm:$0xff] %vm1505_vm8, %v3805_v7  ;;  %v7575_v61 = vpop.f32.mrb[5].mxu1  ;;  %v4704_v8 = vmul.f32 %v7572_v17, %v7572_v17  ;;  %v4638_v53 = vsel %vm204_vm0, %v7572_v17, 0.0 }
 0x5bc   : > { %v4636_v13 = vsel %vm204_vm0, %v7575_v61, 0.0  ;;  %v4703_v3 = vmul.f32 %v7575_v61, %v7575_v61 }
 0x5bd   : > { %v3615_v18 = vpop.permute.xlu0 %3614  ;;  %v4637_v37 = vadd.f32 %v4636_v13, %v4635_v35  ;;  %v4290_v54 = vld [vmem:[#allocation3 + $0xb0] sm:$0xff]  ;;  %v4740_v60 = vsel %vm204_vm0, %v4704_v8, 0.0 }
 0x5be   : > { %3685 = vst.msk [vmem:[#allocation3 + $0xc8] sm:$0xff] %vm1311_vm7, %v3615_v18  ;;  %v4738_v56 = vsel %vm204_vm0, %v4703_v3, 0.0  ;;  %5275 = vmatprep.mubr.msk.f32.mxu1 %vm1961_vm11, %v4290_v54  ;;  %v3807_v10 = vpop.permute.xlu1 %3806  ;;  %v4291_v55 = vld [vmem:[#allocation3 + $0xb8] sm:$0xff] }
 0x5bf   : > { %v4739_v26 = vadd.f32 %v4738_v56, %v4737_v12  ;;  %3877 = vst.msk [vmem:[#allocation3 + $0xc8] sm:$0xff] %vm1505_vm8, %v3807_v10  ;;  %5276 = vmatmul.mubr.msk.f32.gmra.mrb[22].mxu1 %vm1961_vm11, %v4291_v55  ;;  %v4639_v5 = vadd.f32 %v4638_v53, %v4637_v37 }
 0x5c1   : > { %v3233_v23 = vpop.permute.xlu0 %3232  ;;  %v4741_v34 = vadd.f32 %v4740_v60, %v4739_v26 }
 0x5c2   : > { %3302 = vst.msk [vmem:[#allocation3 + $0xd0] sm:$0xff] %vm925_vm4, %v3233_v23  ;;  %v3235_v28 = vpop.permute.xlu1 %3234 }
 0x5c3   : > { %3303 = vst.msk [vmem:[#allocation3 + $0xd8] sm:$0xff] %vm925_vm4, %v3235_v28 }
 0x5c5   : > { %v3997_v6 = vpop.permute.xlu0 %3996 }
 0x5c6   : > { %4068 = vst.msk [vmem:[#allocation3 + $0xc0] sm:$0xff] %vm1698_vm9, %v3997_v6  ;;  %v3999_v44 = vpop.permute.xlu1 %3998 }
 0x5c7   : > { %4069 = vst.msk [vmem:[#allocation3 + $0xc8] sm:$0xff] %vm1698_vm9, %v3999_v44 }
 0x5c9   : > { %v3425_v20 = vpop.permute.xlu0 %3424 }
 0x5ca   : > { %3494 = vst.msk [vmem:[#allocation3 + $0xd0] sm:$0xff] %vm1118_vm6, %v3425_v20  ;;  %v3427_v9 = vpop.permute.xlu1 %3426 }
 0x5cb   : > { %3495 = vst.msk [vmem:[#allocation3 + $0xd8] sm:$0xff] %vm1118_vm6, %v3427_v9 }
 0x5cd   : > { %v4189_v63 = vpop.permute.xlu0 %4188 }
 0x5ce   : > { %4260 = vst.msk [vmem:[#allocation3 + $0xc0] sm:$0xff] %vm1891_vm10, %v4189_v63  ;;  %v4191_v30 = vpop.permute.xlu1 %4190 }
 0x5cf   : > { %4261 = vst.msk [vmem:[#allocation3 + $0xc8] sm:$0xff] %vm1891_vm10, %v4191_v30 }
 0x5d1   : > { %v3617_v59 = vpop.permute.xlu0 %3616 }
 0x5d2   : > { %3686 = vst.msk [vmem:[#allocation3 + $0xd0] sm:$0xff] %vm1311_vm7, %v3617_v59  ;;  %v3809_v62 = vpop.permute.xlu1 %3808  ;;  %v7600_v19 = vpop.f32.mrb[6].mxu1 }
 0x5d3   : > { %3878 = vst.msk [vmem:[#allocation3 + $0xd0] sm:$0xff] %vm1505_vm8, %v3809_v62  ;;  %v7603_v11 = vpop.f32.mrb[7].mxu1  ;;  %v4706_v29 = vmul.f32 %v7600_v19, %v7600_v19  ;;  %v4642_v25 = vsel %vm204_vm0, %v7600_v19, 0.0 }
 0x5d4   : > { %v4640_v57 = vsel %vm204_vm0, %v7603_v11, 0.0  ;;  %v4705_v51 = vmul.f32 %v7603_v11, %v7603_v11 }
 0x5d5   : > { %v3619_v46 = vpop.permute.xlu0 %3618  ;;  %v4641_v15 = vadd.f32 %v4640_v57, %v4639_v5  ;;  %v4292_v33 = vld [vmem:[#allocation3 + $0xc0] sm:$0xff]  ;;  %v4744_v36 = vsel %vm204_vm0, %v4706_v29, 0.0 }
 0x5d6   : > { %3687 = vst.msk [vmem:[#allocation3 + $0xd8] sm:$0xff] %vm1311_vm7, %v3619_v46  ;;  %v4742_v31 = vsel %vm204_vm0, %v4705_v51, 0.0  ;;  %5278 = vmatprep.mubr.msk.f32.mxu1 %vm1961_vm11, %v4292_v33  ;;  %v3811_v50 = vpop.permute.xlu1 %3810  ;;  %v4293_v40 = vld [vmem:[#allocation3 + $0xc8] sm:$0xff] }
 0x5d7   : > { %v4743_v2 = vadd.f32 %v4742_v31, %v4741_v34  ;;  %3879 = vst.msk [vmem:[#allocation3 + $0xd8] sm:$0xff] %vm1505_vm8, %v3811_v50  ;;  %5279 = vmatmul.mubr.msk.f32.gmra.mrb[24].mxu1 %vm1961_vm11, %v4293_v40  ;;  %v4643_v38 = vadd.f32 %v4642_v25, %v4641_v15 }
 0x5d9   : > { %v3237_v16 = vpop.permute.xlu0 %3236  ;;  %v4745_v4 = vadd.f32 %v4744_v36, %v4743_v2 }
 0x5da   : > { %3304 = vst.msk [vmem:[#allocation3 + $0xe0] sm:$0xff] %vm925_vm4, %v3237_v16  ;;  %v3239_v14 = vpop.permute.xlu1 %3238 }
 0x5db   : > { %3305 = vst.msk [vmem:[#allocation3 + $0xe8] sm:$0xff] %vm925_vm4, %v3239_v14 }
 0x5dd   : > { %v4001_v21 = vpop.permute.xlu0 %4000 }
 0x5de   : > { %4070 = vst.msk [vmem:[#allocation3 + $0xd0] sm:$0xff] %vm1698_vm9, %v4001_v21  ;;  %v4003_v22 = vpop.permute.xlu1 %4002 }
 0x5df   : > { %4071 = vst.msk [vmem:[#allocation3 + $0xd8] sm:$0xff] %vm1698_vm9, %v4003_v22 }
 0x5e1   : > { %v3429_v42 = vpop.permute.xlu0 %3428 }
 0x5e2   : > { %3496 = vst.msk [vmem:[#allocation3 + $0xe0] sm:$0xff] %vm1118_vm6, %v3429_v42  ;;  %v3431_v35 = vpop.permute.xlu1 %3430 }
 0x5e3   : > { %3497 = vst.msk [vmem:[#allocation3 + $0xe8] sm:$0xff] %vm1118_vm6, %v3431_v35 }
 0x5e5   : > { %v4193_v48 = vpop.permute.xlu0 %4192 }
 0x5e6   : > { %4262 = vst.msk [vmem:[#allocation3 + $0xd0] sm:$0xff] %vm1891_vm10, %v4193_v48  ;;  %v4195_v47 = vpop.permute.xlu1 %4194 }
 0x5e7   : > { %4263 = vst.msk [vmem:[#allocation3 + $0xd8] sm:$0xff] %vm1891_vm10, %v4195_v47 }
 0x5e9   : > { %v3621_v12 = vpop.permute.xlu0 %3620 }
 0x5ea   : > { %3688 = vst.msk [vmem:[#allocation3 + $0xe0] sm:$0xff] %vm1311_vm7, %v3621_v12  ;;  %v3813_v1 = vpop.permute.xlu1 %3812  ;;  %v7628_v58 = vpop.f32.mrb[8].mxu1 }
 0x5eb   : > { %3880 = vst.msk [vmem:[#allocation3 + $0xe0] sm:$0xff] %vm1505_vm8, %v3813_v1  ;;  %v7631_v0 = vpop.f32.mrb[9].mxu1  ;;  %v4708_v27 = vmul.f32 %v7628_v58, %v7628_v58  ;;  %v4646_v8 = vsel %vm204_vm0, %v7628_v58, 0.0 }
 0x5ec   : > { %v4644_v32 = vsel %vm204_vm0, %v7631_v0, 0.0  ;;  %v4707_v41 = vmul.f32 %v7631_v0, %v7631_v0 }
 0x5ed   : > { %v3623_v45 = vpop.permute.xlu0 %3622  ;;  %v4645_v43 = vadd.f32 %v4644_v32, %v4643_v38  ;;  %v4294_v7 = vld [vmem:[#allocation3 + $0xd0] sm:$0xff]  ;;  %v4748_v53 = vsel %vm204_vm0, %v4708_v27, 0.0 }
 0x5ee   : > { %3689 = vst.msk [vmem:[#allocation3 + $0xe8] sm:$0xff] %vm1311_vm7, %v3623_v45  ;;  %v4746_v13 = vsel %vm204_vm0, %v4707_v41, 0.0  ;;  %5281 = vmatprep.mubr.msk.f32.mxu1 %vm1961_vm11, %v4294_v7  ;;  %v3241_v3 = vpop.permute.xlu1 %3240  ;;  %v4295_v18 = vld [vmem:[#allocation3 + $0xd8] sm:$0xff] }
 0x5ef   : > { %v4747_v37 = vadd.f32 %v4746_v13, %v4745_v4  ;;  %3306 = vst.msk [vmem:[#allocation3 + $0xf0] sm:$0xff] %vm925_vm4, %v3241_v3  ;;  %5282 = vmatmul.mubr.msk.f32.gmra.mrb[26].mxu1 %vm1961_vm11, %v4295_v18  ;;  %v4647_v54 = vadd.f32 %v4646_v8, %v4645_v43 }
 0x5f1   : > { %v3051_v56 = vpop.permute.xlu0 %3050  ;;  %v4749_v10 = vadd.f32 %v4748_v53, %v4747_v37 }
 0x5f2   : > { %3115 = vst.msk [vmem:[#allocation3 + $0xf8] sm:$0xff] %vm732_vm3, %v3051_v56  ;;  %v4005_v55 = vpop.permute.xlu1 %4004 }
 0x5f3   : > { %4072 = vst.msk [vmem:[#allocation3 + $0xe0] sm:$0xff] %vm1698_vm9, %v4005_v55 }
 0x5f5   : > { %v3815_v26 = vpop.permute.xlu0 %3814 }
 0x5f6   : > { %3881 = vst.msk [vmem:[#allocation3 + $0xe8] sm:$0xff] %vm1505_vm8, %v3815_v26  ;;  %v3433_v5 = vpop.permute.xlu1 %3432 }
 0x5f7   : > { %3498 = vst.msk [vmem:[#allocation3 + $0xf0] sm:$0xff] %vm1118_vm6, %v3433_v5 }
 0x5f9   : > { %v3243_v60 = vpop.permute.xlu0 %3242 }
 0x5fa   : > { %3307 = vst.msk [vmem:[#allocation3 + $0xf8] sm:$0xff] %vm925_vm4, %v3243_v60  ;;  %v4197_v23 = vpop.permute.xlu1 %4196 }
 0x5fb   : > { %4264 = vst.msk [vmem:[#allocation3 + $0xe0] sm:$0xff] %vm1891_vm10, %v4197_v23 }
 0x5fd   : > { %v4007_v34 = vpop.permute.xlu0 %4006 }
 0x5fe   : > { %4073 = vst.msk [vmem:[#allocation3 + $0xe8] sm:$0xff] %vm1698_vm9, %v4007_v34  ;;  %v3625_v28 = vpop.permute.xlu1 %3624 }
 0x5ff   : > { %3690 = vst.msk [vmem:[#allocation3 + $0xf0] sm:$0xff] %vm1311_vm7, %v3625_v28 }
 0x601   : > { %v3435_v6 = vpop.permute.xlu0 %3434 }
 0x602   : > { %3499 = vst.msk [vmem:[#allocation3 + $0xf8] sm:$0xff] %vm1118_vm6, %v3435_v6  ;;  %v3627_v44 = vpop.permute.xlu1 %3626  ;;  %v7656_v20 = vpop.f32.mrb[10].mxu1  ;;  %v4296_v9 = vld [vmem:[#allocation3 + $0xe0] sm:$0xff] }
 0x603   : > { %3691 = vst.msk [vmem:[#allocation3 + $0xf8] sm:$0xff] %vm1311_vm7, %v3627_v44  ;;  %v7659_v63 = vpop.f32.mrb[11].mxu1  ;;  %5284 = vmatprep.mubr.msk.f32.mxu1 %vm1961_vm11, %v4296_v9  ;;  %v4710_v30 = vmul.f32 %v7656_v20, %v7656_v20  ;;  %v4650_v51 = vsel %vm204_vm0, %v7656_v20, 0.0 }
 0x604   : > { %v4648_v59 = vsel %vm204_vm0, %v7659_v63, 0.0  ;;  %v4709_v62 = vmul.f32 %v7659_v63, %v7659_v63 }
 0x605   : > { %v4199_v29 = vpop.permute.xlu0 %4198  ;;  %v4649_v57 = vadd.f32 %v4648_v59, %v4647_v54  ;;  %v4752_v31 = vsel %vm204_vm0, %v4710_v30, 0.0 }
 0x606   : > { %4265 = vst.msk [vmem:[#allocation3 + $0xe8] sm:$0xff] %vm1891_vm10, %v4199_v29  ;;  %v4750_v46 = vsel %vm204_vm0, %v4709_v62, 0.0  ;;  %v3819_v15 = vpop.permute.xlu1 %3818 }
 0x607   : > { %v4751_v33 = vadd.f32 %v4750_v46, %v4749_v10  ;;  %3883 = vst.msk [vmem:[#allocation3 + $0xf8] sm:$0xff] %vm1505_vm8, %v3819_v15  ;;  %v4651_v25 = vadd.f32 %v4650_v51, %v4649_v57 }
 0x609   : > { %v3817_v50 = vpop.permute.xlu0 %3816  ;;  %v4753_v40 = vadd.f32 %v4752_v31, %v4751_v33 }
 0x60a   : > { %3882 = vst.msk [vmem:[#allocation3 + $0xf0] sm:$0xff] %vm1505_vm8, %v3817_v50  ;;  %v4011_v2 = vpop.permute.xlu1 %4010 }
 0x60b   : > { %4075 = vst.msk [vmem:[#allocation3 + $0xf8] sm:$0xff] %vm1698_vm9, %v4011_v2 }
 0x60d   : > { %v4009_v38 = vpop.permute.xlu0 %4008  ;;  %v4297_v36 = vld [vmem:[#allocation3 + $0xe8] sm:$0xff] }
 0x60e   : > { %4074 = vst.msk [vmem:[#allocation3 + $0xf0] sm:$0xff] %vm1698_vm9, %v4009_v38  ;;  %5285 = vmatmul.mubr.msk.f32.gmra.mrb[28].mxu1 %vm1961_vm11, %v4297_v36  ;;  %v4203_v16 = vpop.permute.xlu1 %4202 }
 0x60f   : > { %4267 = vst.msk [vmem:[#allocation3 + $0xf8] sm:$0xff] %vm1891_vm10, %v4203_v16 }
 0x611   : > { %v4201_v4 = vpop.permute.xlu0 %4200 }
 0x612   : > { %4266 = vst.msk [vmem:[#allocation3 + $0xf0] sm:$0xff] %vm1891_vm10, %v4201_v4 }
 0x616   : > { %v4299_v14 = vld [vmem:[#allocation3 + $0xf8] sm:$0xff] }
 0x619   : > { %v4298_v21 = vld [vmem:[#allocation3 + $0xf0] sm:$0xff] }
 0x61a   : > { %5287 = vmatprep.mubr.msk.f32.mxu1 %vm1961_vm11, %v4298_v21  ;;  %v7681_v22 = vpop.f32.mrb[12].mxu1 }
 0x61b   : > { %5288 = vmatmul.mubr.msk.f32.gmra.mrb[30].mxu1 %vm1961_vm11, %v4299_v14  ;;  %v7684_v42 = vpop.f32.mrb[13].mxu1  ;;  %v4712_v35 = vmul.f32 %v7681_v22, %v7681_v22  ;;  %v4654_v1 = vsel %vm204_vm0, %v7681_v22, 0.0 }
 0x61c   : > { %v4652_v48 = vsel %vm204_vm0, %v7684_v42, 0.0  ;;  %v4711_v47 = vmul.f32 %v7684_v42, %v7684_v42 }
 0x61d   : > { %v4653_v12 = vadd.f32 %v4652_v48, %v4651_v25  ;;  %v4756_v45 = vsel %vm204_vm0, %v4712_v35, 0.0 }
 0x61e   : > { %v4754_v27 = vsel %vm204_vm0, %v4711_v47, 0.0 }
 0x61f   : > { %v4755_v32 = vadd.f32 %v4754_v27, %v4753_v40  ;;  %v4655_v41 = vadd.f32 %v4654_v1, %v4653_v12 }
 0x621   : > { %v4757_v43 = vadd.f32 %v4756_v45, %v4755_v32 }
 0x632   : > { %v7696_v7 = vpop.f32.mrb[14].mxu1 }
 0x633   : > { %v7698_v8 = vpop.f32.mrb[15].mxu1  ;;  %v4714_v13 = vmul.f32 %v7696_v7, %v7696_v7  ;;  %v4658_v54 = vsel %vm204_vm0, %v7696_v7, 0.0 }
 0x634   : > { %v4656_v3 = vsel %vm204_vm0, %v7698_v8, 0.0  ;;  %v4713_v18 = vmul.f32 %v7698_v8, %v7698_v8 }
 0x635   : > { %v4657_v37 = vadd.f32 %v4656_v3, %v4655_v41  ;;  %v4760_v55 = vsel %vm204_vm0, %v4714_v13, 0.0 }
 0x636   : > { %v4758_v53 = vsel %vm204_vm0, %v4713_v18, 0.0 }
 0x637   : > { %v4759_v56 = vadd.f32 %v4758_v53, %v4757_v43  ;;  %v4659_v10 = vadd.f32 %v4658_v54, %v4657_v37 }
 0x639   : > { %v4761_v26 = vadd.f32 %v4760_v55, %v4759_v56 }
 0x64a   : > { %v7710_v5 = vpop.f32.mrb[16].mxu1 }
 0x64b   : > { %v7712_v60 = vpop.f32.mrb[17].mxu1  ;;  %v4716_v23 = vmul.f32 %v7710_v5, %v7710_v5  ;;  %v4662_v44 = vsel %vm204_vm0, %v7710_v5, 0.0 }
 0x64c   : > { %v4660_v34 = vsel %vm204_vm0, %v7712_v60, 0.0  ;;  %v4715_v28 = vmul.f32 %v7712_v60, %v7712_v60 }
 0x64d   : > { %v4661_v6 = vadd.f32 %v4660_v34, %v4659_v10  ;;  %v4764_v62 = vsel %vm204_vm0, %v4716_v23, 0.0 }
 0x64e   : > { %v4762_v9 = vsel %vm204_vm0, %v4715_v28, 0.0 }
 0x64f   : > { %v4763_v30 = vadd.f32 %v4762_v9, %v4761_v26  ;;  %v4663_v59 = vadd.f32 %v4662_v44, %v4661_v6 }
 0x651   : > { %v4765_v29 = vadd.f32 %v4764_v62, %v4763_v30 }
 0x662   : > { %v7724_v57 = vpop.f32.mrb[18].mxu1 }
 0x663   : > { %v7726_v51 = vpop.f32.mrb[19].mxu1  ;;  %v4718_v46 = vmul.f32 %v7724_v57, %v7724_v57  ;;  %v4666_v31 = vsel %vm204_vm0, %v7724_v57, 0.0 }
 0x664   : > { %v4664_v15 = vsel %vm204_vm0, %v7726_v51, 0.0  ;;  %v4717_v33 = vmul.f32 %v7726_v51, %v7726_v51 }
 0x665   : > { %v4665_v25 = vadd.f32 %v4664_v15, %v4663_v59  ;;  %v4768_v38 = vsel %vm204_vm0, %v4718_v46, 0.0 }
 0x666   : > { %v4766_v50 = vsel %vm204_vm0, %v4717_v33, 0.0 }
 0x667   : > { %v4767_v40 = vadd.f32 %v4766_v50, %v4765_v29  ;;  %v4667_v2 = vadd.f32 %v4666_v31, %v4665_v25 }
 0x669   : > { %v4769_v36 = vadd.f32 %v4768_v38, %v4767_v40 }
 0x67a   : > { %v7738_v16 = vpop.f32.mrb[20].mxu1 }
 0x67b   : > { %v7740_v4 = vpop.f32.mrb[21].mxu1  ;;  %v4720_v14 = vmul.f32 %v7738_v16, %v7738_v16  ;;  %v4670_v47 = vsel %vm204_vm0, %v7738_v16, 0.0 }
 0x67c   : > { %v4668_v21 = vsel %vm204_vm0, %v7740_v4, 0.0  ;;  %v4719_v35 = vmul.f32 %v7740_v4, %v7740_v4 }
 0x67d   : > { %v4669_v48 = vadd.f32 %v4668_v21, %v4667_v2  ;;  %v4772_v32 = vsel %vm204_vm0, %v4720_v14, 0.0 }
 0x67e   : > { %v4770_v12 = vsel %vm204_vm0, %v4719_v35, 0.0 }
 0x67f   : > { %v4771_v1 = vadd.f32 %v4770_v12, %v4769_v36  ;;  %v4671_v27 = vadd.f32 %v4670_v47, %v4669_v48 }
 0x681   : > { %v4773_v41 = vadd.f32 %v4772_v32, %v4771_v1 }
 0x692   : > { %v7752_v45 = vpop.f32.mrb[22].mxu1 }
 0x693   : > { %v7754_v43 = vpop.f32.mrb[23].mxu1  ;;  %v4722_v13 = vmul.f32 %v7752_v45, %v7752_v45  ;;  %v4674_v54 = vsel %vm204_vm0, %v7752_v45, 0.0 }
 0x694   : > { %v4672_v3 = vsel %vm204_vm0, %v7754_v43, 0.0  ;;  %v4721_v18 = vmul.f32 %v7754_v43, %v7754_v43 }
 0x695   : > { %v4673_v37 = vadd.f32 %v4672_v3, %v4671_v27  ;;  %v4776_v55 = vsel %vm204_vm0, %v4722_v13, 0.0 }
 0x696   : > { %v4774_v53 = vsel %vm204_vm0, %v4721_v18, 0.0 }
 0x697   : > { %v4775_v56 = vadd.f32 %v4774_v53, %v4773_v41  ;;  %v4675_v10 = vadd.f32 %v4674_v54, %v4673_v37 }
 0x699   : > { %v4777_v26 = vadd.f32 %v4776_v55, %v4775_v56 }
 0x6aa   : > { %v7766_v23 = vpop.f32.mrb[24].mxu1 }
 0x6ab   : > { %v7768_v34 = vpop.f32.mrb[25].mxu1  ;;  %v4724_v28 = vmul.f32 %v7766_v23, %v7766_v23  ;;  %v4678_v30 = vsel %vm204_vm0, %v7766_v23, 0.0 }
 0x6ac   : > { %v4676_v6 = vsel %vm204_vm0, %v7768_v34, 0.0  ;;  %v4723_v44 = vmul.f32 %v7768_v34, %v7768_v34 }
 0x6ad   : > { %v4677_v9 = vadd.f32 %v4676_v6, %v4675_v10  ;;  %v4780_v46 = vsel %vm204_vm0, %v4724_v28, 0.0 }
 0x6ae   : > { %v4778_v59 = vsel %vm204_vm0, %v4723_v44, 0.0 }
 0x6af   : > { %v4779_v62 = vadd.f32 %v4778_v59, %v4777_v26  ;;  %v4679_v29 = vadd.f32 %v4678_v30, %v4677_v9 }
 0x6b1   : > { %v4781_v15 = vadd.f32 %v4780_v46, %v4779_v62 }
 0x6c2   : > { %v7780_v33 = vpop.f32.mrb[26].mxu1 }
 0x6c3   : > { %v7782_v25 = vpop.f32.mrb[27].mxu1  ;;  %v4726_v31 = vmul.f32 %v7780_v33, %v7780_v33  ;;  %v4682_v38 = vsel %vm204_vm0, %v7780_v33, 0.0 }
 0x6c4   : > { %v4680_v50 = vsel %vm204_vm0, %v7782_v25, 0.0  ;;  %v4725_v40 = vmul.f32 %v7782_v25, %v7782_v25 }
 0x6c5   : > { %v4681_v2 = vadd.f32 %v4680_v50, %v4679_v29  ;;  %v4784_v35 = vsel %vm204_vm0, %v4726_v31, 0.0 }
 0x6c6   : > { %v4782_v36 = vsel %vm204_vm0, %v4725_v40, 0.0 }
 0x6c7   : > { %v4783_v14 = vadd.f32 %v4782_v36, %v4781_v15  ;;  %v4683_v21 = vadd.f32 %v4682_v38, %v4681_v2 }
 0x6c9   : > { %v4785_v48 = vadd.f32 %v4784_v35, %v4783_v14 }
 0x6e1   : > { %v7794_v47 = vpop.f32.mrb[28].mxu1 }
 0x6e2   : > { %v7796_v12 = vpop.f32.mrb[29].mxu1  ;;  %v4728_v1 = vmul.f32 %v7794_v47, %v7794_v47  ;;  %v4686_v13 = vsel %vm204_vm0, %v7794_v47, 0.0 }
 0x6e3   : > { %v4684_v27 = vsel %vm204_vm0, %v7796_v12, 0.0  ;;  %v4727_v32 = vmul.f32 %v7796_v12, %v7796_v12 }
 0x6e4   : > { %v4685_v41 = vadd.f32 %v4684_v27, %v4683_v21  ;;  %v4788_v54 = vsel %vm204_vm0, %v4728_v1, 0.0 }
 0x6e5   : > { %v4786_v3 = vsel %vm204_vm0, %v4727_v32, 0.0 }
 0x6e6   : > { %v4787_v18 = vadd.f32 %v4786_v3, %v4785_v48  ;;  %v4687_v37 = vadd.f32 %v4686_v13, %v4685_v41 }
 0x6e8   : > { %v4789_v53 = vadd.f32 %v4788_v54, %v4787_v18 }
 0x6ee   : > { %v7808_v56 = vpop.f32.mrb[30].mxu1 }
 0x6ef   : > { %v7810_v10 = vpop.f32.mrb[31].mxu1  ;;  %v4730_v55 = vmul.f32 %v7808_v56, %v7808_v56  ;;  %v4690_v44 = vsel %vm204_vm0, %v7808_v56, 0.0 }
 0x6f0   : > { %v4688_v26 = vsel %vm204_vm0, %v7810_v10, 0.0  ;;  %v4729_v28 = vmul.f32 %v7810_v10, %v7810_v10 }
 0x6f1   : > { %v4689_v6 = vadd.f32 %v4688_v26, %v4687_v37  ;;  %v4792_v62 = vsel %vm204_vm0, %v4730_v55, 0.0 }
 0x6f2   : > { %v4790_v9 = vsel %vm204_vm0, %v4729_v28, 0.0 }
 0x6f3   : > { %v4691_v30 = vadd.f32 %v4690_v44, %v4689_v6  ;;  %v4791_v59 = vadd.f32 %v4790_v9, %v4789_v53 }
 0x6f5   : > { %v4692_v29 = vrot.slane %v4691_v30, 4  ;;  %v4793_v46 = vadd.f32 %v4792_v62, %v4791_v59 }
 0x6f7   : > { %v4693_v15 = vadd.f32 %v4692_v29, %v4691_v30  ;;  %v4794_v31 = vrot.slane %v4793_v46, 4 }
 0x6f9   : > { %v4694_v50 = vrot.slane %v4693_v15, 2  ;;  %v4795_v40 = vadd.f32 %v4794_v31, %v4793_v46 }
 0x6fb   : > { %v4695_v2 = vadd.f32 %v4694_v50, %v4693_v15  ;;  %v4796_v38 = vrot.slane %v4795_v40, 2  ;;  %v4870_v50 = vld [vmem:[%s5378_s17] sm:$0xff] }
 0x6fd   : > { %v4696_v36 = vrot.slane %v4695_v2, 1  ;;  %v4797_v14 = vadd.f32 %v4796_v38, %v4795_v40  ;;  %v4871_v40 = vld [vmem:[%s5378_s17 + $0x8] sm:$0xff]  ;;  %v4873_v38 = vld [vmem:[%s5378_s17 + $0x18] sm:$0xff] }
 0x6ff   : > { %v4697_v21 = vadd.f32 %v4696_v36, %v4695_v2  ;;  %v4798_v35 = vrot.slane %v4797_v14, 1  ;;  %v4872_v2 = vld [vmem:[%s5378_s17 + $0x10] sm:$0xff] }
 0x701   : > { %v7822_v48 = vmul.f32 0.00390625, %v4697_v21  ;;  %v4799_v1 = vadd.f32 %v4798_v35, %v4797_v14 }
 0x703   : > { %v4800_v27 = vmul.f32 0.00390625, %v4799_v1  ;;  %v4801_v32 = vmul.f32 %v7822_v48, %v7822_v48  ;;  %v4804_v41 = vsub.f32 %v7513_v49, %v7822_v48  ;;  %v4805_v13 = vsub.f32 %v7505_v24, %v7822_v48  ;;  %v4875_v1 = vld [vmem:[%s5378_s17 + $0x28] sm:$0xff] }
 0x704   : > { %v4806_v3 = vsub.f32 %v7547_v52, %v7822_v48  ;;  %v4807_v18 = vsub.f32 %v7544_v39, %v7822_v48  ;;  %v4808_v37 = vsub.f32 %v7575_v61, %v7822_v48  ;;  %v4809_v54 = vsub.f32 %v7572_v17, %v7822_v48 }
 0x705   : > { %v4802_v53 = vsub.f32 %v4800_v27, %v4801_v32  ;;  %v4810_v55 = vsub.f32 %v7603_v11, %v7822_v48  ;;  %v4811_v49 = vsub.f32 %v7600_v19, %v7822_v48  ;;  %v4812_v24 = vsub.f32 %v7631_v0, %v7822_v48  ;;  %v4876_v27 = vld [vmem:[%s5378_s17 + $0x30] sm:$0xff]  ;;  %v4877_v32 = vld [vmem:[%s5378_s17 + $0x38] sm:$0xff] }
 0x706   : > { %v4813_v52 = vsub.f32 %v7628_v58, %v7822_v48  ;;  %v4814_v39 = vsub.f32 %v7659_v63, %v7822_v48  ;;  %v4815_v61 = vsub.f32 %v7656_v20, %v7822_v48  ;;  %v4816_v17 = vsub.f32 %v7684_v42, %v7822_v48 }
 0x707   : > { %v4803_v26 = vmax.f32 %v4802_v53, 0.0  ;;  %v4817_v11 = vsub.f32 %v7681_v22, %v7822_v48  ;;  %v4818_v19 = vsub.f32 %v7698_v8, %v7822_v48  ;;  %v4819_v0 = vsub.f32 %v7696_v7, %v7822_v48  ;;  %v4880_v53 = vld [vmem:[%s5378_s17 + $0x50] sm:$0xff] }
 0x708   : > { %v4820_v58 = vsub.f32 %v7712_v60, %v7822_v48  ;;  %v4821_v63 = vsub.f32 %v7710_v5, %v7822_v48  ;;  %v4822_v20 = vsub.f32 %v7726_v51, %v7822_v48  ;;  %v4823_v42 = vsub.f32 %v7724_v57, %v7822_v48 }
 0x709   : > { %v4824_v22 = vsub.f32 %v7740_v4, %v7822_v48  ;;  %v4825_v8 = vsub.f32 %v7738_v16, %v7822_v48  ;;  %v4826_v7 = vsub.f32 %v7754_v43, %v7822_v48  ;;  %v4827_v60 = vsub.f32 %v7752_v45, %v7822_v48 }
 0x70a   : > { %v4828_v5 = vsub.f32 %v7768_v34, %v7822_v48  ;;  %v4829_v51 = vsub.f32 %v7766_v23, %v7822_v48  ;;  %v4830_v57 = vsub.f32 %v7782_v25, %v7822_v48  ;;  %v4831_v4 = vsub.f32 %v7780_v33, %v7822_v48 }
 0x70b   : > { %v4832_v16 = vsub.f32 %v7796_v12, %v7822_v48  ;;  %v4833_v43 = vsub.f32 %v7794_v47, %v7822_v48  ;;  %v4834_v45 = vsub.f32 %v7810_v10, %v7822_v48  ;;  %v4835_v34 = vsub.f32 %v7808_v56, %v7822_v48  ;;  %v4874_v48 = vld [vmem:[%s5378_s17 + $0x20] sm:$0xff] }
 0x70c   : > { %v4836_v28 = vadd.f32 1e-05, %v4803_v26 }
 0x70e   : > { %5324 = vrsqrt.f32 %v4836_v28 }
 0x718   : > { %v5325_v23 = vpop.eup %5324 }
 0x719   : > { %v4838_v6 = vmul.f32 %v5325_v23, %v4804_v41  ;;  %v4839_v25 = vmul.f32 %v5325_v23, %v4805_v13  ;;  %v4840_v33 = vmul.f32 %v5325_v23, %v4806_v3  ;;  %v4841_v44 = vmul.f32 %v5325_v23, %v4807_v18 }
 0x71a   : > { %v4842_v12 = vmul.f32 %v5325_v23, %v4808_v37  ;;  %v4843_v9 = vmul.f32 %v5325_v23, %v4809_v54  ;;  %v4844_v47 = vmul.f32 %v5325_v23, %v4810_v55  ;;  %v4845_v30 = vmul.f32 %v5325_v23, %v4811_v49  ;;  %v4878_v37 = vld [vmem:[%s5378_s17 + $0x40] sm:$0xff]  ;;  %v4879_v54 = vld [vmem:[%s5378_s17 + $0x48] sm:$0xff] }
 0x71b   : > { %v4846_v59 = vmul.f32 %v5325_v23, %v4812_v24  ;;  %v4847_v10 = vmul.f32 %v5325_v23, %v4813_v52  ;;  %v4848_v56 = vmul.f32 %v5325_v23, %v4814_v39  ;;  %v4849_v62 = vmul.f32 %v5325_v23, %v4815_v61  ;;  %v4881_v39 = vld [vmem:[%s5378_s17 + $0x58] sm:$0xff]  ;;  %v4882_v61 = vld [vmem:[%s5378_s17 + $0x60] sm:$0xff] }
 0x71c   : > { %v7890_v29 = vmul.f32 %v5325_v23, %v4816_v17  ;;  %v7892_v46 = vmul.f32 %v5325_v23, %v4817_v11  ;;  %v7894_v15 = vmul.f32 %v5325_v23, %v4818_v19  ;;  %v7896_v31 = vmul.f32 %v5325_v23, %v4819_v0  ;;  %v4883_v17 = vld [vmem:[%s5378_s17 + $0x68] sm:$0xff] }
 0x71d   : > { %v7902_v36 = vmul.f32 %v5325_v23, %v4820_v58  ;;  %v7904_v14 = vmul.f32 %v5325_v23, %v4821_v63  ;;  %v7906_v21 = vmul.f32 %v5325_v23, %v4822_v20  ;;  %v7908_v35 = vmul.f32 %v5325_v23, %v4823_v42  ;;  %v4884_v58 = vld [vmem:[%s5378_s17 + $0x70] sm:$0xff]  ;;  %v4885_v63 = vld [vmem:[%s5378_s17 + $0x78] sm:$0xff]  ;;  %v4886_v20 = vld [vmem:[%s5378_s17 + $0x80] sm:$0xff] }
 0x71e   : > { %v7914_v41 = vmul.f32 %v5325_v23, %v4824_v22  ;;  %v7916_v13 = vmul.f32 %v5325_v23, %v4825_v8  ;;  %v7918_v3 = vmul.f32 %v5325_v23, %v4826_v7  ;;  %v7920_v18 = vmul.f32 %v5325_v23, %v4827_v60  ;;  %v4887_v42 = vld [vmem:[%s5378_s17 + $0x88] sm:$0xff]  ;;  %v4888_v22 = vld [vmem:[%s5378_s17 + $0x90] sm:$0xff]  ;;  %v4889_v8 = vld [vmem:[%s5378_s17 + $0x98] sm:$0xff] }
 0x71f   : > { %v7925_v55 = vmul.f32 %v5325_v23, %v4828_v5  ;;  %v7927_v49 = vmul.f32 %v5325_v23, %v4829_v51  ;;  %v7929_v24 = vmul.f32 %v5325_v23, %v4830_v57  ;;  %v7931_v52 = vmul.f32 %v5325_v23, %v4831_v4  ;;  %v4890_v57 = vld [vmem:[%s5378_s17 + $0xa0] sm:$0xff]  ;;  %v4891_v4 = vld [vmem:[%s5378_s17 + $0xa8] sm:$0xff] }
 0x720   : > { %v7943_v26 = vmul.f32 %v5325_v23, %v4832_v16  ;;  %v7945_v11 = vmul.f32 %v5325_v23, %v4833_v43  ;;  %v7947_v19 = vmul.f32 %v5325_v23, %v4834_v45  ;;  %v7949_v0 = vmul.f32 %v5325_v23, %v4835_v34  ;;  %v4892_v16 = vld [vmem:[%s5378_s17 + $0xb0] sm:$0xff]  ;;  %v4893_v23 = vld [vmem:[%s5378_s17 + $0xb8] sm:$0xff] }
 0x721   : > { %v4902_v7 = vadd.f32 %v4870_v50, %v4838_v6  ;;  %v4903_v60 = vadd.f32 %v4871_v40, %v4839_v25  ;;  %v4904_v5 = vadd.f32 %v4872_v2, %v4840_v33  ;;  %v4905_v51 = vadd.f32 %v4873_v38, %v4841_v44  ;;  %v4895_v6 = vld [vmem:[%s5378_s17 + $0xc8] sm:$0xff] }
 0x722   : > { %8084 = vst [vmem:[#allocation4_spill] sm:$0xff] %v7949_v0  ;;  %v4906_v43 = vadd.f32 %v4874_v48, %v4842_v12  ;;  %v4907_v45 = vadd.f32 %v4875_v1, %v4843_v9  ;;  %v4908_v34 = vadd.f32 %v4876_v27, %v4844_v47  ;;  %v4909_v28 = vadd.f32 %v4877_v32, %v4845_v30  ;;  %v4894_v0 = vld [vmem:[%s5378_s17 + $0xc0] sm:$0xff]  ;;  %v4896_v12 = vld [vmem:[%s5378_s17 + $0xd0] sm:$0xff]  ;;  %v4897_v9 = vld [vmem:[%s5378_s17 + $0xd8] sm:$0xff] }
 0x723   : > { %v4910_v25 = vadd.f32 %v4878_v37, %v4846_v59  ;;  %v4911_v33 = vadd.f32 %v4879_v54, %v4847_v10  ;;  %v4912_v44 = vadd.f32 %v4880_v53, %v4848_v56  ;;  %v4913_v50 = vadd.f32 %v4881_v39, %v4849_v62  ;;  %4934 = vst.msk [vmem:[%s7941_s21] sm:$0xff] %vm204_vm0, %v4902_v7  ;;  %v4898_v47 = vld [vmem:[%s5378_s17 + $0xe0] sm:$0xff]  ;;  %v4899_v62 = vld [vmem:[%s5378_s17 + $0xe8] sm:$0xff] }
 0x724   : > { %4935 = vst.msk [vmem:[%s7941_s21 + $0x8] sm:$0xff] %vm204_vm0, %v4903_v60  ;;  %4936 = vst.msk [vmem:[%s7941_s21 + $0x10] sm:$0xff] %vm204_vm0, %v4904_v5  ;;  %v4914_v30 = vadd.f32 %v4882_v61, %v7890_v29  ;;  %v4915_v59 = vadd.f32 %v4883_v17, %v7892_v46  ;;  %v4916_v10 = vadd.f32 %v4884_v58, %v7894_v15  ;;  %v4900_v29 = vld [vmem:[%s5378_s17 + $0xf0] sm:$0xff]  ;;  %v4901_v46 = vld [vmem:[%s5378_s17 + $0xf8] sm:$0xff] }
 0x725   : > { %4937 = vst.msk [vmem:[%s7941_s21 + $0x18] sm:$0xff] %vm204_vm0, %v4905_v51  ;;  %v4917_v56 = vadd.f32 %v4885_v63, %v7896_v31  ;;  %4938 = vst.msk [vmem:[%s7941_s21 + $0x20] sm:$0xff] %vm204_vm0, %v4906_v43  ;;  %v4918_v15 = vadd.f32 %v4886_v20, %v7902_v36  ;;  %v4919_v40 = vadd.f32 %v4887_v42, %v7904_v14 }
 0x726   : > { %4939 = vst.msk [vmem:[%s7941_s21 + $0x28] sm:$0xff] %vm204_vm0, %v4907_v45  ;;  %4940 = vst.msk [vmem:[%s7941_s21 + $0x30] sm:$0xff] %vm204_vm0, %v4908_v34  ;;  %v4920_v31 = vadd.f32 %v4888_v22, %v7906_v21  ;;  %v4921_v2 = vadd.f32 %v4889_v8, %v7908_v35  ;;  %v4922_v38 = vadd.f32 %v4890_v57, %v7914_v41 }
 0x727   : > { %4941 = vst.msk [vmem:[%s7941_s21 + $0x38] sm:$0xff] %vm204_vm0, %v4909_v28  ;;  %4942 = vst.msk [vmem:[%s7941_s21 + $0x40] sm:$0xff] %vm204_vm0, %v4910_v25  ;;  %v4923_v36 = vadd.f32 %v4891_v4, %v7916_v13  ;;  %v4924_v14 = vadd.f32 %v4892_v16, %v7918_v3  ;;  %v4925_v21 = vadd.f32 %v4893_v23, %v7920_v18 }
 0x728   : > { %4943 = vst.msk [vmem:[%s7941_s21 + $0x48] sm:$0xff] %vm204_vm0, %v4911_v33  ;;  %4944 = vst.msk [vmem:[%s7941_s21 + $0x50] sm:$0xff] %vm204_vm0, %v4912_v44  ;;  %v4926_v35 = vadd.f32 %v4894_v0, %v7925_v55  ;;  %v4927_v48 = vadd.f32 %v4895_v6, %v7927_v49  ;;  %v4928_v1 = vadd.f32 %v4896_v12, %v7929_v24 }
 0x729   : > { %4945 = vst.msk [vmem:[%s7941_s21 + $0x58] sm:$0xff] %vm204_vm0, %v4913_v50  ;;  %4946 = vst.msk [vmem:[%s7941_s21 + $0x60] sm:$0xff] %vm204_vm0, %v4914_v30  ;;  %v4929_v27 = vadd.f32 %v4897_v9, %v7931_v52  ;;  %v4930_v32 = vadd.f32 %v4898_v47, %v7943_v26  ;;  %v4931_v41 = vadd.f32 %v4899_v62, %v7945_v11  ;;  %v8085_v3 = vld [vmem:[#allocation4_spill] sm:$0xff] }
 0x72a   : > { %4947 = vst.msk [vmem:[%s7941_s21 + $0x68] sm:$0xff] %vm204_vm0, %v4915_v59  ;;  %4948 = vst.msk [vmem:[%s7941_s21 + $0x70] sm:$0xff] %vm204_vm0, %v4916_v10  ;;  %v4932_v13 = vadd.f32 %v4900_v29, %v7947_v19  ;;  %v4933_v18 = vadd.f32 %v4901_v46, %v8085_v3 }
 0x72b   : > { %4949 = vst.msk [vmem:[%s7941_s21 + $0x78] sm:$0xff] %vm204_vm0, %v4917_v56  ;;  %4950 = vst.msk [vmem:[%s7941_s21 + $0x80] sm:$0xff] %vm204_vm0, %v4918_v15 }
 0x72c   : > { %4951 = vst.msk [vmem:[%s7941_s21 + $0x88] sm:$0xff] %vm204_vm0, %v4919_v40  ;;  %4952 = vst.msk [vmem:[%s7941_s21 + $0x90] sm:$0xff] %vm204_vm0, %v4920_v31 }
 0x72d   : > { %4953 = vst.msk [vmem:[%s7941_s21 + $0x98] sm:$0xff] %vm204_vm0, %v4921_v2  ;;  %4954 = vst.msk [vmem:[%s7941_s21 + $0xa0] sm:$0xff] %vm204_vm0, %v4922_v38 }
 0x72e   : > { %4955 = vst.msk [vmem:[%s7941_s21 + $0xa8] sm:$0xff] %vm204_vm0, %v4923_v36  ;;  %4956 = vst.msk [vmem:[%s7941_s21 + $0xb0] sm:$0xff] %vm204_vm0, %v4924_v14 }
 0x72f   : > { %4957 = vst.msk [vmem:[%s7941_s21 + $0xb8] sm:$0xff] %vm204_vm0, %v4925_v21  ;;  %4958 = vst.msk [vmem:[%s7941_s21 + $0xc0] sm:$0xff] %vm204_vm0, %v4926_v35 }
 0x730   : > { %4959 = vst.msk [vmem:[%s7941_s21 + $0xc8] sm:$0xff] %vm204_vm0, %v4927_v48  ;;  %4960 = vst.msk [vmem:[%s7941_s21 + $0xd0] sm:$0xff] %vm204_vm0, %v4928_v1 }
 0x731   : > { %4961 = vst.msk [vmem:[%s7941_s21 + $0xd8] sm:$0xff] %vm204_vm0, %v4929_v27  ;;  %4962 = vst.msk [vmem:[%s7941_s21 + $0xe0] sm:$0xff] %vm204_vm0, %v4930_v32 }
 0x732   : > { %4963 = vst.msk [vmem:[%s7941_s21 + $0xe8] sm:$0xff] %vm204_vm0, %v4931_v41  ;;  %4964 = vst.msk [vmem:[%s7941_s21 + $0xf0] sm:$0xff] %vm204_vm0, %v4932_v13 }
 0x733   : > { %4965 = vst.msk [vmem:[%s7941_s21 + $0xf8] sm:$0xff] %vm204_vm0, %v4933_v18 }
 0x734 PF: > { %s13_s12 = sadd.s32 1, %s5332_s12  }
 0x735   : > { %p10_p4 = scmp.ge.s32.totalorder %s13_s12, 4  }
 0x737   :  { %12 = sbr.rel (!%p10_p4) target bundleno = 1 (0x1), region = 65 }

</bundles_post_ra>
